<compile_context>
chip_gen: v6e
topology: v6e:2x2x1
jax: 0.10.0
libtpu: 0.0.40
codegen_flags: <defaults>
</compile_context>

<pallas_src>
import functools

import numpy as np
import jax
import jax.numpy as jnp
from jax.experimental import pallas as pl
from jax.experimental.pallas import tpu as pltpu

_EPS = 1e-5
_VMEM_LIMIT = 48 * 1024 * 1024   # <= ~48 MiB: safe headroom on v7x (64 MiB phys)


# ----------------------------------------------------------------------------
# In-kernel helpers
# ----------------------------------------------------------------------------
def _mish(y):
    """y * tanh(softplus(y)) = y * (1 - 2/((1+e^y)^2 + 1)); recip on the EUP."""
    t = 1.0 + jnp.exp(y)
    return y * (1.0 - 2.0 * pl.reciprocal(t * t + 1.0, approx=True))


def _gn2(x, gamma, beta, gm_ref, hw):
    """GroupNorm(2, 16) on a lane-flattened (H, W*16) tensor, one sample.

    gm_ref holds two full-width (1, W*16) group masks -> no lane slicing.
    """
    m0 = gm_ref[0:1, :]
    m1 = gm_ref[1:2, :]
    inv_cnt = 1.0 / float(hw * 8)
    mu0 = jnp.sum(x * m0) * inv_cnt
    mu1 = jnp.sum(x * m1) * inv_cnt
    d = x - (mu0 * m0 + mu1 * m1)
    v0 = jnp.sum(d * d * m0) * inv_cnt
    v1 = jnp.sum(d * d * m1) * inv_cnt
    inv = jax.lax.rsqrt(v0 + _EPS) * m0 + jax.lax.rsqrt(v1 + _EPS) * m1
    return d * inv * gamma + beta


# ----------------------------------------------------------------------------
# Fused per-frame kernel
# ----------------------------------------------------------------------------
def _fused_kernel(high_ref, low_ref, ahhi_ref, bwhi_ref, band_ref, mlow_ref,
                  mref_ref, gn_ref, gm_ref, ahf_ref, wcomb_ref, o_ref,
                  padh_ref, padr_ref, *, Hl, Wl):
    f32 = jnp.float32
    bf16 = jnp.bfloat16

    # -- 1) F.interpolate(high, (Hl,Wl), bilinear): two lane-dense MXU matmuls
    #       (columns via a block-diag Kronecker matrix so C=32 stays on lanes).
    t = jnp.dot(high_ref[0], bwhi_ref[...], preferred_element_type=f32)  # (Hh, Wl*32)
    hi_rs = jnp.dot(ahhi_ref[...], t.astype(bf16),
                    preferred_element_type=f32)                          # (Hl, Wl*32)

    # -- 2) row-halo scratch (horizontal zero-pad is folded into the banded
    #       weights; only the 2-row vertical halo needs zeros -> tiny stores).
    padh_ref[0:2, :] = jnp.zeros((2, Wl * 32), bf16)
    padh_ref[Hl + 2:Hl + 4, :] = jnp.zeros((2, Wl * 32), bf16)
    padh_ref[2:2 + Hl, :] = hi_rs.astype(bf16)

    # -- 3) DilatedParallelConvBlockD2(32,16): conv0 (1x1) folded into both
    #       dilated 3x3 branches; 5 banded matmuls, one per vertical offset
    #       dy in {-2,-1,0,1,2}; output is the interleaved cat([b1,b2]) layout.
    hi = jnp.dot(padh_ref[0:Hl, :], band_ref[0], preferred_element_type=f32)
    for r in range(1, 5):
        hi = hi + jnp.dot(padh_ref[r:r + Hl, :], band_ref[r],
                          preferred_element_type=f32)                    # (Hl, Wl*16)
    # GroupNorm(1, 16): one global mean/var per sample.
    inv_cnt = 1.0 / float(Hl * Wl * 16)
    mu = jnp.sum(hi) * inv_cnt
    d = hi - mu
    var = jnp.sum(d * d) * inv_cnt
    hi = d * jax.lax.rsqrt(var + _EPS) * gn_ref[0:1, :] + gn_ref[1:2, :]

    # -- 4) low branch: 1x1 conv 24->16 (block-diag kron weight) + GN(2,16) --
    lo = jnp.dot(low_ref[0], mlow_ref[...], preferred_element_type=f32)  # (Hl, Wl*16)
    lo = _gn2(lo, gn_ref[2:3, :], gn_ref[3:4, :], gm_ref, Hl * Wl)

    # -- 5) Mish(high + low); refine 3x3 (3 banded matmuls) + GN(2,16) + Mish
    fused = _mish(hi + lo)
    padr_ref[0:1, :] = jnp.zeros((1, Wl * 16), bf16)
    padr_ref[Hl + 1:Hl + 2, :] = jnp.zeros((1, Wl * 16), bf16)
    padr_ref[1:1 + Hl, :] = fused.astype(bf16)
    rf = jnp.dot(padr_ref[0:Hl, :], mref_ref[0], preferred_element_type=f32)
    for r in range(1, 3):
        rf = rf + jnp.dot(padr_ref[r:r + Hl, :], mref_ref[r],
                          preferred_element_type=f32)                    # (Hl, Wl*16)
    rf = _mish(_gn2(rf, gn_ref[4:5, :], gn_ref[5:6, :], gm_ref, Hl * Wl))

    # -- 6) SegNIN (Dropout2d=identity at eval; 1x1 16->1) folded into the
    #       final bilinear upsample + sigmoid; lane-dense (Ho, Wo) output.
    tmp = jnp.dot(rf.astype(bf16), wcomb_ref[...], preferred_element_type=f32)  # (Hl, Wo)
    y = jnp.dot(ahf_ref[...], tmp.astype(bf16), preferred_element_type=f32)     # (Ho, Wo)
    o_ref[...] = jax.nn.sigmoid(y)[None]


# ----------------------------------------------------------------------------
# Host-side constant / weight preparation
# ----------------------------------------------------------------------------
def _interp_matrix(out_size, in_size):
    """PyTorch bilinear (align_corners=False) interpolation matrix (out, in)."""
    A = np.zeros((out_size, in_size), np.float32)
    if in_size == 1:
        A[:, 0] = 1.0
        return A
    scale = in_size / out_size
    for o in range(out_size):
        src = max((o + 0.5) * scale - 0.5, 0.0)
        i0 = min(int(np.floor(src)), in_size - 1)
        i1 = min(i0 + 1, in_size - 1)
        w1 = src - i0
        A[o, i0] += 1.0 - w1
        A[o, i1] += w1
    return A


def _prepare_mats(params, Hh, Wh, Hl, Wl, Ho, Wo):
    """Build the banded conv matrices, kron 1x1 weights, interp matrices and
    tiled GroupNorm params (all lane-flattened, bf16 for MXU operands)."""
    bf16 = jnp.bfloat16
    dec = params['decoder']

    # Placement tensors P[kx, w_in, w_out]: horizontal zero-padding folded in
    # (out-of-range taps simply dropped).
    P1 = np.zeros((3, Wl, Wl), np.float32)   # dilation 1
    P2 = np.zeros((3, Wl, Wl), np.float32)   # dilation 2
    for kx in range(3):
        for wo in range(Wl):
            wi = wo + (kx - 1)
            if 0 <= wi < Wl:
                P1[kx, wi, wo] = 1.0
            wi = wo + 2 * (kx - 1)
            if 0 <= wi < Wl:
                P2[kx, wi, wo] = 1.0

    # Fold conv0 (1x1, 32->16) into the dilated 3x3 branches.  Exact: the
    # block has no norm / activation between conv0 and conv1/conv2, add=False.
    w0 = dec['up2_high']['conv0_w']                       # (32, 16)
    w1 = dec['up2_high']['conv1_w']                       # (3,3,8,8)
    w2 = dec['up2_high']['conv2_w']                       # (3,3,8,8)
    wA = jnp.einsum('cf,yxfd->yxcd', w0[:, :8], w1)       # (3,3,32,8) -> out ch 0..7
    wB = jnp.einsum('cf,yxfd->yxcd', w0[:, 8:], w2)       # (3,3,32,8) -> out ch 8..15
    wA = jnp.pad(wA, ((0, 0), (0, 0), (0, 0), (0, 8)))    # (3,3,32,16)
    wB = jnp.pad(wB, ((0, 0), (0, 0), (0, 0), (8, 0)))    # (3,3,32,16)

    def banded(P, w_ky):   # (3,Wl,Wl), (3,Cin,16) -> (Wl*Cin, Wl*16)
        cin = w_ky.shape[1]
        m = jnp.einsum('kiw,kcd->icwd', P, w_ky)
        return m.reshape(Wl * cin, Wl * 16)

    M1 = [banded(P1, wA[ky]) for ky in range(3)]          # dilation-1 rows
    M2 = [banded(P2, wB[ky]) for ky in range(3)]          # dilation-2 rows
    # One matrix per vertical offset dy=-2..2 (dy=0 serves both dilations).
    band = jnp.stack([M2[0], M1[0], M1[1] + M2[1], M1[2], M2[2]], 0).astype(bf16)

    mlow = jnp.kron(jnp.eye(Wl, dtype=jnp.float32),
                    dec['up2_low_w']).astype(bf16)        # (Wl*24, Wl*16)

    wr = dec['refine_conv_w']                             # (3,3,16,16)
    mref = jnp.stack([banded(P1, wr[ky]) for ky in range(3)], 0).astype(bf16)

    gn = jnp.stack([jnp.tile(v, Wl) for v in
                    (dec['up2_high']['bn_g'], dec['up2_high']['bn_b'],
                     dec['up2_bn2_g'], dec['up2_bn2_b'],
                     dec['refine_gn_g'], dec['refine_gn_b'])], 0)   # (6, Wl*16) f32

    m0 = np.tile(np.r_[np.ones(8, np.float32), np.zeros(8, np.float32)], Wl)
    gmask = jnp.asarray(np.stack([m0, 1.0 - m0], 0))      # (2, Wl*16) f32

    ahhi = jnp.asarray(_interp_matrix(Hl, Hh)).astype(bf16)              # (Hl, Hh)
    bwhi = jnp.asarray(np.kron(_interp_matrix(Wl, Wh).T,
                               np.eye(32, dtype=np.float32))).astype(bf16)  # (Wh*32, Wl*32)
    ahf = jnp.asarray(_interp_matrix(Ho, Hl)).astype(bf16)               # (Ho, Hl)
    awf = _interp_matrix(Wo, Wl)                                          # (Wo, Wl) np
    segw = params['segnin_w'].reshape(16)
    wcomb = jnp.einsum('ow,c->wco', awf, segw).reshape(Wl * 16, Wo).astype(bf16)

    return dict(ahhi=ahhi, bwhi=bwhi, band=band, mlow=mlow, mref=mref,
                gn=gn, gmask=gmask, ahf=ahf, wcomb=wcomb)


# ----------------------------------------------------------------------------
# Forward (glue)
# ----------------------------------------------------------------------------
def pnsnet_forward(low_fea_nchw, high_fea_nchw, params, *, origin_hw):
    """PNSNet tail: interpolate(high) + conbine_feature + SegNIN + upsample +
    sigmoid, fused into one Pallas kernel over the frame axis.

    low_fea_nchw : (N, 24, Hl, Wl)   high_fea_nchw: (N, 32, Hh, Wh)
    returns      : (N, 1, origin_H, origin_W) sigmoid mask.
    """
    low = jnp.transpose(low_fea_nchw, (0, 2, 3, 1)).astype(jnp.float32)
    high = jnp.transpose(high_fea_nchw, (0, 2, 3, 1)).astype(jnp.float32)
    N, Hl, Wl, Cl = low.shape
    _, Hh, Wh, Ch = high.shape
    Ho, Wo = origin_hw
    assert Ch == 32 and Cl == 24

    # lane-flattened channels-last inputs, bf16 (halves HBM traffic)
    high_f = high.reshape(N, Hh, Wh * Ch).astype(jnp.bfloat16)
    low_f = low.reshape(N, Hl, Wl * Cl).astype(jnp.bfloat16)

    m = _prepare_mats(params, Hh, Wh, Hl, Wl, Ho, Wo)

    kern = functools.partial(_fused_kernel, Hl=Hl, Wl=Wl)
    out = pl.pallas_call(
        kern,
        out_shape=jax.ShapeDtypeStruct((N, Ho, Wo), jnp.float32),
        grid=(N,),
        in_specs=[
            pl.BlockSpec((1, Hh, Wh * Ch), lambda n: (n, 0, 0)),
            pl.BlockSpec((1, Hl, Wl * Cl), lambda n: (n, 0, 0)),
            pl.BlockSpec((Hl, Hh), lambda n: (0, 0)),
            pl.BlockSpec((Wh * Ch, Wl * Ch), lambda n: (0, 0)),
            pl.BlockSpec((5, Wl * Ch, Wl * 16), lambda n: (0, 0, 0)),
            pl.BlockSpec((Wl * Cl, Wl * 16), lambda n: (0, 0)),
            pl.BlockSpec((3, Wl * 16, Wl * 16), lambda n: (0, 0, 0)),
            pl.BlockSpec((6, Wl * 16), lambda n: (0, 0)),
            pl.BlockSpec((2, Wl * 16), lambda n: (0, 0)),
            pl.BlockSpec((Ho, Hl), lambda n: (0, 0)),
            pl.BlockSpec((Wl * 16, Wo), lambda n: (0, 0)),
        ],
        out_specs=pl.BlockSpec((1, Ho, Wo), lambda n: (n, 0, 0)),
        scratch_shapes=[pltpu.VMEM((Hl + 4, Wl * Ch), jnp.bfloat16),   # high row-halo
                        pltpu.VMEM((Hl + 2, Wl * 16), jnp.bfloat16)],  # refine row-halo
        compiler_params=pltpu.CompilerParams(
            dimension_semantics=("parallel",),
            vmem_limit_bytes=_VMEM_LIMIT),
    )(high_f, low_f, m['ahhi'], m['bwhi'], m['band'], m['mlow'], m['mref'],
      m['gn'], m['gmask'], m['ahf'], m['wcomb'])

    return out.reshape(N, 1, Ho, Wo)


# ----------------------------------------------------------------------------
# Params (mapping from the PyTorch module's weights)
# ----------------------------------------------------------------------------
def init_params(key):
    ks = jax.random.split(key, 6)

    def w(k, shape):
        return 0.1 * jax.random.normal(k, shape, jnp.float32)

    ones16 = jnp.ones((16,), jnp.float32)
    zeros16 = jnp.zeros((16,), jnp.float32)
    dec = {
        'up2_high': {
            # conv0.weight (16,32,1,1) -> [:, :, 0, 0].T     => (Cin=32, Cout=16)
            'conv0_w': w(ks[0], (32, 16)),
            # conv1.weight (8,8,3,3)  -> permute(2,3,1,0)    => (ky,kx,Cin,Cout)
            'conv1_w': w(ks[1], (3, 3, 8, 8)),
            'conv2_w': w(ks[2], (3, 3, 8, 8)),
            'bn_g': ones16, 'bn_b': zeros16,                 # GroupNorm(1,16)
        },
        # up2_low.weight (16,24,1,1) -> [:, :, 0, 0].T       => (24, 16)
        'up2_low_w': w(ks[3], (24, 16)),
        'up2_bn2_g': ones16, 'up2_bn2_b': zeros16,           # GroupNorm(2,16)
        # refine[0].weight (16,16,3,3) -> permute(2,3,1,0)   => (3,3,16,16)
        'refine_conv_w': w(ks[4], (3, 3, 16, 16)),
        'refine_gn_g': ones16, 'refine_gn_b': zeros16,       # GroupNorm(2,16)
    }
    # SegNIN[1].weight (1,16,1,1) -> (16,)
    return {'decoder': dec, 'segnin_w': w(ks[5], (16,))}


if __name__ == "__main__":
    key = jax.random.PRNGKey(0)
    kp, kl, kh = jax.random.split(key, 3)
    params = init_params(kp)

    N = 2                                   # flattened (batch * clip) frames
    low_fea = jax.random.normal(kl, (N, 24, 16, 16), jnp.float32)
    high_fea = jax.random.normal(kh, (N, 32, 8, 8), jnp.float32)

    fwd = jax.jit(functools.partial(pnsnet_forward, origin_hw=(64, 64)))
    out = jax.block_until_ready(fwd(low_fea, high_fea, params))

    assert out.shape == (N, 1, 64, 64), out.shape
    assert bool(jnp.all(jnp.isfinite(out)))
    assert bool(jnp.all((out >= 0.0) & (out <= 1.0)))
    print("KERNEL_OK")
</pallas_src>

<mosaic_0001>
module attributes {stable_mosaic.version = 11 : i64} {
  func.func @_fused_kernel(%arg0: i32, %arg1: memref<1x8x256xbf16, #tpu.memory_space<vmem>>, %arg2: memref<1x16x384xbf16, #tpu.memory_space<vmem>>, %arg3: memref<16x8xbf16, #tpu.memory_space<vmem>>, %arg4: memref<256x512xbf16, #tpu.memory_space<vmem>>, %arg5: memref<5x512x256xbf16, #tpu.memory_space<vmem>>, %arg6: memref<384x256xbf16, #tpu.memory_space<vmem>>, %arg7: memref<3x256x256xbf16, #tpu.memory_space<vmem>>, %arg8: memref<6x256xf32, #tpu.memory_space<vmem>>, %arg9: memref<2x256xf32, #tpu.memory_space<vmem>>, %arg10: memref<64x16xbf16, #tpu.memory_space<vmem>>, %arg11: memref<256x64xbf16, #tpu.memory_space<vmem>>, %arg12: memref<1x64x64xf32, #tpu.memory_space<vmem>>, %arg13: memref<20x512xbf16, #tpu.memory_space<vmem>>, %arg14: memref<18x256xbf16, #tpu.memory_space<vmem>>) attributes {dimension_semantics = [#tpu.dimension_semantics<parallel>], iteration_bounds = array<i64: 2>, scalar_prefetch = 0 : i64, scratch_operands = 2 : i64, tpu.core_type = #tpu.core_type<tc>, window_params = [{transform_indices = @transform_0, window_bounds = array<i64: 1, 8, 256>}, {transform_indices = @transform_1, window_bounds = array<i64: 1, 16, 384>}, {pipeline_mode = #tpu.pipeline_mode<synchronous>, transform_indices = @transform_2, window_bounds = array<i64: 16, 8>}, {pipeline_mode = #tpu.pipeline_mode<synchronous>, transform_indices = @transform_3, window_bounds = array<i64: 256, 512>}, {pipeline_mode = #tpu.pipeline_mode<synchronous>, transform_indices = @transform_4, window_bounds = array<i64: 5, 512, 256>}, {pipeline_mode = #tpu.pipeline_mode<synchronous>, transform_indices = @transform_5, window_bounds = array<i64: 384, 256>}, {pipeline_mode = #tpu.pipeline_mode<synchronous>, transform_indices = @transform_6, window_bounds = array<i64: 3, 256, 256>}, {pipeline_mode = #tpu.pipeline_mode<synchronous>, transform_indices = @transform_7, window_bounds = array<i64: 6, 256>}, {pipeline_mode = #tpu.pipeline_mode<synchronous>, transform_indices = @transform_8, window_bounds = array<i64: 2, 256>}, {pipeline_mode = #tpu.pipeline_mode<synchronous>, transform_indices = @transform_9, window_bounds = array<i64: 64, 16>}, {pipeline_mode = #tpu.pipeline_mode<synchronous>, transform_indices = @transform_10, window_bounds = array<i64: 256, 64>}, {transform_indices = @transform_11, window_bounds = array<i64: 1, 64, 64>}]} {
    %c0 = arith.constant 0 : index
    %c0_0 = arith.constant 0 : index
    %c0_1 = arith.constant 0 : index
    %0 = vector.load %arg1[%c0, %c0_0, %c0_1] : memref<1x8x256xbf16, #tpu.memory_space<vmem>>, vector<1x8x256xbf16>
    %1 = vector.shape_cast %0 : vector<1x8x256xbf16> to vector<8x256xbf16>
    %c0_2 = arith.constant 0 : index
    %c0_3 = arith.constant 0 : index
    %2 = vector.load %arg4[%c0_2, %c0_3] : memref<256x512xbf16, #tpu.memory_space<vmem>>, vector<256x512xbf16>
    %cst = arith.constant dense<0.000000e+00> : vector<8x512xf32>
    %3 = tpu.matmul %1, %2, %cst {dimension_numbers = #tpu.dot_dimension_numbers<[1], [0], [0], [1], [0, 0, 1, 1], [], []>} : vector<8x256xbf16>, vector<256x512xbf16>, vector<8x512xf32> -> vector<8x512xf32>
    %c0_4 = arith.constant 0 : index
    %c0_5 = arith.constant 0 : index
    %4 = vector.load %arg3[%c0_4, %c0_5] : memref<16x8xbf16, #tpu.memory_space<vmem>>, vector<16x8xbf16>
    %5 = arith.truncf %3 : vector<8x512xf32> to vector<8x512xbf16>
    %cst_6 = arith.constant dense<0.000000e+00> : vector<16x512xf32>
    %6 = tpu.matmul %4, %5, %cst_6 {dimension_numbers = #tpu.dot_dimension_numbers<[1], [0], [0], [1], [0, 0, 1, 1], [], []>} : vector<16x8xbf16>, vector<8x512xbf16>, vector<16x512xf32> -> vector<16x512xf32>
    %cst_7 = arith.constant 0.000000e+00 : bf16
    %7 = vector.broadcast %cst_7 : bf16 to vector<2x512xbf16>
    %c0_8 = arith.constant 0 : index
    %c0_9 = arith.constant 0 : index
    %8 = vector.load %arg13[%c0_8, %c0_9] : memref<20x512xbf16, #tpu.memory_space<vmem>>, vector<2x512xbf16>
    tpu.vector_store %arg13[%c0_8, %c0_9], %7 {strides = array<i32>} : memref<20x512xbf16, #tpu.memory_space<vmem>>, vector<2x512xbf16>,
    %cst_10 = arith.constant 0.000000e+00 : bf16
    %9 = vector.broadcast %cst_10 : bf16 to vector<2x512xbf16>
    %c18 = arith.constant 18 : index
    %c0_11 = arith.constant 0 : index
    %10 = vector.load %arg13[%c18, %c0_11] : memref<20x512xbf16, #tpu.memory_space<vmem>>, vector<2x512xbf16>
    tpu.vector_store %arg13[%c18, %c0_11], %9 {strides = array<i32>} : memref<20x512xbf16, #tpu.memory_space<vmem>>, vector<2x512xbf16>,
    %11 = arith.truncf %6 : vector<16x512xf32> to vector<16x512xbf16>
    %c2 = arith.constant 2 : index
    %c0_12 = arith.constant 0 : index
    %12 = vector.load %arg13[%c2, %c0_12] : memref<20x512xbf16, #tpu.memory_space<vmem>>, vector<16x512xbf16>
    tpu.vector_store %arg13[%c2, %c0_12], %11 {strides = array<i32>} : memref<20x512xbf16, #tpu.memory_space<vmem>>, vector<16x512xbf16>,
    %c0_13 = arith.constant 0 : index
    %c0_14 = arith.constant 0 : index
    %13 = vector.load %arg13[%c0_13, %c0_14] : memref<20x512xbf16, #tpu.memory_space<vmem>>, vector<16x512xbf16>
    %c0_15 = arith.constant 0 : index
    %c0_16 = arith.constant 0 : index
    %c0_17 = arith.constant 0 : index
    %14 = vector.load %arg5[%c0_15, %c0_16, %c0_17] : memref<5x512x256xbf16, #tpu.memory_space<vmem>>, vector<1x512x256xbf16>
    %15 = vector.shape_cast %14 : vector<1x512x256xbf16> to vector<512x256xbf16>
    %cst_18 = arith.constant dense<0.000000e+00> : vector<16x256xf32>
    %16 = tpu.matmul %13, %15, %cst_18 {dimension_numbers = #tpu.dot_dimension_numbers<[1], [0], [0], [1], [0, 0, 1, 1], [], []>} : vector<16x512xbf16>, vector<512x256xbf16>, vector<16x256xf32> -> vector<16x256xf32>
    %c1 = arith.constant 1 : index
    %c0_19 = arith.constant 0 : index
    %17 = vector.load %arg13[%c1, %c0_19] : memref<20x512xbf16, #tpu.memory_space<vmem>>, vector<16x512xbf16>
    %c1_20 = arith.constant 1 : index
    %c0_21 = arith.constant 0 : index
    %c0_22 = arith.constant 0 : index
    %18 = vector.load %arg5[%c1_20, %c0_21, %c0_22] : memref<5x512x256xbf16, #tpu.memory_space<vmem>>, vector<1x512x256xbf16>
    %19 = vector.shape_cast %18 : vector<1x512x256xbf16> to vector<512x256xbf16>
    %cst_23 = arith.constant dense<0.000000e+00> : vector<16x256xf32>
    %20 = tpu.matmul %17, %19, %cst_23 {dimension_numbers = #tpu.dot_dimension_numbers<[1], [0], [0], [1], [0, 0, 1, 1], [], []>} : vector<16x512xbf16>, vector<512x256xbf16>, vector<16x256xf32> -> vector<16x256xf32>
    %21 = arith.addf %16, %20 : vector<16x256xf32>
    %c2_24 = arith.constant 2 : index
    %c0_25 = arith.constant 0 : index
    %22 = vector.load %arg13[%c2_24, %c0_25] : memref<20x512xbf16, #tpu.memory_space<vmem>>, vector<16x512xbf16>
    %c2_26 = arith.constant 2 : index
    %c0_27 = arith.constant 0 : index
    %c0_28 = arith.constant 0 : index
    %23 = vector.load %arg5[%c2_26, %c0_27, %c0_28] : memref<5x512x256xbf16, #tpu.memory_space<vmem>>, vector<1x512x256xbf16>
    %24 = vector.shape_cast %23 : vector<1x512x256xbf16> to vector<512x256xbf16>
    %cst_29 = arith.constant dense<0.000000e+00> : vector<16x256xf32>
    %25 = tpu.matmul %22, %24, %cst_29 {dimension_numbers = #tpu.dot_dimension_numbers<[1], [0], [0], [1], [0, 0, 1, 1], [], []>} : vector<16x512xbf16>, vector<512x256xbf16>, vector<16x256xf32> -> vector<16x256xf32>
    %26 = arith.addf %21, %25 : vector<16x256xf32>
    %c3 = arith.constant 3 : index
    %c0_30 = arith.constant 0 : index
    %27 = vector.load %arg13[%c3, %c0_30] : memref<20x512xbf16, #tpu.memory_space<vmem>>, vector<16x512xbf16>
    %c3_31 = arith.constant 3 : index
    %c0_32 = arith.constant 0 : index
    %c0_33 = arith.constant 0 : index
    %28 = vector.load %arg5[%c3_31, %c0_32, %c0_33] : memref<5x512x256xbf16, #tpu.memory_space<vmem>>, vector<1x512x256xbf16>
    %29 = vector.shape_cast %28 : vector<1x512x256xbf16> to vector<512x256xbf16>
    %cst_34 = arith.constant dense<0.000000e+00> : vector<16x256xf32>
    %30 = tpu.matmul %27, %29, %cst_34 {dimension_numbers = #tpu.dot_dimension_numbers<[1], [0], [0], [1], [0, 0, 1, 1], [], []>} : vector<16x512xbf16>, vector<512x256xbf16>, vector<16x256xf32> -> vector<16x256xf32>
    %31 = arith.addf %26, %30 : vector<16x256xf32>
    %c4 = arith.constant 4 : index
    %c0_35 = arith.constant 0 : index
    %32 = vector.load %arg13[%c4, %c0_35] : memref<20x512xbf16, #tpu.memory_space<vmem>>, vector<16x512xbf16>
    %c4_36 = arith.constant 4 : index
    %c0_37 = arith.constant 0 : index
    %c0_38 = arith.constant 0 : index
    %33 = vector.load %arg5[%c4_36, %c0_37, %c0_38] : memref<5x512x256xbf16, #tpu.memory_space<vmem>>, vector<1x512x256xbf16>
    %34 = vector.shape_cast %33 : vector<1x512x256xbf16> to vector<512x256xbf16>
    %cst_39 = arith.constant dense<0.000000e+00> : vector<16x256xf32>
    %35 = tpu.matmul %32, %34, %cst_39 {dimension_numbers = #tpu.dot_dimension_numbers<[1], [0], [0], [1], [0, 0, 1, 1], [], []>} : vector<16x512xbf16>, vector<512x256xbf16>, vector<16x256xf32> -> vector<16x256xf32>
    %36 = arith.addf %31, %35 : vector<16x256xf32>
    %37 = vector.shape_cast %36 : vector<16x256xf32> to vector<1x16x256xf32>
    %cst_40 = arith.constant dense<0.000000e+00> : vector<1xf32>
    %38 = vector.multi_reduction <add>, %37, %cst_40 [1, 2] : vector<1x16x256xf32> to vector<1xf32>
    %39 = vector.shape_cast %38 : vector<1xf32> to vector<1x1x1xf32>
    %40 = vector.extract %39[0, 0, 0] : f32 from vector<1x1x1xf32>
    %cst_41 = arith.constant 2.44140625E-4 : f32
    %41 = arith.mulf %40, %cst_41 : f32
    %42 = vector.broadcast %41 : f32 to vector<16x256xf32>
    %43 = arith.subf %36, %42 : vector<16x256xf32>
    %44 = arith.mulf %43, %43 : vector<16x256xf32>
    %45 = vector.shape_cast %44 : vector<16x256xf32> to vector<1x16x256xf32>
    %cst_42 = arith.constant dense<0.000000e+00> : vector<1xf32>
    %46 = vector.multi_reduction <add>, %45, %cst_42 [1, 2] : vector<1x16x256xf32> to vector<1xf32>
    %47 = vector.shape_cast %46 : vector<1xf32> to vector<1x1x1xf32>
    %48 = vector.extract %47[0, 0, 0] : f32 from vector<1x1x1xf32>
    %cst_43 = arith.constant 2.44140625E-4 : f32
    %49 = arith.mulf %48, %cst_43 : f32
    %cst_44 = arith.constant 9.99999974E-6 : f32
    %50 = arith.addf %49, %cst_44 : f32
    %51 = math.rsqrt %50 : f32
    %52 = vector.broadcast %51 : f32 to vector<16x256xf32>
    %53 = arith.mulf %43, %52 : vector<16x256xf32>
    %c0_45 = arith.constant 0 : index
    %c0_46 = arith.constant 0 : index
    %54 = vector.load %arg8[%c0_45, %c0_46] : memref<6x256xf32, #tpu.memory_space<vmem>>, vector<1x256xf32>
    %55 = vector.broadcast %54 : vector<1x256xf32> to vector<16x256xf32>
    %56 = arith.mulf %53, %55 : vector<16x256xf32>
    %c1_47 = arith.constant 1 : index
    %c0_48 = arith.constant 0 : index
    %57 = vector.load %arg8[%c1_47, %c0_48] : memref<6x256xf32, #tpu.memory_space<vmem>>, vector<1x256xf32>
    %58 = vector.broadcast %57 : vector<1x256xf32> to vector<16x256xf32>
    %59 = arith.addf %56, %58 : vector<16x256xf32>
    %c0_49 = arith.constant 0 : index
    %c0_50 = arith.constant 0 : index
    %c0_51 = arith.constant 0 : index
    %60 = vector.load %arg2[%c0_49, %c0_50, %c0_51] : memref<1x16x384xbf16, #tpu.memory_space<vmem>>, vector<1x16x384xbf16>
    %61 = vector.shape_cast %60 : vector<1x16x384xbf16> to vector<16x384xbf16>
    %c0_52 = arith.constant 0 : index
    %c0_53 = arith.constant 0 : index
    %62 = vector.load %arg6[%c0_52, %c0_53] : memref<384x256xbf16, #tpu.memory_space<vmem>>, vector<384x256xbf16>
    %cst_54 = arith.constant dense<0.000000e+00> : vector<16x256xf32>
    %63 = tpu.matmul %61, %62, %cst_54 {dimension_numbers = #tpu.dot_dimension_numbers<[1], [0], [0], [1], [0, 0, 1, 1], [], []>} : vector<16x384xbf16>, vector<384x256xbf16>, vector<16x256xf32> -> vector<16x256xf32>
    %c2_55 = arith.constant 2 : index
    %c0_56 = arith.constant 0 : index
    %64 = vector.load %arg8[%c2_55, %c0_56] : memref<6x256xf32, #tpu.memory_space<vmem>>, vector<1x256xf32>
    %c3_57 = arith.constant 3 : index
    %c0_58 = arith.constant 0 : index
    %65 = vector.load %arg8[%c3_57, %c0_58] : memref<6x256xf32, #tpu.memory_space<vmem>>, vector<1x256xf32>
    %c0_59 = arith.constant 0 : index
    %c0_60 = arith.constant 0 : index
    %66 = vector.load %arg9[%c0_59, %c0_60] : memref<2x256xf32, #tpu.memory_space<vmem>>, vector<1x256xf32>
    %c1_61 = arith.constant 1 : index
    %c0_62 = arith.constant 0 : index
    %67 = vector.load %arg9[%c1_61, %c0_62] : memref<2x256xf32, #tpu.memory_space<vmem>>, vector<1x256xf32>
    %68 = vector.broadcast %66 : vector<1x256xf32> to vector<16x256xf32>
    %69 = arith.mulf %63, %68 : vector<16x256xf32>
    %70 = vector.shape_cast %69 : vector<16x256xf32> to vector<1x16x256xf32>
    %cst_63 = arith.constant dense<0.000000e+00> : vector<1xf32>
    %71 = vector.multi_reduction <add>, %70, %cst_63 [1, 2] : vector<1x16x256xf32> to vector<1xf32>
    %72 = vector.shape_cast %71 : vector<1xf32> to vector<1x1x1xf32>
    %73 = vector.extract %72[0, 0, 0] : f32 from vector<1x1x1xf32>
    %cst_64 = arith.constant 4.8828125E-4 : f32
    %74 = arith.mulf %73, %cst_64 : f32
    %75 = vector.broadcast %67 : vector<1x256xf32> to vector<16x256xf32>
    %76 = arith.mulf %63, %75 : vector<16x256xf32>
    %77 = vector.shape_cast %76 : vector<16x256xf32> to vector<1x16x256xf32>
    %cst_65 = arith.constant dense<0.000000e+00> : vector<1xf32>
    %78 = vector.multi_reduction <add>, %77, %cst_65 [1, 2] : vector<1x16x256xf32> to vector<1xf32>
    %79 = vector.shape_cast %78 : vector<1xf32> to vector<1x1x1xf32>
    %80 = vector.extract %79[0, 0, 0] : f32 from vector<1x1x1xf32>
    %cst_66 = arith.constant 4.8828125E-4 : f32
    %81 = arith.mulf %80, %cst_66 : f32
    %82 = vector.broadcast %74 : f32 to vector<1x256xf32>
    %83 = arith.mulf %82, %66 : vector<1x256xf32>
    %84 = vector.broadcast %81 : f32 to vector<1x256xf32>
    %85 = arith.mulf %84, %67 : vector<1x256xf32>
    %86 = arith.addf %83, %85 : vector<1x256xf32>
    %87 = vector.broadcast %86 : vector<1x256xf32> to vector<16x256xf32>
    %88 = arith.subf %63, %87 : vector<16x256xf32>
    %89 = arith.mulf %88, %88 : vector<16x256xf32>
    %90 = vector.broadcast %66 : vector<1x256xf32> to vector<16x256xf32>
    %91 = arith.mulf %89, %90 : vector<16x256xf32>
    %92 = vector.shape_cast %91 : vector<16x256xf32> to vector<1x16x256xf32>
    %cst_67 = arith.constant dense<0.000000e+00> : vector<1xf32>
    %93 = vector.multi_reduction <add>, %92, %cst_67 [1, 2] : vector<1x16x256xf32> to vector<1xf32>
    %94 = vector.shape_cast %93 : vector<1xf32> to vector<1x1x1xf32>
    %95 = vector.extract %94[0, 0, 0] : f32 from vector<1x1x1xf32>
    %cst_68 = arith.constant 4.8828125E-4 : f32
    %96 = arith.mulf %95, %cst_68 : f32
    %97 = arith.mulf %88, %88 : vector<16x256xf32>
    %98 = vector.broadcast %67 : vector<1x256xf32> to vector<16x256xf32>
    %99 = arith.mulf %97, %98 : vector<16x256xf32>
    %100 = vector.shape_cast %99 : vector<16x256xf32> to vector<1x16x256xf32>
    %cst_69 = arith.constant dense<0.000000e+00> : vector<1xf32>
    %101 = vector.multi_reduction <add>, %100, %cst_69 [1, 2] : vector<1x16x256xf32> to vector<1xf32>
    %102 = vector.shape_cast %101 : vector<1xf32> to vector<1x1x1xf32>
    %103 = vector.extract %102[0, 0, 0] : f32 from vector<1x1x1xf32>
    %cst_70 = arith.constant 4.8828125E-4 : f32
    %104 = arith.mulf %103, %cst_70 : f32
    %cst_71 = arith.constant 9.99999974E-6 : f32
    %105 = arith.addf %96, %cst_71 : f32
    %106 = math.rsqrt %105 : f32
    %107 = vector.broadcast %106 : f32 to vector<1x256xf32>
    %108 = arith.mulf %107, %66 : vector<1x256xf32>
    %cst_72 = arith.constant 9.99999974E-6 : f32
    %109 = arith.addf %104, %cst_72 : f32
    %110 = math.rsqrt %109 : f32
    %111 = vector.broadcast %110 : f32 to vector<1x256xf32>
    %112 = arith.mulf %111, %67 : vector<1x256xf32>
    %113 = arith.addf %108, %112 : vector<1x256xf32>
    %114 = vector.broadcast %113 : vector<1x256xf32> to vector<16x256xf32>
    %115 = arith.mulf %88, %114 : vector<16x256xf32>
    %116 = vector.broadcast %64 : vector<1x256xf32> to vector<16x256xf32>
    %117 = arith.mulf %115, %116 : vector<16x256xf32>
    %118 = vector.broadcast %65 : vector<1x256xf32> to vector<16x256xf32>
    %119 = arith.addf %117, %118 : vector<16x256xf32>
    %120 = arith.addf %59, %119 : vector<16x256xf32>
    %121 = math.exp %120 : vector<16x256xf32>
    %cst_73 = arith.constant 1.000000e+00 : f32
    %122 = vector.broadcast %cst_73 : f32 to vector<16x256xf32>
    %123 = arith.addf %122, %121 : vector<16x256xf32>
    %124 = arith.mulf %123, %123 : vector<16x256xf32>
    %cst_74 = arith.constant 1.000000e+00 : f32
    %125 = vector.broadcast %cst_74 : f32 to vector<16x256xf32>
    %126 = arith.addf %124, %125 : vector<16x256xf32>
    %127 = tpu.reciprocal %126 {approx = true} : vector<16x256xf32> -> vector<16x256xf32>
    %cst_75 = arith.constant 2.000000e+00 : f32
    %128 = vector.broadcast %cst_75 : f32 to vector<16x256xf32>
    %129 = arith.mulf %128, %127 : vector<16x256xf32>
    %cst_76 = arith.constant 1.000000e+00 : f32
    %130 = vector.broadcast %cst_76 : f32 to vector<16x256xf32>
    %131 = arith.subf %130, %129 : vector<16x256xf32>
    %132 = arith.mulf %120, %131 : vector<16x256xf32>
    %cst_77 = arith.constant 0.000000e+00 : bf16
    %133 = vector.broadcast %cst_77 : bf16 to vector<1x256xbf16>
    %c0_78 = arith.constant 0 : index
    %c0_79 = arith.constant 0 : index
    %134 = vector.load %arg14[%c0_78, %c0_79] : memref<18x256xbf16, #tpu.memory_space<vmem>>, vector<1x256xbf16>
    tpu.vector_store %arg14[%c0_78, %c0_79], %133 {strides = array<i32>} : memref<18x256xbf16, #tpu.memory_space<vmem>>, vector<1x256xbf16>,
    %cst_80 = arith.constant 0.000000e+00 : bf16
    %135 = vector.broadcast %cst_80 : bf16 to vector<1x256xbf16>
    %c17 = arith.constant 17 : index
    %c0_81 = arith.constant 0 : index
    %136 = vector.load %arg14[%c17, %c0_81] : memref<18x256xbf16, #tpu.memory_space<vmem>>, vector<1x256xbf16>
    tpu.vector_store %arg14[%c17, %c0_81], %135 {strides = array<i32>} : memref<18x256xbf16, #tpu.memory_space<vmem>>, vector<1x256xbf16>,
    %137 = arith.truncf %132 : vector<16x256xf32> to vector<16x256xbf16>
    %c1_82 = arith.constant 1 : index
    %c0_83 = arith.constant 0 : index
    %138 = vector.load %arg14[%c1_82, %c0_83] : memref<18x256xbf16, #tpu.memory_space<vmem>>, vector<16x256xbf16>
    tpu.vector_store %arg14[%c1_82, %c0_83], %137 {strides = array<i32>} : memref<18x256xbf16, #tpu.memory_space<vmem>>, vector<16x256xbf16>,
    %c0_84 = arith.constant 0 : index
    %c0_85 = arith.constant 0 : index
    %139 = vector.load %arg14[%c0_84, %c0_85] : memref<18x256xbf16, #tpu.memory_space<vmem>>, vector<16x256xbf16>
    %c0_86 = arith.constant 0 : index
    %c0_87 = arith.constant 0 : index
    %c0_88 = arith.constant 0 : index
    %140 = vector.load %arg7[%c0_86, %c0_87, %c0_88] : memref<3x256x256xbf16, #tpu.memory_space<vmem>>, vector<1x256x256xbf16>
    %141 = vector.shape_cast %140 : vector<1x256x256xbf16> to vector<256x256xbf16>
    %cst_89 = arith.constant dense<0.000000e+00> : vector<16x256xf32>
    %142 = tpu.matmul %139, %141, %cst_89 {dimension_numbers = #tpu.dot_dimension_numbers<[1], [0], [0], [1], [0, 0, 1, 1], [], []>} : vector<16x256xbf16>, vector<256x256xbf16>, vector<16x256xf32> -> vector<16x256xf32>
    %c1_90 = arith.constant 1 : index
    %c0_91 = arith.constant 0 : index
    %143 = vector.load %arg14[%c1_90, %c0_91] : memref<18x256xbf16, #tpu.memory_space<vmem>>, vector<16x256xbf16>
    %c1_92 = arith.constant 1 : index
    %c0_93 = arith.constant 0 : index
    %c0_94 = arith.constant 0 : index
    %144 = vector.load %arg7[%c1_92, %c0_93, %c0_94] : memref<3x256x256xbf16, #tpu.memory_space<vmem>>, vector<1x256x256xbf16>
    %145 = vector.shape_cast %144 : vector<1x256x256xbf16> to vector<256x256xbf16>
    %cst_95 = arith.constant dense<0.000000e+00> : vector<16x256xf32>
    %146 = tpu.matmul %143, %145, %cst_95 {dimension_numbers = #tpu.dot_dimension_numbers<[1], [0], [0], [1], [0, 0, 1, 1], [], []>} : vector<16x256xbf16>, vector<256x256xbf16>, vector<16x256xf32> -> vector<16x256xf32>
    %147 = arith.addf %142, %146 : vector<16x256xf32>
    %c2_96 = arith.constant 2 : index
    %c0_97 = arith.constant 0 : index
    %148 = vector.load %arg14[%c2_96, %c0_97] : memref<18x256xbf16, #tpu.memory_space<vmem>>, vector<16x256xbf16>
    %c2_98 = arith.constant 2 : index
    %c0_99 = arith.constant 0 : index
    %c0_100 = arith.constant 0 : index
    %149 = vector.load %arg7[%c2_98, %c0_99, %c0_100] : memref<3x256x256xbf16, #tpu.memory_space<vmem>>, vector<1x256x256xbf16>
    %150 = vector.shape_cast %149 : vector<1x256x256xbf16> to vector<256x256xbf16>
    %cst_101 = arith.constant dense<0.000000e+00> : vector<16x256xf32>
    %151 = tpu.matmul %148, %150, %cst_101 {dimension_numbers = #tpu.dot_dimension_numbers<[1], [0], [0], [1], [0, 0, 1, 1], [], []>} : vector<16x256xbf16>, vector<256x256xbf16>, vector<16x256xf32> -> vector<16x256xf32>
    %152 = arith.addf %147, %151 : vector<16x256xf32>
    %c4_102 = arith.constant 4 : index
    %c0_103 = arith.constant 0 : index
    %153 = vector.load %arg8[%c4_102, %c0_103] : memref<6x256xf32, #tpu.memory_space<vmem>>, vector<1x256xf32>
    %c5 = arith.constant 5 : index
    %c0_104 = arith.constant 0 : index
    %154 = vector.load %arg8[%c5, %c0_104] : memref<6x256xf32, #tpu.memory_space<vmem>>, vector<1x256xf32>
    %c0_105 = arith.constant 0 : index
    %c0_106 = arith.constant 0 : index
    %155 = vector.load %arg9[%c0_105, %c0_106] : memref<2x256xf32, #tpu.memory_space<vmem>>, vector<1x256xf32>
    %c1_107 = arith.constant 1 : index
    %c0_108 = arith.constant 0 : index
    %156 = vector.load %arg9[%c1_107, %c0_108] : memref<2x256xf32, #tpu.memory_space<vmem>>, vector<1x256xf32>
    %157 = vector.broadcast %155 : vector<1x256xf32> to vector<16x256xf32>
    %158 = arith.mulf %152, %157 : vector<16x256xf32>
    %159 = vector.shape_cast %158 : vector<16x256xf32> to vector<1x16x256xf32>
    %cst_109 = arith.constant dense<0.000000e+00> : vector<1xf32>
    %160 = vector.multi_reduction <add>, %159, %cst_109 [1, 2] : vector<1x16x256xf32> to vector<1xf32>
    %161 = vector.shape_cast %160 : vector<1xf32> to vector<1x1x1xf32>
    %162 = vector.extract %161[0, 0, 0] : f32 from vector<1x1x1xf32>
    %cst_110 = arith.constant 4.8828125E-4 : f32
    %163 = arith.mulf %162, %cst_110 : f32
    %164 = vector.broadcast %156 : vector<1x256xf32> to vector<16x256xf32>
    %165 = arith.mulf %152, %164 : vector<16x256xf32>
    %166 = vector.shape_cast %165 : vector<16x256xf32> to vector<1x16x256xf32>
    %cst_111 = arith.constant dense<0.000000e+00> : vector<1xf32>
    %167 = vector.multi_reduction <add>, %166, %cst_111 [1, 2] : vector<1x16x256xf32> to vector<1xf32>
    %168 = vector.shape_cast %167 : vector<1xf32> to vector<1x1x1xf32>
    %169 = vector.extract %168[0, 0, 0] : f32 from vector<1x1x1xf32>
    %cst_112 = arith.constant 4.8828125E-4 : f32
    %170 = arith.mulf %169, %cst_112 : f32
    %171 = vector.broadcast %163 : f32 to vector<1x256xf32>
    %172 = arith.mulf %171, %155 : vector<1x256xf32>
    %173 = vector.broadcast %170 : f32 to vector<1x256xf32>
    %174 = arith.mulf %173, %156 : vector<1x256xf32>
    %175 = arith.addf %172, %174 : vector<1x256xf32>
    %176 = vector.broadcast %175 : vector<1x256xf32> to vector<16x256xf32>
    %177 = arith.subf %152, %176 : vector<16x256xf32>
    %178 = arith.mulf %177, %177 : vector<16x256xf32>
    %179 = vector.broadcast %155 : vector<1x256xf32> to vector<16x256xf32>
    %180 = arith.mulf %178, %179 : vector<16x256xf32>
    %181 = vector.shape_cast %180 : vector<16x256xf32> to vector<1x16x256xf32>
    %cst_113 = arith.constant dense<0.000000e+00> : vector<1xf32>
    %182 = vector.multi_reduction <add>, %181, %cst_113 [1, 2] : vector<1x16x256xf32> to vector<1xf32>
    %183 = vector.shape_cast %182 : vector<1xf32> to vector<1x1x1xf32>
    %184 = vector.extract %183[0, 0, 0] : f32 from vector<1x1x1xf32>
    %cst_114 = arith.constant 4.8828125E-4 : f32
    %185 = arith.mulf %184, %cst_114 : f32
    %186 = arith.mulf %177, %177 : vector<16x256xf32>
    %187 = vector.broadcast %156 : vector<1x256xf32> to vector<16x256xf32>
    %188 = arith.mulf %186, %187 : vector<16x256xf32>
    %189 = vector.shape_cast %188 : vector<16x256xf32> to vector<1x16x256xf32>
    %cst_115 = arith.constant dense<0.000000e+00> : vector<1xf32>
    %190 = vector.multi_reduction <add>, %189, %cst_115 [1, 2] : vector<1x16x256xf32> to vector<1xf32>
    %191 = vector.shape_cast %190 : vector<1xf32> to vector<1x1x1xf32>
    %192 = vector.extract %191[0, 0, 0] : f32 from vector<1x1x1xf32>
    %cst_116 = arith.constant 4.8828125E-4 : f32
    %193 = arith.mulf %192, %cst_116 : f32
    %cst_117 = arith.constant 9.99999974E-6 : f32
    %194 = arith.addf %185, %cst_117 : f32
    %195 = math.rsqrt %194 : f32
    %196 = vector.broadcast %195 : f32 to vector<1x256xf32>
    %197 = arith.mulf %196, %155 : vector<1x256xf32>
    %cst_118 = arith.constant 9.99999974E-6 : f32
    %198 = arith.addf %193, %cst_118 : f32
    %199 = math.rsqrt %198 : f32
    %200 = vector.broadcast %199 : f32 to vector<1x256xf32>
    %201 = arith.mulf %200, %156 : vector<1x256xf32>
    %202 = arith.addf %197, %201 : vector<1x256xf32>
    %203 = vector.broadcast %202 : vector<1x256xf32> to vector<16x256xf32>
    %204 = arith.mulf %177, %203 : vector<16x256xf32>
    %205 = vector.broadcast %153 : vector<1x256xf32> to vector<16x256xf32>
    %206 = arith.mulf %204, %205 : vector<16x256xf32>
    %207 = vector.broadcast %154 : vector<1x256xf32> to vector<16x256xf32>
    %208 = arith.addf %206, %207 : vector<16x256xf32>
    %209 = math.exp %208 : vector<16x256xf32>
    %cst_119 = arith.constant 1.000000e+00 : f32
    %210 = vector.broadcast %cst_119 : f32 to vector<16x256xf32>
    %211 = arith.addf %210, %209 : vector<16x256xf32>
    %212 = arith.mulf %211, %211 : vector<16x256xf32>
    %cst_120 = arith.constant 1.000000e+00 : f32
    %213 = vector.broadcast %cst_120 : f32 to vector<16x256xf32>
    %214 = arith.addf %212, %213 : vector<16x256xf32>
    %215 = tpu.reciprocal %214 {approx = true} : vector<16x256xf32> -> vector<16x256xf32>
    %cst_121 = arith.constant 2.000000e+00 : f32
    %216 = vector.broadcast %cst_121 : f32 to vector<16x256xf32>
    %217 = arith.mulf %216, %215 : vector<16x256xf32>
    %cst_122 = arith.constant 1.000000e+00 : f32
    %218 = vector.broadcast %cst_122 : f32 to vector<16x256xf32>
    %219 = arith.subf %218, %217 : vector<16x256xf32>
    %220 = arith.mulf %208, %219 : vector<16x256xf32>
    %221 = arith.truncf %220 : vector<16x256xf32> to vector<16x256xbf16>
    %c0_123 = arith.constant 0 : index
    %c0_124 = arith.constant 0 : index
    %222 = vector.load %arg11[%c0_123, %c0_124] : memref<256x64xbf16, #tpu.memory_space<vmem>>, vector<256x64xbf16>
    %cst_125 = arith.constant dense<0.000000e+00> : vector<16x64xf32>
    %223 = tpu.matmul %221, %222, %cst_125 {dimension_numbers = #tpu.dot_dimension_numbers<[1], [0], [0], [1], [0, 0, 1, 1], [], []>} : vector<16x256xbf16>, vector<256x64xbf16>, vector<16x64xf32> -> vector<16x64xf32>
    %c0_126 = arith.constant 0 : index
    %c0_127 = arith.constant 0 : index
    %224 = vector.load %arg10[%c0_126, %c0_127] : memref<64x16xbf16, #tpu.memory_space<vmem>>, vector<64x16xbf16>
    %225 = arith.truncf %223 : vector<16x64xf32> to vector<16x64xbf16>
    %cst_128 = arith.constant dense<0.000000e+00> : vector<64x64xf32>
    %226 = tpu.matmul %224, %225, %cst_128 {dimension_numbers = #tpu.dot_dimension_numbers<[1], [0], [0], [1], [0, 0, 1, 1], [], []>} : vector<64x16xbf16>, vector<16x64xbf16>, vector<64x64xf32> -> vector<64x64xf32>
    %227 = arith.negf %226 : vector<64x64xf32>
    %228 = math.exp %227 : vector<64x64xf32>
    %cst_129 = arith.constant 1.000000e+00 : f32
    %229 = vector.broadcast %cst_129 : f32 to vector<64x64xf32>
    %230 = arith.addf %229, %228 : vector<64x64xf32>
    %231 = arith.divf %229, %230 : vector<64x64xf32>
    %232 = vector.shape_cast %231 : vector<64x64xf32> to vector<1x64x64xf32>
    %c0_130 = arith.constant 0 : index
    %c0_131 = arith.constant 0 : index
    %c0_132 = arith.constant 0 : index
    %233 = vector.load %arg12[%c0_130, %c0_131, %c0_132] : memref<1x64x64xf32, #tpu.memory_space<vmem>>, vector<1x64x64xf32>
    tpu.vector_store %arg12[%c0_130, %c0_131, %c0_132], %232 {strides = array<i32>} : memref<1x64x64xf32, #tpu.memory_space<vmem>>, vector<1x64x64xf32>,
    return
  }
  func.func @transform_0(%arg0: i32) -> (i32, i32, i32) {
    %c0_i32 = arith.constant 0 : i32
    %c0_i32_0 = arith.constant 0 : i32
    %c0_i32_1 = arith.constant 0 : i32
    return %arg0, %c0_i32, %c0_i32_0 : i32, i32, i32
  }
  func.func @transform_1(%arg0: i32) -> (i32, i32, i32) {
    %c0_i32 = arith.constant 0 : i32
    %c0_i32_0 = arith.constant 0 : i32
    %c0_i32_1 = arith.constant 0 : i32
    return %arg0, %c0_i32, %c0_i32_0 : i32, i32, i32
  }
  func.func @transform_2(%arg0: i32) -> (i32, i32) {
    %c0_i32 = arith.constant 0 : i32
    %c0_i32_0 = arith.constant 0 : i32
    %c0_i32_1 = arith.constant 0 : i32
    return %c0_i32, %c0_i32_0 : i32, i32
  }
  func.func @transform_3(%arg0: i32) -> (i32, i32) {
    %c0_i32 = arith.constant 0 : i32
    %c0_i32_0 = arith.constant 0 : i32
    %c0_i32_1 = arith.constant 0 : i32
    return %c0_i32, %c0_i32_0 : i32, i32
  }
  func.func @transform_4(%arg0: i32) -> (i32, i32, i32) {
    %c0_i32 = arith.constant 0 : i32
    %c0_i32_0 = arith.constant 0 : i32
    %c0_i32_1 = arith.constant 0 : i32
    %c0_i32_2 = arith.constant 0 : i32
    return %c0_i32, %c0_i32_0, %c0_i32_1 : i32, i32, i32
  }
  func.func @transform_5(%arg0: i32) -> (i32, i32) {
    %c0_i32 = arith.constant 0 : i32
    %c0_i32_0 = arith.constant 0 : i32
    %c0_i32_1 = arith.constant 0 : i32
    return %c0_i32, %c0_i32_0 : i32, i32
  }
  func.func @transform_6(%arg0: i32) -> (i32, i32, i32) {
    %c0_i32 = arith.constant 0 : i32
    %c0_i32_0 = arith.constant 0 : i32
    %c0_i32_1 = arith.constant 0 : i32
    %c0_i32_2 = arith.constant 0 : i32
    return %c0_i32, %c0_i32_0, %c0_i32_1 : i32, i32, i32
  }
  func.func @transform_7(%arg0: i32) -> (i32, i32) {
    %c0_i32 = arith.constant 0 : i32
    %c0_i32_0 = arith.constant 0 : i32
    %c0_i32_1 = arith.constant 0 : i32
    return %c0_i32, %c0_i32_0 : i32, i32
  }
  func.func @transform_8(%arg0: i32) -> (i32, i32) {
    %c0_i32 = arith.constant 0 : i32
    %c0_i32_0 = arith.constant 0 : i32
    %c0_i32_1 = arith.constant 0 : i32
    return %c0_i32, %c0_i32_0 : i32, i32
  }
  func.func @transform_9(%arg0: i32) -> (i32, i32) {
    %c0_i32 = arith.constant 0 : i32
    %c0_i32_0 = arith.constant 0 : i32
    %c0_i32_1 = arith.constant 0 : i32
    return %c0_i32, %c0_i32_0 : i32, i32
  }
  func.func @transform_10(%arg0: i32) -> (i32, i32) {
    %c0_i32 = arith.constant 0 : i32
    %c0_i32_0 = arith.constant 0 : i32
    %c0_i32_1 = arith.constant 0 : i32
    return %c0_i32, %c0_i32_0 : i32, i32
  }
  func.func @transform_11(%arg0: i32) -> (i32, i32, i32) {
    %c0_i32 = arith.constant 0 : i32
    %c0_i32_0 = arith.constant 0 : i32
    %c0_i32_1 = arith.constant 0 : i32
    return %arg0, %c0_i32, %c0_i32_0 : i32, i32, i32
  }
}

</mosaic_0001>

<bundles_post_ra>
// kernel: tile.33
= control target key start
LH: loop header
LB: loop body
LE: loop exit
PB: predicated region body
PF: predicated region fallthrough
CT: control target
= control target key end

     0   :  { %s28_s0 = inlined_call_operand.vmem [shape: f32[16], index: 0, kind: input, shape index: {}]   ;;  %s29_s1 = inlined_call_operand.vmem [shape: f32[16,16], index: 1, kind: output, shape index: {}]  }
   0x1   :  { %v4_v0 = vld [vmem:[%s28_s0] ss:$0 sm:$0xff] }
   0x2   :  { %5 = vst [vmem:[%s29_s1] sm:$0xff] %v4_v0  ;;  %8 = vst [vmem:[%s29_s1 + $0x8] sm:$0xff] %v4_v0 }

// kernel: tile.54
= control target key start
LH: loop header
LB: loop body
LE: loop exit
PB: predicated region body
PF: predicated region fallthrough
CT: control target
= control target key end

     0   :  { %s7_s6 = smov 3  ;;  %s21_s9 = smov 3  ;;  %vm4_vm0 = vcmask 130048   ;;  %vm11_vm1 = vcmask 1048448   ;;  %vm18_vm2 = vcmask 917248   ;;  %vm25_vm3 = vcmask 786048   ;;  %s131_s0 = inlined_call_operand.vmem [shape: f32[16,16], index: 0, kind: input, shape index: {}]   ;;  %s132_s1 = inlined_call_operand.vmem [shape: f32[1,256], index: 1, kind: output, shape index: {}]  }
   0x1   :  { %v69_v0 = vld [vmem:[%s131_s0 + $0x7] ss:$8 sm:%s7_s6]   ;;  %s84_s10 = smov 112   ;;  %v71_v1 = vld [vmem:[%s131_s0 + $0x5] ss:$8 sm:%s21_s9]   ;;  %s14_s13 = smov 3 }
   0x2   :  { %9 = vrot.lane.b32.xlu0 %v69_v0, %s84_s10  ;;  %s85_s14 = smov 80   ;;  %v70_v2 = vld [vmem:[%s131_s0 + $0x6] ss:$8 sm:%s14_s13]   ;;  %s28_s17 = smov 3  ;;  %vm32_vm4 = vcmask 654848   ;;  %vm39_vm5 = vcmask 523648  }
   0x3   :  { %23 = vrot.lane.b32.xlu1 %v71_v1, %s85_s14  ;;  %v72_v3 = vld [vmem:[%s131_s0 + $0x4] ss:$8 sm:%s28_s17]   ;;  %s35_s20 = smov 3  ;;  %s42_s21 = smov 3  ;;  %vm46_vm6 = vcmask 392448   ;;  %vm53_vm7 = vcmask 261248  }
   0x4   :  { %s86_s22 = smov 96   ;;  %s87_s23 = smov 64   ;;  %v73_v4 = vld [vmem:[%s131_s0 + $0x3] ss:$8 sm:%s35_s20]   ;;  %v74_v5 = vld [vmem:[%s131_s0 + $0x2] ss:$8 sm:%s42_s21]  }
   0x5   :  { %s2_s26 = smov 3  ;;  %s49_s29 = smov 3 }
   0x6   :  { %16 = vrot.lane.b32.xlu0 %v70_v2, %s86_s22  ;;  %v3_v6 = vld [vmem:[%s131_s0] ss:$8 sm:%s2_s26]   ;;  %s88_s3 = smov 48   ;;  %s89_s4 = smov 32  }
   0x7   :  { %30 = vrot.lane.b32.xlu1 %v72_v3, %s87_s23  ;;  %5 = vst.msk [vmem:[#allocation0] ss:$8 sm:$0x3] %vm4_vm0, %v3_v6   ;;  %v75_v7 = vld [vmem:[%s131_s0 + $0x1] ss:$8 sm:%s49_s29]   ;;  %s90_s0 = smov 16  }
   0xa   :  { %37 = vrot.lane.b32.xlu0 %v73_v4, %s88_s3 }
   0xb   :  { %44 = vrot.lane.b32.xlu1 %v74_v5, %s89_s4 }
   0xe   :  { %51 = vrot.lane.b32.xlu0 %v75_v7, %s90_s0 }
  0x74   :  { %v10_v8 = vpop.permute.xlu0 %9  }
  0x75   :  { %12 = vst.msk [vmem:[#allocation0] ss:$8 sm:$0x3] %vm11_vm1, %v10_v8   ;;  %v24_v9 = vpop.permute.xlu1 %23  }
  0x78   :  { %v17_v10 = vpop.permute.xlu0 %16  }
  0x79   :  { %19 = vst.msk [vmem:[#allocation0] ss:$8 sm:$0x3] %vm18_vm2, %v17_v10   ;;  %v31_v11 = vpop.permute.xlu1 %30  }
  0x7a   :  { %26 = vst.msk [vmem:[#allocation0] ss:$8 sm:$0x3] %vm25_vm3, %v24_v9  }
  0x7b   :  { %33 = vst.msk [vmem:[#allocation0] ss:$8 sm:$0x3] %vm32_vm4, %v31_v11  }
  0x7c   :  { %v38_v12 = vpop.permute.xlu0 %37  }
  0x7d   :  { %40 = vst.msk [vmem:[#allocation0] ss:$8 sm:$0x3] %vm39_vm5, %v38_v12   ;;  %v45_v13 = vpop.permute.xlu1 %44  }
  0x7e   :  { %47 = vst.msk [vmem:[#allocation0] ss:$8 sm:$0x3] %vm46_vm6, %v45_v13  }
  0x80   :  { %v52_v14 = vpop.permute.xlu0 %51  }
  0x81   :  { %54 = vst.msk [vmem:[#allocation0] ss:$8 sm:$0x3] %vm53_vm7, %v52_v14  }
  0x88   :  { %v59_v15 = vld [vmem:[#allocation0] sm:$0x1]  ;;  %v64_v16 = vld [vmem:[#allocation0 + $0x8] sm:$0x1] }
  0x89   :  { %62 = vst [vmem:[%s132_s1] sm:$0x1] %v59_v15  ;;  %76 = vst [vmem:[%s132_s1 + $0x1] sm:$0x1] %v64_v16 }

// kernel: pnsnet_forward.1
= control target key start
LH: loop header
LB: loop body
LE: loop exit
PB: predicated region body
PF: predicated region fallthrough
CT: control target
= control target key end

     0   :  { %s10067_s0 = inlined_call_operand.vmem [shape: bf16[2,8,256], index: 0, kind: input, shape index: {}]   ;;  %s10068_s1 = inlined_call_operand.vmem [shape: bf16[2,16,384], index: 1, kind: input, shape index: {}]   ;;  %s10069_s2 = inlined_call_operand.vmem [shape: bf16[16,8], index: 2, kind: input, shape index: {}]   ;;  %s10070_s3 = inlined_call_operand.vmem [shape: bf16[256,512], index: 3, kind: input, shape index: {}]   ;;  %s10071_s4 = inlined_call_operand.vmem [shape: bf16[5,512,256], index: 4, kind: input, shape index: {}]   ;;  %s10072_s5 = inlined_call_operand.vmem [shape: bf16[384,256], index: 5, kind: input, shape index: {}]   ;;  %s10073_s6 = inlined_call_operand.vmem [shape: bf16[3,256,256], index: 6, kind: input, shape index: {}]   ;;  %s10074_s7 = inlined_call_operand.vmem [shape: f32[6,256], index: 7, kind: input, shape index: {}]   ;;  %s10075_s8 = inlined_call_operand.vmem [shape: f32[2,256], index: 8, kind: input, shape index: {}]   ;;  %s10076_s9 = inlined_call_operand.vmem [shape: bf16[64,16], index: 9, kind: input, shape index: {}]   ;;  %s10077_s10 = inlined_call_operand.vmem [shape: bf16[256,64], index: 10, kind: input, shape index: {}]   ;;  %s10078_s11 = inlined_call_operand.hbm [shape: f32[2,64,64], index: 11, kind: output, shape index: {}]  }
   0x1   :  { %10082 = sst [smem:[#allocation10_spill]] %s10067_s0 }
   0x2   :  { %16 = vsyncpa [#allocation5], 0 }
   0x3   :  { %18 = vsyncpa [#allocation5 + $0x1], 0  ;;  %s7886_s17 = smov 0   ;;  %s7888_s18 = smov 0  }
   0x4   :  { %s7890_s19 = smov 0   ;;  %s7892_s20 = smov 0  }
   0x5 LB: > { %10083 = sst [smem:[#allocation7_spill]] %s7816_s19  ;;  %s7907_s21 = sadd.s32 4294967295, %s7820_s20   ;;  %s7820_s20 = sphi %s7892_s20, %s10099_s20   ;;  %s7816_s19 = sphi %s7890_s19, %s10101_s19   ;;  %s7812_s18 = sphi %s7888_s18, %s10103_s18   ;;  %s7808_s17 = sphi %s7886_s17, %s10102_s17  }
   0x6   : > { %s5797_s22 = sadd.s32 4294967294, %s7820_s20   ;;  %s7911_s23 = sadd.s32 1, %s7820_s20  }
   0x7   : > { %10084 = sst [smem:[#allocation8_spill]] %s7911_s23  ;;  %s272_s24 = sadd.s32 1, %s7816_s19 }
   0x8   : > { %s269_s25 = ssub.s32 %s7820_s20, %s7911_s23  ;;  %p282_p0 = scmp.ne.s32.totalorder %s7816_s19, %s7812_s18 }
   0x9   : > { %p270_p1 = scmp.eq.s32.totalorder %s269_s25, 0  ;;  %p283_p2 = scmp.eq.s32.totalorder %s7907_s21, 1 }
   0xa   : > { %p288_p3 = scmp.ne.s32.totalorder %s7812_s18, %s7808_s17  ;;  %p289_p4 = scmp.eq.s32.totalorder %s5797_s22, 1 }
   0xb   : > { %s7922_s26 = scalar_select %p270_p1, %s7816_s19, %s272_s24  }
   0xc   : > { %p7924_p5 = por %p283_p2, %p282_p0  ;;  %p7928_p6 = por %p289_p4, %p288_p3 }
   0xd   : > { %10085 = sst [smem:[#allocation9_spill]] %s7922_s26  ;;  %p5800_p7 = scmp.ge.s32.totalorder %s7820_s20, 1 }
   0xe   : > { %p350_p8 = scmp.lt.s32.totalorder %s7820_s20, 3 }
  0x10   : > { %p351_p9 = pnand %p5800_p7, %p350_p8 }
  0x11   : > { %p395_p10 = scmp.lt.s32.totalorder (!%p351_p9), %s7907_s21, 1  ;;  %s10088_s0 = sld [smem:[#allocation10_spill]] (!%p351_p9) }
  0x12   : > { %354 = sbr.rel (%p351_p9) target bundleno = 3122 (0xc32), region = 64 }
  0x17   : > { %v6857_v0 = vld [vmem:[%s10070_s3 + $0xe4] ss:$16 sps:$4 sm:$0xff]   ;;  %v6859_v1 = vld [vmem:[%s10070_s3 + $0xe0] ss:$16 sps:$4 sm:$0xff]   ;;  %v6860_v2 = vld [vmem:[%s10070_s3 + $0xec] ss:$16 sps:$4 sm:$0xff]  }
  0x18   : > { %798 = vmatprep.subr.bf16.mxu0 %v6857_v0  ;;  %v6862_v3 = vld [vmem:[%s10070_s3 + $0xe8] ss:$16 sps:$4 sm:$0xff]   ;;  %v6863_v4 = vld [vmem:[%s10070_s3 + $0xc4] ss:$16 sps:$4 sm:$0xff]   ;;  %v6865_v5 = vld [vmem:[%s10070_s3 + $0xc0] ss:$16 sps:$4 sm:$0xff]   ;;  %839 = vmatprep.subr.bf16.mxu1 %v6860_v2 }
  0x19   : > { %799 = vmatpush1.bf16.msra.mxu0 %v6859_v1  ;;  %v6866_v6 = vld [vmem:[%s10070_s3 + $0xcc] ss:$16 sps:$4 sm:$0xff]   ;;  %840 = vmatpush1.bf16.msra.mxu1 %v6862_v3  ;;  %v6868_v7 = vld [vmem:[%s10070_s3 + $0xc8] ss:$16 sps:$4 sm:$0xff]   ;;  %v6869_v8 = vld [vmem:[%s10070_s3 + $0xa4] ss:$16 sps:$4 sm:$0xff]  }
  0x1a   : > { %800 = vmatprep.subr.bf16.mxu0 %v6863_v4  ;;  %841 = vmatprep.subr.bf16.mxu1 %v6866_v6  ;;  %v6871_v9 = vld [vmem:[%s10070_s3 + $0xa0] ss:$16 sps:$4 sm:$0xff]   ;;  %v6872_v10 = vld [vmem:[%s10070_s3 + $0xac] ss:$16 sps:$4 sm:$0xff]   ;;  %v6875_v11 = vld [vmem:[%s10070_s3 + $0x84] ss:$16 sps:$4 sm:$0xff]  }
  0x1b   : > { %v6874_v12 = vld [vmem:[%s10070_s3 + $0xa8] ss:$16 sps:$4 sm:$0xff]   ;;  %v6878_v13 = vld [vmem:[%s10070_s3 + $0x8c] ss:$16 sps:$4 sm:$0xff]   ;;  %v6877_v14 = vld [vmem:[%s10070_s3 + $0x80] ss:$16 sps:$4 sm:$0xff]  }
  0x1c   : > { %v6881_v15 = vld [vmem:[%s10070_s3 + $0x64] ss:$16 sps:$4 sm:$0xff]   ;;  %v6880_v16 = vld [vmem:[%s10070_s3 + $0x88] ss:$16 sps:$4 sm:$0xff]   ;;  %v6884_v17 = vld [vmem:[%s10070_s3 + $0x6c] ss:$16 sps:$4 sm:$0xff]  }
  0x1d   : > { %801 = vmatpush1.bf16.msra.mxu0 %v6865_v5  ;;  %842 = vmatpush1.bf16.msra.mxu1 %v6868_v7  ;;  %v6883_v18 = vld [vmem:[%s10070_s3 + $0x60] ss:$16 sps:$4 sm:$0xff]   ;;  %v6887_v19 = vld [vmem:[%s10070_s3 + $0x44] ss:$16 sps:$4 sm:$0xff]   ;;  %v6886_v20 = vld [vmem:[%s10070_s3 + $0x68] ss:$16 sps:$4 sm:$0xff]  }
  0x1e   : > { %802 = vmatprep.subr.bf16.mxu0 %v6869_v8  ;;  %843 = vmatprep.subr.bf16.mxu1 %v6872_v10  ;;  %v6890_v21 = vld [vmem:[%s10070_s3 + $0x4c] ss:$16 sps:$4 sm:$0xff]   ;;  %v6889_v22 = vld [vmem:[%s10070_s3 + $0x40] ss:$16 sps:$4 sm:$0xff]   ;;  %v6893_v23 = vld [vmem:[%s10070_s3 + $0x24] ss:$16 sps:$4 sm:$0xff]  }
  0x1f   : > { %v6892_v24 = vld [vmem:[%s10070_s3 + $0x48] ss:$16 sps:$4 sm:$0xff]   ;;  %v6896_v25 = vld [vmem:[%s10070_s3 + $0x2c] ss:$16 sps:$4 sm:$0xff]   ;;  %v6895_v26 = vld [vmem:[%s10070_s3 + $0x20] ss:$16 sps:$4 sm:$0xff]  }
  0x20   : > { %v6899_v27 = vld [vmem:[%s10070_s3 + $0x4] ss:$16 sps:$4 sm:$0xff]   ;;  %v6898_v28 = vld [vmem:[%s10070_s3 + $0x28] ss:$16 sps:$4 sm:$0xff]   ;;  %v6902_v29 = vld [vmem:[%s10070_s3 + $0xc] ss:$16 sps:$4 sm:$0xff]  }
  0x21   : > { %803 = vmatpush1.bf16.msra.mxu0 %v6871_v9  ;;  %844 = vmatpush1.bf16.msra.mxu1 %v6874_v12  ;;  %v6901_v30 = vld [vmem:[%s10070_s3] ss:$16 sps:$4 sm:$0xff]   ;;  %v6905_v31 = vld [vmem:[%s10070_s3 + $0x1e4] ss:$16 sps:$4 sm:$0xff]   ;;  %v6904_v32 = vld [vmem:[%s10070_s3 + $0x8] ss:$16 sps:$4 sm:$0xff]  }
  0x22   : > { %804 = vmatprep.subr.bf16.mxu0 %v6875_v11  ;;  %845 = vmatprep.subr.bf16.mxu1 %v6878_v13  ;;  %v6908_v33 = vld [vmem:[%s10070_s3 + $0x1ec] ss:$16 sps:$4 sm:$0xff]   ;;  %v6907_v34 = vld [vmem:[%s10070_s3 + $0x1e0] ss:$16 sps:$4 sm:$0xff]   ;;  %v6911_v35 = vld [vmem:[%s10070_s3 + $0x1c4] ss:$16 sps:$4 sm:$0xff]  }
  0x23   : > { %s8044_s12 = scalar_select %p395_p10, %s7907_s21, 1  ;;  %v6910_v36 = vld [vmem:[%s10070_s3 + $0x1e8] ss:$16 sps:$4 sm:$0xff]   ;;  %v6914_v37 = vld [vmem:[%s10070_s3 + $0x1cc] ss:$16 sps:$4 sm:$0xff]   ;;  %v7822_v3 = vmov 0  }
  0x24   : > { %v6913_v38 = vld [vmem:[%s10070_s3 + $0x1c0] ss:$16 sps:$4 sm:$0xff]   ;;  %v6917_v39 = vld [vmem:[%s10070_s3 + $0x1a4] ss:$16 sps:$4 sm:$0xff]   ;;  %v6916_v40 = vld [vmem:[%s10070_s3 + $0x1c8] ss:$16 sps:$4 sm:$0xff]  }
  0x25   : > { %805 = vmatpush1.bf16.msra.mxu0 %v6877_v14  ;;  %846 = vmatpush1.bf16.msra.mxu1 %v6880_v16  ;;  %s6739_s30 = sshll.u32 %s8044_s12, 3  ;;  %v6920_v41 = vld [vmem:[%s10070_s3 + $0x1ac] ss:$16 sps:$4 sm:$0xff]   ;;  %v6919_v42 = vld [vmem:[%s10070_s3 + $0x1a0] ss:$16 sps:$4 sm:$0xff]   ;;  %s6784_s29 = smul.u32 24, %s8044_s12 }
  0x26   : > { %806 = vmatprep.subr.bf16.mxu0 %v6881_v15  ;;  %847 = vmatprep.subr.bf16.mxu1 %v6884_v17  ;;  %v6922_v43 = vld [vmem:[%s10070_s3 + $0x1a8] ss:$16 sps:$4 sm:$0xff]   ;;  %s399_s23 = scalar_lea.vmem %s10088_s0, %s6739_s30  ;;  %v6923_v44 = vld [vmem:[%s10070_s3 + $0x184] ss:$16 sps:$4 sm:$0xff]   ;;  %v6925_v45 = vld [vmem:[%s10070_s3 + $0x180] ss:$16 sps:$4 sm:$0xff]  }
  0x27   : > { %v6926_v46 = vld [vmem:[%s10070_s3 + $0x18c] ss:$16 sps:$4 sm:$0xff]   ;;  %v6929_v47 = vld [vmem:[%s10070_s3 + $0x164] ss:$16 sps:$4 sm:$0xff]   ;;  %v6928_v49 = vld [vmem:[%s10070_s3 + $0x188] ss:$16 sps:$4 sm:$0xff]   ;;  %s8194_s22 = scalar_lea.vmem %s10068_s1, %s6784_s29 }
  0x28   : > { %v406_v48 = vld [vmem:[%s399_s23] sm:$0xff]  ;;  %v6932_v51 = vld [vmem:[%s10070_s3 + $0x16c] ss:$16 sps:$4 sm:$0xff]   ;;  %v6934_v54 = vld [vmem:[%s10070_s3 + $0x168] ss:$16 sps:$4 sm:$0xff]   ;;  %vm895_vm0 = vcmask 1043456  }
  0x29   : > { %807 = vmatpush1.bf16.msra.mxu0 %v6883_v18  ;;  %848 = vmatpush1.bf16.msra.mxu1 %v6886_v20  ;;  %v5806_v50 = vcombine.high %v406_v48, %v406_v48  ;;  %v6931_v52 = vld [vmem:[%s10070_s3 + $0x160] ss:$16 sps:$4 sm:$0xff]   ;;  %v6935_v53 = vld [vmem:[%s10070_s3 + $0x144] ss:$16 sps:$4 sm:$0xff]   ;;  %v6938_v55 = vld [vmem:[%s10070_s3 + $0x14c] ss:$16 sps:$4 sm:$0xff]   ;;  %v5805_v2 = vcombine.low %v406_v48, %v406_v48 }
  0x2a   : > { %808 = vmatprep.subr.bf16.mxu0 %v6887_v19  ;;  %849 = vmatprep.subr.bf16.mxu1 %v6890_v21  ;;  %v6937_v56 = vld [vmem:[%s10070_s3 + $0x140] ss:$16 sps:$4 sm:$0xff]   ;;  %v6941_v57 = vld [vmem:[%s10070_s3 + $0x124] ss:$16 sps:$4 sm:$0xff]   ;;  %v6940_v58 = vld [vmem:[%s10070_s3 + $0x148] ss:$16 sps:$4 sm:$0xff]  }
  0x2b   : > { %830 = vmatprep.mubr.bf16.mxu0 %v5806_v50  ;;  %871 = vmatprep.mubr.bf16.mxu1 %v5806_v50  ;;  %v6944_v59 = vld [vmem:[%s10070_s3 + $0x12c] ss:$16 sps:$4 sm:$0xff]   ;;  %v6943_v60 = vld [vmem:[%s10070_s3 + $0x120] ss:$16 sps:$4 sm:$0xff]   ;;  %v6947_v61 = vld [vmem:[%s10070_s3 + $0x104] ss:$16 sps:$4 sm:$0xff]  }
  0x2c   : > { %v6946_v62 = vld [vmem:[%s10070_s3 + $0x128] ss:$16 sps:$4 sm:$0xff]   ;;  %v6950_v63 = vld [vmem:[%s10070_s3 + $0x10c] ss:$16 sps:$4 sm:$0xff]   ;;  %v6949_v0 = vld [vmem:[%s10070_s3 + $0x100] ss:$16 sps:$4 sm:$0xff]  }
  0x2d   : > { %809 = vmatpush1.bf16.msra.mxu0 %v6889_v22  ;;  %850 = vmatpush1.bf16.msra.mxu1 %v6892_v24  ;;  %v6954_v1 = vld [vmem:[%s10070_s3 + $0x108] ss:$16 sps:$4 sm:$0xff]   ;;  %994 = vst [vmem:[#allocation2 + $0x18] sm:$0x11] %v7822_v3  ;;  %995 = vst [vmem:[#allocation2 + $0x20] sm:$0x11] %v7822_v3 }
  0x2e   : > { %810 = vmatprep.subr.bf16.mxu0 %v6893_v23  ;;  %851 = vmatprep.subr.bf16.mxu1 %v6896_v25  ;;  %996 = vst [vmem:[#allocation2 + $0x8] sm:$0x22] %v7822_v3  ;;  %997 = vst [vmem:[#allocation2] sm:$0x22] %v7822_v3  ;;  %v6956_v4 = vld [vmem:[%s10071_s4 + $0x270] ss:$8 sps:$4 sm:$0xff]  }
  0x2f   : > { %v6958_v5 = vld [vmem:[%s10071_s4 + $0x274] ss:$8 sps:$4 sm:$0xff]   ;;  %v6961_v6 = vld [vmem:[%s10071_s4 + $0x264] ss:$8 sps:$4 sm:$0xff]   ;;  %v6959_v7 = vld [vmem:[%s10071_s4 + $0x260] ss:$8 sps:$4 sm:$0xff]  }
  0x30   : > { %v6964_v8 = vld [vmem:[%s10071_s4 + $0x254] ss:$8 sps:$4 sm:$0xff]   ;;  %v6962_v9 = vld [vmem:[%s10071_s4 + $0x250] ss:$8 sps:$4 sm:$0xff]   ;;  %v6970_v10 = vld [vmem:[%s10071_s4 + $0x244] ss:$8 sps:$4 sm:$0xff]  }
  0x31   : > { %811 = vmatpush1.bf16.msra.mxu0 %v6895_v26  ;;  %852 = vmatpush1.bf16.msra.mxu1 %v6898_v28  ;;  %v6968_v11 = vld [vmem:[%s10071_s4 + $0x240] ss:$8 sps:$4 sm:$0xff]   ;;  %v6976_v12 = vld [vmem:[%s10071_s4 + $0x234] ss:$8 sps:$4 sm:$0xff]   ;;  %v6974_v13 = vld [vmem:[%s10071_s4 + $0x230] ss:$8 sps:$4 sm:$0xff]  }
  0x32   : > { %812 = vmatprep.subr.bf16.mxu0 %v6899_v27  ;;  %853 = vmatprep.subr.bf16.mxu1 %v6902_v29  ;;  %v6982_v14 = vld [vmem:[%s10071_s4 + $0x224] ss:$8 sps:$4 sm:$0xff]   ;;  %v6980_v15 = vld [vmem:[%s10071_s4 + $0x220] ss:$8 sps:$4 sm:$0xff]   ;;  %v6988_v16 = vld [vmem:[%s10071_s4 + $0x214] ss:$8 sps:$4 sm:$0xff]  }
  0x33   : > { %v6986_v17 = vld [vmem:[%s10071_s4 + $0x210] ss:$8 sps:$4 sm:$0xff]   ;;  %v6994_v18 = vld [vmem:[%s10071_s4 + $0x204] ss:$8 sps:$4 sm:$0xff]   ;;  %v6992_v19 = vld [vmem:[%s10071_s4 + $0x200] ss:$8 sps:$4 sm:$0xff]  }
  0x34   : > { %v7000_v20 = vld [vmem:[%s10071_s4 + $0x2f4] ss:$8 sps:$4 sm:$0xff]   ;;  %v6998_v21 = vld [vmem:[%s10071_s4 + $0x2f0] ss:$8 sps:$4 sm:$0xff]   ;;  %vm891_vm1 = vcmask 64512   ;;  %vm1018_vm2 = vcmask 1040384  }
  0x35   : > { %813 = vmatpush1.bf16.msra.mxu0 %v6901_v30  ;;  %854 = vmatpush1.bf16.msra.mxu1 %v6904_v32  ;;  %v6955_v32 = vld [vmem:[%s10069_s2] sm:$0xff]   ;;  %v7001_v50 = vld [vmem:[%s10071_s4 + $0x310] ss:$8 sps:$4 sm:$0xff]   ;;  %vm1019_vm3 = vcmask 1044484   ;;  %vm4331_vm5 = vsmask.f32 256 }
  0x36   : > { %814 = vmatprep.subr.bf16.mxu0 %v6905_v31  ;;  %855 = vmatprep.subr.bf16.mxu1 %v6908_v33  ;;  %v6995_v48 = vld [vmem:[%s10071_s4 + $0x320] ss:$8 sps:$4 sm:$0xff]   ;;  %vm8287_vm4 = vmor %vm1018_vm2, %vm1019_vm3  ;;  %vm4333_vm6 = vsmask.f32 4352  ;;  %vm4339_vm8 = vsmask.f32 7938 }
  0x37   : > { %vm8305_vm7 = vmand %vm1018_vm2, %vm4331_vm5  ;;  %vm4341_vm10 = vsmask.f32 7954  ;;  %vm4381_vm15 = vcmask 1047556  }
  0x38   : > { %vm8310_vm9 = vmand %vm1019_vm3, %vm4333_vm6  ;;  %vm2150_vm6 = vcmask 1046528  }
  0x39   : > { %815 = vmatpush2.bf16.msra.mxu0 %v6907_v34  ;;  %856 = vmatpush2.bf16.msra.mxu1 %v6910_v36  ;;  %v6967_v36 = vld [vmem:[%s10071_s4 + $0x374] ss:$8 sps:$4 sm:$0xff]   ;;  %vm4335_vm11 = vmor %vm8310_vm9, %vm8305_vm7  ;;  %vm5700_vm7 = vcmask 523264  }
  0x3a   : > { %816 = vmatprep.subr.bf16.mxu0 %v6911_v35  ;;  %857 = vmatprep.subr.bf16.mxu1 %v6914_v37  ;;  %vm4340_vm12 = vmand %vm1018_vm2, %vm4339_vm8 }
  0x3b   : > { %vm4342_vm13 = vmand %vm1019_vm3, %vm4341_vm10  ;;  %vm1204_vm3 = vsmask.f32 7424 }
  0x3c   : > { %vm4343_vm14 = vmor %vm4342_vm13, %vm4340_vm12 }
  0x3d   : > { %817 = vmatpush2.bf16.msra.mxu0 %v6913_v38  ;;  %858 = vmatpush2.bf16.msra.mxu1 %v6916_v40  ;;  %v6965_v38 = vld [vmem:[%s10071_s4 + $0x370] ss:$8 sps:$4 sm:$0xff]   ;;  %v6971_v40 = vld [vmem:[%s10071_s4 + $0x360] ss:$8 sps:$4 sm:$0xff]   ;;  %vm8361_vm2 = vmand %vm4381_vm15, %vm4341_vm10  ;;  %vm4357_vm10 = vsmask.f32 4368 }
  0x3e   : > { %818 = vmatprep.subr.bf16.mxu0 %v6917_v39  ;;  %859 = vmatprep.subr.bf16.mxu1 %v6920_v41  ;;  %v6973_v39 = vld [vmem:[%s10071_s4 + $0x364] ss:$8 sps:$4 sm:$0xff]   ;;  %v6979_v41 = vld [vmem:[%s10071_s4 + $0x354] ss:$8 sps:$4 sm:$0xff]   ;;  %vm4358_vm12 = vmor %vm4331_vm5, %vm4357_vm10  ;;  %vm5574_vm5 = vcmask 130048  }
  0x41   : > { %819 = vmatpush2.bf16.msra.mxu0 %v6919_v42  ;;  %860 = vmatpush2.bf16.msra.mxu1 %v6922_v43  ;;  %v6977_v42 = vld [vmem:[%s10071_s4 + $0x350] ss:$8 sps:$4 sm:$0xff]   ;;  %v6985_v43 = vld [vmem:[%s10071_s4 + $0x344] ss:$8 sps:$4 sm:$0xff]  }
  0x42   : > { %820 = vmatprep.subr.bf16.mxu0 %v6923_v44  ;;  %861 = vmatprep.subr.bf16.mxu1 %v6926_v46  ;;  %v6983_v44 = vld [vmem:[%s10071_s4 + $0x340] ss:$8 sps:$4 sm:$0xff]   ;;  %v6989_v46 = vld [vmem:[%s10071_s4 + $0x330] ss:$8 sps:$4 sm:$0xff]  }
  0x45   : > { %821 = vmatpush2.bf16.msra.mxu0 %v6925_v45  ;;  %862 = vmatpush2.bf16.msra.mxu1 %v6928_v49  ;;  %v6991_v45 = vld [vmem:[%s10071_s4 + $0x334] ss:$8 sps:$4 sm:$0xff]  }
  0x46   : > { %822 = vmatprep.subr.bf16.mxu0 %v6929_v47  ;;  %863 = vmatprep.subr.bf16.mxu1 %v6932_v51  ;;  %v6997_v47 = vld [vmem:[%s10071_s4 + $0x324] ss:$8 sps:$4 sm:$0xff]   ;;  %v7003_v49 = vld [vmem:[%s10071_s4 + $0x314] ss:$8 sps:$4 sm:$0xff]  }
  0x47   : > { %v7006_v51 = vld [vmem:[%s10071_s4 + $0x2e4] ss:$8 sps:$4 sm:$0xff]  }
  0x49   : > { %823 = vmatpush2.bf16.msra.mxu0 %v6931_v52  ;;  %864 = vmatpush2.bf16.msra.mxu1 %v6934_v54  ;;  %v7009_v52 = vld [vmem:[%s10071_s4 + $0x304] ss:$8 sps:$4 sm:$0xff]   ;;  %v7007_v54 = vld [vmem:[%s10071_s4 + $0x300] ss:$8 sps:$4 sm:$0xff]  }
  0x4a   : > { %824 = vmatprep.subr.bf16.mxu0 %v6935_v53  ;;  %865 = vmatprep.subr.bf16.mxu1 %v6938_v55  ;;  %v7004_v53 = vld [vmem:[%s10071_s4 + $0x2e0] ss:$8 sps:$4 sm:$0xff]   ;;  %v7012_v55 = vld [vmem:[%s10071_s4 + $0x2d4] ss:$8 sps:$4 sm:$0xff]  }
  0x4d   : > { %825 = vmatpush2.bf16.msra.mxu0 %v6937_v56  ;;  %866 = vmatpush2.bf16.msra.mxu1 %v6940_v58  ;;  %v7015_v56 = vld [vmem:[%s10071_s4 + $0x3f4] ss:$8 sps:$4 sm:$0xff]   ;;  %v7013_v58 = vld [vmem:[%s10071_s4 + $0x3f0] ss:$8 sps:$4 sm:$0xff]  }
  0x4e   : > { %826 = vmatprep.subr.bf16.mxu0 %v6941_v57  ;;  %867 = vmatprep.subr.bf16.mxu1 %v6944_v59  ;;  %v7010_v57 = vld [vmem:[%s10071_s4 + $0x2d0] ss:$8 sps:$4 sm:$0xff]   ;;  %v7018_v59 = vld [vmem:[%s10071_s4 + $0x2c4] ss:$8 sps:$4 sm:$0xff]  }
  0x51   : > { %827 = vmatpush2.bf16.msra.mxu0 %v6943_v60  ;;  %868 = vmatpush2.bf16.msra.mxu1 %v6946_v62  ;;  %v7021_v60 = vld [vmem:[%s10071_s4 + $0x3e4] ss:$8 sps:$4 sm:$0xff]   ;;  %v7019_v62 = vld [vmem:[%s10071_s4 + $0x3e0] ss:$8 sps:$4 sm:$0xff]  }
  0x52   : > { %828 = vmatprep.subr.bf16.mxu0 %v6947_v61  ;;  %869 = vmatprep.subr.bf16.mxu1 %v6950_v63  ;;  %v7016_v61 = vld [vmem:[%s10071_s4 + $0x2c0] ss:$8 sps:$4 sm:$0xff]  }
  0x55   : > { %829 = vmatpush2.bf16.msra.mxu0 %v6949_v0  ;;  %870 = vmatpush2.bf16.msra.mxu1 %v6954_v1  ;;  %v7024_v0 = vld [vmem:[%s10071_s4 + $0x2b4] ss:$8 sps:$4 sm:$0xff]  }
  0x56   : > { %1577 = vmatprep.subr.bf16.mxu0 %v6958_v5  ;;  %v7027_v1 = vld [vmem:[%s10071_s4 + $0x3d4] ss:$8 sps:$4 sm:$0xff]  }
  0x58   : > { %831 = vmatmul.mubr.bf16.vlgmr.msra.gmra.mxu0 %v5805_v2  ;;  %872 = vmatmul.mubr.bf16.vlgmr.msra.gmra.mxu1 %v5805_v2  ;;  %v7022_v2 = vld [vmem:[%s10071_s4 + $0x2b0] ss:$8 sps:$4 sm:$0xff]  }
  0x59   : > { %940 = vmatprep.mubr.bf16.mxu1 %v7822_v3  ;;  %1578 = vmatpush1.bf16.msra.mxu0 %v6956_v4  ;;  %v7025_v4 = vld [vmem:[%s10071_s4 + $0x3d0] ss:$8 sps:$4 sm:$0xff]  }
  0x5a   : > { %1579 = vmatprep.subr.bf16.mxu0 %v6961_v6  ;;  %v4336_v6 = vld [vmem:[#allocation3] sm:$0x11] }
  0x5d   : > { %1580 = vmatpush1.bf16.msra.mxu0 %v6959_v7 }
  0x5e   : > { %1581 = vmatprep.subr.bf16.mxu0 %v6964_v8  ;;  %v7028_v8 = vld [vmem:[%s10071_s4 + $0x2a0] ss:$8 sps:$4 sm:$0xff]  }
  0x61   : > { %1582 = vmatpush1.bf16.msra.mxu0 %v6962_v9  ;;  %v7030_v9 = vld [vmem:[%s10071_s4 + $0x2a4] ss:$8 sps:$4 sm:$0xff]  }
  0x62   : > { %1583 = vmatprep.subr.bf16.mxu0 %v6970_v10  ;;  %v7031_v10 = vld [vmem:[%s10071_s4 + $0x3c0] ss:$8 sps:$4 sm:$0xff]  }
  0x65   : > { %1584 = vmatpush1.bf16.msra.mxu0 %v6968_v11  ;;  %v4337_v11 = vsel %vm4335_vm11, 0, %v4336_v6 }
  0x66   : > { %1585 = vmatprep.subr.bf16.mxu0 %v6976_v12  ;;  %v4344_v12 = vld [vmem:[#allocation3 + $0x10] sm:$0x11]  ;;  %4338 = vst [vmem:[#allocation3] sm:$0x11] %v4337_v11 }
  0x69   : > { %1586 = vmatpush1.bf16.msra.mxu0 %v6974_v13  ;;  %v7033_v13 = vld [vmem:[%s10071_s4 + $0x3c4] ss:$8 sps:$4 sm:$0xff]  }
  0x6a   : > { %1587 = vmatprep.subr.bf16.mxu0 %v6982_v14  ;;  %v7036_v14 = vld [vmem:[%s10071_s4 + $0x294] ss:$8 sps:$4 sm:$0xff]  }
  0x6d   : > { %1588 = vmatpush1.bf16.msra.mxu0 %v6980_v15  ;;  %v7039_v15 = vld [vmem:[%s10071_s4 + $0x3b4] ss:$8 sps:$4 sm:$0xff]  }
  0x6e   : > { %1589 = vmatprep.subr.bf16.mxu0 %v6988_v16  ;;  %v7034_v16 = vld [vmem:[%s10071_s4 + $0x290] ss:$8 sps:$4 sm:$0xff]  }
  0x71   : > { %1590 = vmatpush1.bf16.msra.mxu0 %v6986_v17  ;;  %v4345_v17 = vsel %vm4343_vm14, 0, %v4344_v12 }
  0x72   : > { %1591 = vmatprep.subr.bf16.mxu0 %v6994_v18  ;;  %v7037_v18 = vld [vmem:[%s10071_s4 + $0x3b0] ss:$8 sps:$4 sm:$0xff]   ;;  %4346 = vst [vmem:[#allocation3 + $0x10] sm:$0x11] %v4345_v17 }
  0x75   : > { %1592 = vmatpush1.bf16.msra.mxu0 %v6992_v19 }
  0x76   : > { %1593 = vmatprep.subr.bf16.mxu0 %v7000_v20  ;;  %v7042_v20 = vld [vmem:[%s10071_s4 + $0x284] ss:$8 sps:$4 sm:$0xff]  }
  0x79   : > { %1594 = vmatpush2.bf16.msra.mxu0 %v6998_v21 }
  0x7a   : > { %1595 = vmatprep.subr.bf16.mxu0 %v7006_v51 }
  0x7d   : > { %1596 = vmatpush2.bf16.msra.mxu0 %v7004_v53 }
  0x7e   : > { %1597 = vmatprep.subr.bf16.mxu0 %v7012_v55 }
  0x81   : > { %1598 = vmatpush2.bf16.msra.mxu0 %v7010_v57 }
  0x82   : > { %1599 = vmatprep.subr.bf16.mxu0 %v7018_v59 }
  0x85   : > { %1600 = vmatpush2.bf16.msra.mxu0 %v7016_v61 }
  0x86   : > { %1601 = vmatprep.subr.bf16.mxu0 %v7024_v0 }
  0x89   : > { %1602 = vmatpush2.bf16.msra.mxu0 %v7022_v2 }
  0x8a   : > { %1603 = vmatprep.subr.bf16.mxu0 %v7030_v9 }
  0x8d   : > { %1604 = vmatpush2.bf16.msra.mxu0 %v7028_v8 }
  0x8e   : > { %1605 = vmatprep.subr.bf16.mxu0 %v7036_v14 }
  0x91   : > { %1606 = vmatpush2.bf16.msra.mxu0 %v7034_v16 }
  0x92   : > { %1607 = vmatprep.subr.bf16.mxu0 %v7042_v20 }
 0x118   : > { %v832_v22 = vpop.f32.mrf.mxu0  ;;  %v873_v25 = vpop.f32.mrf.mxu1 }
 0x119   : > { %v882_v23 = vpack.c.bf16 %v832_v22, %v832_v22  ;;  %v884_v27 = vpack.c.bf16 %v873_v25, %v873_v25  ;;  %v7045_v22 = vld [vmem:[%s10071_s4 + $0x3a4] ss:$8 sps:$4 sm:$0xff]   ;;  %v7049_v25 = vld [vmem:[%s10071_s4 + $0x394] ss:$8 sps:$4 sm:$0xff]  }
 0x11a   : > { %v834_v24 = vpop.f32.mrf.mxu0  ;;  %v875_v29 = vpop.f32.mrf.mxu1 }
 0x11b   : > { %v883_v26 = vpack.c.bf16 %v834_v24, %v834_v24  ;;  %v897_v30 = vsel %vm895_vm0, %v882_v23, 0  ;;  %v885_v31 = vpack.c.bf16 %v875_v29, %v875_v29  ;;  %v903_v35 = vsel %vm895_vm0, %v884_v27, 0  ;;  %v7040_v23 = vld [vmem:[%s10071_s4 + $0x280] ss:$8 sps:$4 sm:$0xff]   ;;  %v7047_v27 = vld [vmem:[%s10071_s4 + $0x390] ss:$8 sps:$4 sm:$0xff]  }
 0x11c   : > { %v836_v28 = vpop.f32.mrf.mxu0  ;;  %v877_v34 = vpop.f32.mrf.mxu1  ;;  %v7043_v24 = vld [vmem:[%s10071_s4 + $0x3a0] ss:$8 sps:$4 sm:$0xff]   ;;  %1608 = vmatpush2.bf16.msra.mxu0 %v7040_v23 }
 0x11d   : > { %5872 = vmatprep.subr.msk.bf16.mxu1 %vm895_vm0, %v883_v26  ;;  %v7052_v26 = vld [vmem:[%s10071_s4 + $0x74] ss:$8 sps:$4 sm:$0xff]   ;;  %v7056_v28 = vld [vmem:[%s10071_s4 + $0x384] ss:$8 sps:$4 sm:$0xff]   ;;  %v7054_v29 = vld [vmem:[%s10071_s4 + $0x380] ss:$8 sps:$4 sm:$0xff]  }
 0x11e   : > { %v837_v33 = vpop.f32.mrf.mxu0  ;;  %923 = vmatpush1.bf16.msra.mxu1 %v897_v30  ;;  %v878_v37 = vpop.f32.mrf.mxu1  ;;  %1987 = vmatprep.subr.bf16.mxu0 %v7052_v26  ;;  %v7066_v30 = vld [vmem:[%s10071_s4 + $0x174] ss:$8 sps:$4 sm:$0xff]  }
 0x11f   : > { %5874 = vmatprep.subr.msk.bf16.mxu1 %vm895_vm0, %v885_v31 }
 0x121   : > { %5873 = vmatmul.mubr.msk.bf16.vlgmr.msra.gmra.mxu1 %vm891_vm1, %v6955_v32 }
 0x122   : > { %966 = vmatpush1.bf16.msra.mxu1 %v903_v35  ;;  %983 = vmatprep.mubr.bf16.mxu1 %v7822_v3 }
 0x123   : > { %1620 = vmatprep.subr.bf16.mxu1 %v6967_v36 }
 0x129   : > { %5875 = vmatmul.mubr.msk.bf16.vlgmr.msra.gmra.mxu1 %vm891_vm1, %v6955_v32  ;;  %vm8353_vm1 = vmand %vm895_vm0, %vm4339_vm8  ;;  %vm2654_vm8 = vsmask.f32 6400 }
 0x12a   : > { %1621 = vmatpush1.bf16.msra.mxu1 %v6965_v38  ;;  %vm4383_vm0 = vmor %vm8361_vm2, %vm8353_vm1 }
 0x12b   : > { %1622 = vmatprep.subr.bf16.mxu1 %v6973_v39 }
 0x12e   : > { %1623 = vmatpush1.bf16.msra.mxu1 %v6971_v40 }
 0x12f   : > { %1624 = vmatprep.subr.bf16.mxu1 %v6979_v41 }
 0x132   : > { %1625 = vmatpush1.bf16.msra.mxu1 %v6977_v42 }
 0x133   : > { %1626 = vmatprep.subr.bf16.mxu1 %v6985_v43 }
 0x136   : > { %1627 = vmatpush1.bf16.msra.mxu1 %v6983_v44 }
 0x137   : > { %1628 = vmatprep.subr.bf16.mxu1 %v6991_v45 }
 0x13a   : > { %1629 = vmatpush1.bf16.msra.mxu1 %v6989_v46 }
 0x13b   : > { %1630 = vmatprep.subr.bf16.mxu1 %v6997_v47 }
 0x13e   : > { %1631 = vmatpush1.bf16.msra.mxu1 %v6995_v48 }
 0x13f   : > { %1632 = vmatprep.subr.bf16.mxu1 %v7003_v49 }
 0x142   : > { %1633 = vmatpush1.bf16.msra.mxu1 %v7001_v50 }
 0x143   : > { %1634 = vmatprep.subr.bf16.mxu1 %v7009_v52 }
 0x146   : > { %1635 = vmatpush1.bf16.msra.mxu1 %v7007_v54 }
 0x147   : > { %1636 = vmatprep.subr.bf16.mxu1 %v7015_v56 }
 0x14a   : > { %1637 = vmatpush2.bf16.msra.mxu1 %v7013_v58 }
 0x14b   : > { %1638 = vmatprep.subr.bf16.mxu1 %v7021_v60 }
 0x14e   : > { %1639 = vmatpush2.bf16.msra.mxu1 %v7019_v62 }
 0x14f   : > { %1640 = vmatprep.subr.bf16.mxu1 %v7027_v1 }
 0x152   : > { %1641 = vmatpush2.bf16.msra.mxu1 %v7025_v4 }
 0x153   : > { %1642 = vmatprep.subr.bf16.mxu1 %v7033_v13 }
 0x156   : > { %1643 = vmatpush2.bf16.msra.mxu1 %v7031_v10 }
 0x157   : > { %1644 = vmatprep.subr.bf16.mxu1 %v7039_v15 }
 0x15a   : > { %1645 = vmatpush2.bf16.msra.mxu1 %v7037_v18 }
 0x15b   : > { %1646 = vmatprep.subr.bf16.mxu1 %v7045_v22 }
 0x15e   : > { %1647 = vmatpush2.bf16.msra.mxu1 %v7043_v24  ;;  %v7050_v24 = vld [vmem:[%s10071_s4 + $0x70] ss:$8 sps:$4 sm:$0xff]  }
 0x15f   : > { %1648 = vmatprep.subr.bf16.mxu1 %v7049_v25 }
 0x162   : > { %1649 = vmatpush2.bf16.msra.mxu1 %v7047_v27 }
 0x163   : > { %1650 = vmatprep.subr.bf16.mxu1 %v7056_v28 }
 0x166   : > { %1651 = vmatpush2.bf16.msra.mxu1 %v7054_v29  ;;  %v7059_v29 = vld [vmem:[%s10071_s4 + $0x64] ss:$8 sps:$4 sm:$0xff]  }
 0x167   : > { %2030 = vmatprep.subr.bf16.mxu1 %v7066_v30 }
 0x1e1   : > { %v942_v31 = vpop.f32.mrf.mxu1 }
 0x1e3   : > { %v944_v32 = vpop.f32.mrf.mxu1 }
 0x1e4   : > { %v6740_v33 = vpack.c.bf16 %v944_v32, %v942_v31 }
 0x1e5   : > { %v946_v34 = vpop.f32.mrf.mxu1 }
 0x1e6   : > { %v1021_v35 = vrot.slane %v6740_v33, 7 }
 0x1e7   : > { %v948_v36 = vpop.f32.mrf.mxu1 }
 0x1e8   : > { %1037 = vst [vmem:[#allocation2 + $0x18] sm:$0xee] %v1021_v35  ;;  %v6742_v37 = vpack.c.bf16 %v948_v36, %v946_v34  ;;  %v1023_v39 = vrot.slane %v1021_v35, 4 }
 0x1e9   : > { %v985_v38 = vpop.f32.mrf.mxu1 }
 0x1ea   : > { %v1024_v40 = vrot.slane %v6742_v37, 7 }
 0x1eb   : > { %v987_v41 = vpop.f32.mrf.mxu1 }
 0x1ec   : > { %v8398_v42 = vsel %vm8287_vm4, %v1023_v39, %v1024_v40  ;;  %v1029_v43 = vrot.slane %v1024_v40, 4  ;;  %v6741_v44 = vpack.c.bf16 %v987_v41, %v985_v38  ;;  %v7057_v38 = vld [vmem:[%s10071_s4 + $0x60] ss:$8 sps:$4 sm:$0xff]  }
 0x1ed   : > { %v989_v45 = vpop.f32.mrf.mxu1 }
 0x1ee   : > { %1041 = vst [vmem:[#allocation2 + $0x8] sm:$0x11] %v1029_v43  ;;  %v1022_v46 = vrot.slane %v6741_v44, 7  ;;  %v7063_v43 = vld [vmem:[%s10071_s4 + $0x54] ss:$8 sps:$4 sm:$0xff]  }
 0x1ef   : > { %v991_v47 = vpop.f32.mrf.mxu1  ;;  %v1043_v48 = vld [vmem:[#allocation2 + $0x18] sm:$0xff] }
 0x1f0   : > { %1038 = vst [vmem:[#allocation2 + $0x20] sm:$0xee] %v1022_v46  ;;  %v6743_v49 = vpack.c.bf16 %v991_v47, %v989_v45  ;;  %v5945_v50 = vcombine.high %v1043_v48, %v8398_v42  ;;  %v8402_v51 = vcombine.low %v1043_v48, %v8398_v42  ;;  %v2073_v52 = vld [vmem:[#allocation2 + $0x18] sm:$0xee]  ;;  %v1026_v53 = vrot.slane %v1022_v46, 4 }
 0x1f1   : > { %v8406_v57 = vcombine.high %v2073_v52, %v8398_v42  ;;  %v8413_v62 = vcombine.low %v2073_v52, %v8398_v42  ;;  %v7061_v52 = vld [vmem:[%s10071_s4 + $0x50] ss:$8 sps:$4 sm:$0xff]  }
 0x1f2   : > { %v1027_v54 = vrot.slane %v6743_v49, 7  ;;  %v1220_v55 = vshll.u32 %v5945_v50, 16  ;;  %v1208_v56 = vshll.u32 %v8402_v51, 16  ;;  %v1218_v4 = vshrl.u32 %v5945_v50, 16 }
 0x1f3   : > { %v1206_v6 = vshrl.u32 %v8402_v51, 16  ;;  %v2154_v63 = vrot.slane %v8406_v57, 1  ;;  %v2151_v16 = vrot.slane %v8413_v62, 1 }
 0x1f4   : > { %v8410_v58 = vsel %vm8287_vm4, %v1026_v53, %v1027_v54  ;;  %v1030_v59 = vrot.slane %v1027_v54, 4  ;;  %v1222_v61 = vrot.slane %v1220_v55, 1  ;;  %v1210_v2 = vrot.slane %v1208_v56, 1  ;;  %v7064_v56 = vld [vmem:[%s10071_s4 + $0x170] ss:$8 sps:$4 sm:$0xff]  }
 0x1f5   : > { %v1111_v60 = vld [vmem:[#allocation2 + $0x8] sm:$0x11]  ;;  %vm3214_vm4 = vcmask 1045504  }
 0x1f6   : > { %1042 = vst [vmem:[#allocation2] sm:$0x11] %v1030_v59  ;;  %v5949_v0 = vcombine.high %v1111_v60, %v1111_v60  ;;  %v5948_v1 = vcombine.low %v1111_v60, %v1111_v60  ;;  %v1223_v13 = vor.u32 %v1222_v61, %v1218_v4  ;;  %v1211_v20 = vor.u32 %v1210_v2, %v1206_v6  ;;  %v2577_v59 = vld [vmem:[#allocation2 + $0x8] sm:$0x33]  ;;  %v3137_v60 = vld [vmem:[#allocation2 + $0x18] sm:$0xcc] }
 0x1f7   : > { %v1044_v8 = vld [vmem:[#allocation2 + $0x20] sm:$0xff]  ;;  %v8476_v6 = vcombine.high %v2577_v59, %v2577_v59 }
 0x1f8   : > { %v1225_v9 = vshll.u32 %v5949_v0, 16  ;;  %v1213_v10 = vshll.u32 %v5948_v1, 16  ;;  %v8418_v11 = vcombine.high %v1044_v8, %v8410_v58  ;;  %v8421_v12 = vcombine.low %v1044_v8, %v8410_v58  ;;  %v2074_v15 = vld [vmem:[#allocation2 + $0x20] sm:$0xee] }
 0x1f9   : > { %v2155_v14 = vrot.slane %v5949_v0, 1  ;;  %v2152_v17 = vrot.slane %v5948_v1, 1  ;;  %v8438_v30 = vcombine.high %v2074_v15, %v8410_v58  ;;  %v8444_v37 = vcombine.low %v2074_v15, %v8410_v58  ;;  %v7070_v1 = vld [vmem:[%s10071_s4 + $0x44] ss:$8 sps:$4 sm:$0xff]   ;;  %v7079_v15 = vld [vmem:[%s10071_s4 + $0x154] ss:$8 sps:$4 sm:$0xff]  }
 0x1fa   : > { %v1227_v18 = vrot.slane %v1225_v9, 1  ;;  %v1215_v22 = vrot.slane %v1213_v10, 1  ;;  %v1244_v23 = vshll.u32 %v8418_v11, 16  ;;  %v1232_v25 = vshll.u32 %v8421_v12, 16  ;;  %v7073_v4 = vld [vmem:[%s10071_s4 + $0x164] ss:$8 sps:$4 sm:$0xff]  }
 0x1fb   : > { %v8430_v26 = vsel %vm2150_vm6, %v2154_v63, %v2155_v14  ;;  %v8441_v31 = vsel %vm2150_vm6, %v2151_v16, %v2152_v17  ;;  %v1242_v39 = vshrl.u32 %v8418_v11, 16  ;;  %v1230_v40 = vshrl.u32 %v8421_v12, 16  ;;  %v3138_v9 = vld [vmem:[#allocation2 + $0x20] sm:$0xcc]  ;;  %v7076_v14 = vld [vmem:[%s10071_s4 + $0x34] ss:$8 sps:$4 sm:$0xff]  }
 0x1fc   : > { %v1228_v27 = vsel %vm1204_vm3, %v1223_v13, %v1227_v18  ;;  %v1216_v28 = vsel %vm1204_vm3, %v1211_v20, %v1215_v22  ;;  %v1246_v33 = vrot.slane %v1244_v23, 1  ;;  %v1234_v34 = vrot.slane %v1232_v25, 1  ;;  %v7068_v10 = vld [vmem:[%s10071_s4 + $0x40] ss:$8 sps:$4 sm:$0xff]   ;;  %v7077_v25 = vld [vmem:[%s10071_s4 + $0x150] ss:$8 sps:$4 sm:$0xff]  }
 0x1fd   : > { %1609 = vmatprep.mubr.bf16.mxu0 %v1228_v27  ;;  %v1112_v32 = vld [vmem:[#allocation2] sm:$0x11]  ;;  %v2160_v45 = vrot.slane %v8438_v30, 1  ;;  %v2157_v49 = vrot.slane %v8444_v37, 1  ;;  %v6409_v63 = vcombine.high %v3137_v60, %v8398_v42  ;;  %v6411_v18 = vcombine.high %v3138_v9, %v8410_v58 }
 0x1fe   : > { %1610 = vmatmul.mubr.bf16.vlgmr.msra.gmra.mxu0 %v1216_v28  ;;  %v5951_v35 = vcombine.high %v1112_v32, %v1112_v32  ;;  %v5950_v36 = vcombine.low %v1112_v32, %v1112_v32  ;;  %v1247_v47 = vor.u32 %v1246_v33, %v1242_v39  ;;  %v1235_v48 = vor.u32 %v1234_v34, %v1230_v40  ;;  %v2578_v8 = vld [vmem:[#allocation2] sm:$0x33] }
 0x1ff   : > { %1988 = vmatpush1.bf16.msra.mxu0 %v7050_v24  ;;  %2019 = vmatprep.mubr.bf16.mxu0 %v5945_v50  ;;  %v7071_v13 = vld [vmem:[%s10071_s4 + $0x160] ss:$8 sps:$4 sm:$0xff]   ;;  %v8492_v16 = vcombine.high %v2578_v8, %v2578_v8  ;;  %v6278_v17 = vcombine.low %v2578_v8, %v2578_v8  ;;  %v3218_v20 = vrot.slane %v6409_v63, 2  ;;  %v3219_v22 = vrot.slane %v8476_v6, 2  ;;  %v7074_v24 = vld [vmem:[%s10071_s4 + $0x30] ss:$8 sps:$4 sm:$0xff]  }
 0x200   : > { %1989 = vmatprep.subr.bf16.mxu0 %v7059_v29  ;;  %v1249_v41 = vshll.u32 %v5951_v35, 16  ;;  %v1237_v44 = vshll.u32 %v5950_v36, 16  ;;  %v2161_v46 = vrot.slane %v5951_v35, 1  ;;  %v2158_v55 = vrot.slane %v5950_v36, 1  ;;  %v7082_v28 = vld [vmem:[%s10071_s4 + $0x24] ss:$8 sps:$4 sm:$0xff]  }
 0x201   : > { %v2693_v23 = vshll.u32 %v8444_v37, 16  ;;  %v6408_v27 = vcombine.low %v3137_v60, %v8398_v42  ;;  %v7085_v29 = vld [vmem:[%s10071_s4 + $0x144] ss:$8 sps:$4 sm:$0xff]   ;;  %v8511_v32 = vcombine.low %v2577_v59, %v2577_v59  ;;  %v8514_v33 = vsel %vm3214_vm4, %v3218_v20, %v3219_v22  ;;  %v7080_v40 = vld [vmem:[%s10071_s4 + $0x20] ss:$8 sps:$4 sm:$0xff]  }
 0x202   : > { %v1251_v50 = vrot.slane %v1249_v41, 1  ;;  %v1239_v53 = vrot.slane %v1237_v44, 1  ;;  %v8460_v54 = vsel %vm2150_vm6, %v2160_v45, %v2161_v46  ;;  %v8471_v2 = vsel %vm2150_vm6, %v2157_v49, %v2158_v55  ;;  %v7083_v41 = vld [vmem:[%s10071_s4 + $0x140] ss:$8 sps:$4 sm:$0xff]   ;;  %v7091_v45 = vld [vmem:[%s10071_s4 + $0x134] ss:$8 sps:$4 sm:$0xff]  }
 0x203   : > { %1990 = vmatpush1.bf16.msra.mxu0 %v7057_v38  ;;  %v6410_v34 = vcombine.low %v3138_v9, %v8410_v58  ;;  %v2695_v36 = vrot.slane %v2693_v23, 2  ;;  %v2698_v42 = vshrl.u32 %v6278_v17, 16  ;;  %v3224_v38 = vrot.slane %v6411_v18, 2  ;;  %v7088_v58 = vld [vmem:[%s10071_s4 + $0x14] ss:$8 sps:$4 sm:$0xff]  }
 0x204   : > { %v1252_v61 = vsel %vm1204_vm3, %v1247_v47, %v1251_v50  ;;  %1991 = vmatprep.subr.bf16.mxu0 %v7063_v43  ;;  %v1240_v0 = vsel %vm1204_vm3, %v1235_v48, %v1239_v53  ;;  %v3225_v39 = vrot.slane %v8492_v16, 2  ;;  %v3215_v47 = vrot.slane %v6408_v27, 2  ;;  %v7089_v59 = vld [vmem:[%s10071_s4 + $0x130] ss:$8 sps:$4 sm:$0xff]   ;;  %v7095_v8 = vld [vmem:[%s10071_s4 + $0x120] ss:$8 sps:$4 sm:$0xff]  }
 0x205   : > { %1652 = vmatprep.mubr.bf16.mxu1 %v1252_v61  ;;  %v2700_v43 = vrot.slane %v2698_v42, 1  ;;  %v3216_v48 = vrot.slane %v8511_v32, 2  ;;  %v3222_v53 = vrot.slane %v6278_v17, 2  ;;  %v7100_v63 = vld [vmem:[%s10071_s4 + $0xf4] ss:$8 sps:$4 sm:$0xff]  }
 0x206   : > { %1653 = vmatmul.mubr.bf16.vlgmr.msra.gmra.mxu1 %v1240_v0  ;;  %v8531_v46 = vsel %vm3214_vm4, %v3224_v38, %v3225_v39  ;;  %v7094_v0 = vld [vmem:[%s10071_s4 + $0x4] ss:$8 sps:$4 sm:$0xff]   ;;  %v7103_v9 = vld [vmem:[%s10071_s4 + $0x114] ss:$8 sps:$4 sm:$0xff]   ;;  %v7107_v18 = vld [vmem:[%s10071_s4 + $0x100] ss:$8 sps:$4 sm:$0xff]  }
 0x207   : > { %1992 = vmatpush1.bf16.msra.mxu0 %v7061_v52  ;;  %2031 = vmatpush1.bf16.msra.mxu1 %v7064_v56  ;;  %v3221_v52 = vrot.slane %v6410_v34, 2  ;;  %v8535_v55 = vsel %vm3214_vm4, %v3215_v47, %v3216_v48  ;;  %v7086_v56 = vld [vmem:[%s10071_s4 + $0x10] ss:$8 sps:$4 sm:$0xff]   ;;  %v7112_v20 = vld [vmem:[%s10071_s4 + $0xd4] ss:$8 sps:$4 sm:$0xff]  }
 0x208   : > { %2062 = vmatprep.mubr.bf16.mxu1 %v8418_v11  ;;  %1993 = vmatprep.subr.bf16.mxu0 %v7070_v1  ;;  %v2690_v11 = vshrl.u32 %v8444_v37, 16  ;;  %v2701_v37 = vshll.u32 %v6278_v17, 16  ;;  %v7097_v1 = vld [vmem:[%s10071_s4 + $0x124] ss:$8 sps:$4 sm:$0xff]   ;;  %v7104_v17 = vld [vmem:[%s10071_s4 + $0xe0] ss:$8 sps:$4 sm:$0xff]  }
 0x209   : > { %2032 = vmatprep.subr.bf16.mxu1 %v7073_v4  ;;  %v8547_v61 = vsel %vm3214_vm4, %v3221_v52, %v3222_v53  ;;  %v7092_v4 = vld [vmem:[%s10071_s4] ss:$8 sps:$4 sm:$0xff]   ;;  %v7115_v22 = vld [vmem:[%s10071_s4 + $0x1f4] ss:$8 sps:$4 sm:$0xff]   ;;  %v7113_v23 = vld [vmem:[%s10071_s4 + $0x1f0] ss:$8 sps:$4 sm:$0xff]  }
 0x20a   : > { %v2692_v35 = vrot.slane %v2690_v11, 1  ;;  %v2703_v44 = vrot.slane %v2701_v37, 2  ;;  %v7110_v11 = vld [vmem:[%s10071_s4 + $0xd0] ss:$8 sps:$4 sm:$0xff]   ;;  %v7116_v27 = vld [vmem:[%s10071_s4 + $0xc0] ss:$8 sps:$4 sm:$0xff]  }
 0x20b   : > { %1994 = vmatpush1.bf16.msra.mxu0 %v7068_v10  ;;  %2033 = vmatpush1.bf16.msra.mxu1 %v7071_v13  ;;  %v7098_v10 = vld [vmem:[%s10071_s4 + $0xf0] ss:$8 sps:$4 sm:$0xff]   ;;  %v7127_v34 = vld [vmem:[%s10071_s4 + $0x1d4] ss:$8 sps:$4 sm:$0xff]   ;;  %v7130_v42 = vld [vmem:[%s10071_s4 + $0xa4] ss:$8 sps:$4 sm:$0xff]  }
 0x20c   : > { %1995 = vmatprep.subr.bf16.mxu0 %v7076_v14  ;;  %2034 = vmatprep.subr.bf16.mxu1 %v7079_v15  ;;  %v2696_v49 = vor.u32 %v2695_v36, %v2692_v35  ;;  %v2704_v50 = vor.u32 %v2703_v44, %v2700_v43  ;;  %v7101_v13 = vld [vmem:[%s10071_s4 + $0x110] ss:$8 sps:$4 sm:$0xff]   ;;  %v7106_v14 = vld [vmem:[%s10071_s4 + $0xe4] ss:$8 sps:$4 sm:$0xff]   ;;  %v7128_v38 = vld [vmem:[%s10071_s4 + $0xa0] ss:$8 sps:$4 sm:$0xff]  }
 0x20d   : > { %v7109_v15 = vld [vmem:[%s10071_s4 + $0x104] ss:$8 sps:$4 sm:$0xff]   ;;  %v7122_v35 = vld [vmem:[%s10071_s4 + $0xb0] ss:$8 sps:$4 sm:$0xff]   ;;  %v7131_v39 = vld [vmem:[%s10071_s4 + $0x1c0] ss:$8 sps:$4 sm:$0xff]  }
 0x20e   : > { %v8544_v60 = vsel %vm2654_vm8, %v2696_v49, %v2704_v50  ;;  %v7125_v36 = vld [vmem:[%s10071_s4 + $0x1d0] ss:$8 sps:$4 sm:$0xff]   ;;  %v7133_v37 = vld [vmem:[%s10071_s4 + $0x1c4] ss:$8 sps:$4 sm:$0xff]   ;;  %v7140_v47 = vld [vmem:[%s10071_s4 + $0x80] ss:$8 sps:$4 sm:$0xff]  }
 0x20f   : > { %1996 = vmatpush1.bf16.msra.mxu0 %v7074_v24  ;;  %2035 = vmatpush1.bf16.msra.mxu1 %v7077_v25  ;;  %v7118_v24 = vld [vmem:[%s10071_s4 + $0xc4] ss:$8 sps:$4 sm:$0xff]   ;;  %v7134_v43 = vld [vmem:[%s10071_s4 + $0x90] ss:$8 sps:$4 sm:$0xff]   ;;  %v7143_v48 = vld [vmem:[%s10071_s4 + $0x1a0] ss:$8 sps:$4 sm:$0xff]  }
 0x210   : > { %1997 = vmatprep.subr.bf16.mxu0 %v7082_v28  ;;  %2036 = vmatprep.subr.bf16.mxu1 %v7085_v29  ;;  %v7121_v25 = vld [vmem:[%s10071_s4 + $0x1e4] ss:$8 sps:$4 sm:$0xff]   ;;  %v7119_v28 = vld [vmem:[%s10071_s4 + $0x1e0] ss:$8 sps:$4 sm:$0xff]   ;;  %v7124_v29 = vld [vmem:[%s10071_s4 + $0xb4] ss:$8 sps:$4 sm:$0xff]  }
 0x211   : > { %v7137_v44 = vld [vmem:[%s10071_s4 + $0x1b0] ss:$8 sps:$4 sm:$0xff]   ;;  %v7148_v49 = vld [vmem:[%s10071_s4 + $0x194] ss:$8 sps:$4 sm:$0xff]  }
 0x212   : > { %v7151_v50 = vld [vmem:[%s10071_s4 + $0x474] ss:$8 sps:$4 sm:$0xff]   ;;  %v7146_v52 = vld [vmem:[%s10071_s4 + $0x190] ss:$8 sps:$4 sm:$0xff]  }
 0x213   : > { %1998 = vmatpush1.bf16.msra.mxu0 %v7080_v40  ;;  %2037 = vmatpush1.bf16.msra.mxu1 %v7083_v41  ;;  %v7136_v40 = vld [vmem:[%s10071_s4 + $0x94] ss:$8 sps:$4 sm:$0xff]   ;;  %v7149_v53 = vld [vmem:[%s10071_s4 + $0x470] ss:$8 sps:$4 sm:$0xff]  }
 0x214   : > { %1999 = vmatprep.subr.bf16.mxu0 %v7088_v58  ;;  %2038 = vmatprep.subr.bf16.mxu1 %v7091_v45  ;;  %v7139_v41 = vld [vmem:[%s10071_s4 + $0x1b4] ss:$8 sps:$4 sm:$0xff]   ;;  %v7142_v58 = vld [vmem:[%s10071_s4 + $0x84] ss:$8 sps:$4 sm:$0xff]  }
 0x215   : > { %v7145_v45 = vld [vmem:[%s10071_s4 + $0x1a4] ss:$8 sps:$4 sm:$0xff]  }
 0x217   : > { %2000 = vmatpush1.bf16.msra.mxu0 %v7086_v56  ;;  %2039 = vmatpush1.bf16.msra.mxu1 %v7089_v59  ;;  %v7154_v56 = vld [vmem:[%s10071_s4 + $0x184] ss:$8 sps:$4 sm:$0xff]  }
 0x218   : > { %2001 = vmatprep.subr.bf16.mxu0 %v7094_v0  ;;  %2040 = vmatprep.subr.bf16.mxu1 %v7097_v1  ;;  %v7157_v59 = vld [vmem:[%s10071_s4 + $0x464] ss:$8 sps:$4 sm:$0xff]   ;;  %v7152_v0 = vld [vmem:[%s10071_s4 + $0x180] ss:$8 sps:$4 sm:$0xff]  }
 0x219   : > { %v7155_v1 = vld [vmem:[%s10071_s4 + $0x460] ss:$8 sps:$4 sm:$0xff]  }
 0x21b   : > { %2002 = vmatpush1.bf16.msra.mxu0 %v7092_v4  ;;  %2041 = vmatpush1.bf16.msra.mxu1 %v7095_v8  ;;  %v7160_v4 = vld [vmem:[%s10071_s4 + $0x454] ss:$8 sps:$4 sm:$0xff]   ;;  %v7158_v8 = vld [vmem:[%s10071_s4 + $0x450] ss:$8 sps:$4 sm:$0xff]  }
 0x21c   : > { %2003 = vmatprep.subr.bf16.mxu0 %v7100_v63  ;;  %2042 = vmatprep.subr.bf16.mxu1 %v7103_v9  ;;  %v7166_v63 = vld [vmem:[%s10071_s4 + $0x444] ss:$8 sps:$4 sm:$0xff]  }
 0x21d   : > { %v7169_v9 = vld [vmem:[%s10071_s4 + $0x564] ss:$8 sps:$4 sm:$0xff]  }
 0x21f   : > { %2004 = vmatpush2.bf16.msra.mxu0 %v7098_v10  ;;  %2043 = vmatpush1.bf16.msra.mxu1 %v7101_v13  ;;  %v7164_v10 = vld [vmem:[%s10071_s4 + $0x440] ss:$8 sps:$4 sm:$0xff]  }
 0x220   : > { %2005 = vmatprep.subr.bf16.mxu0 %v7106_v14  ;;  %2044 = vmatprep.subr.bf16.mxu1 %v7109_v15  ;;  %v7167_v13 = vld [vmem:[%s10071_s4 + $0x560] ss:$8 sps:$4 sm:$0xff]   ;;  %v7172_v14 = vld [vmem:[%s10071_s4 + $0x434] ss:$8 sps:$4 sm:$0xff]   ;;  %v7170_v15 = vld [vmem:[%s10071_s4 + $0x430] ss:$8 sps:$4 sm:$0xff]  }
 0x223   : > { %2006 = vmatpush2.bf16.msra.mxu0 %v7104_v17  ;;  %2045 = vmatpush1.bf16.msra.mxu1 %v7107_v18  ;;  %v7178_v17 = vld [vmem:[%s10071_s4 + $0x424] ss:$8 sps:$4 sm:$0xff]  }
 0x224   : > { %2007 = vmatprep.subr.bf16.mxu0 %v7112_v20  ;;  %2046 = vmatprep.subr.bf16.mxu1 %v7115_v22  ;;  %v7181_v18 = vld [vmem:[%s10071_s4 + $0x544] ss:$8 sps:$4 sm:$0xff]   ;;  %v7176_v20 = vld [vmem:[%s10071_s4 + $0x420] ss:$8 sps:$4 sm:$0xff]  }
 0x225   : > { %v7179_v22 = vld [vmem:[%s10071_s4 + $0x540] ss:$8 sps:$4 sm:$0xff]  }
 0x227   : > { %2008 = vmatpush2.bf16.msra.mxu0 %v7110_v11  ;;  %2047 = vmatpush2.bf16.msra.mxu1 %v7113_v23  ;;  %v7184_v11 = vld [vmem:[%s10071_s4 + $0x414] ss:$8 sps:$4 sm:$0xff]  }
 0x228   : > { %2009 = vmatprep.subr.bf16.mxu0 %v7118_v24  ;;  %2048 = vmatprep.subr.bf16.mxu1 %v7121_v25  ;;  %v7187_v23 = vld [vmem:[%s10071_s4 + $0x534] ss:$8 sps:$4 sm:$0xff]   ;;  %v7182_v24 = vld [vmem:[%s10071_s4 + $0x410] ss:$8 sps:$4 sm:$0xff]  }
 0x229   : > { %v7185_v25 = vld [vmem:[%s10071_s4 + $0x530] ss:$8 sps:$4 sm:$0xff]  }
 0x22b   : > { %2010 = vmatpush2.bf16.msra.mxu0 %v7116_v27  ;;  %2049 = vmatpush2.bf16.msra.mxu1 %v7119_v28  ;;  %v7190_v27 = vld [vmem:[%s10071_s4 + $0x404] ss:$8 sps:$4 sm:$0xff]  }
 0x22c   : > { %2011 = vmatprep.subr.bf16.mxu0 %v7124_v29  ;;  %2050 = vmatprep.subr.bf16.mxu1 %v7127_v34  ;;  %v7193_v28 = vld [vmem:[%s10071_s4 + $0x524] ss:$8 sps:$4 sm:$0xff]   ;;  %v7188_v29 = vld [vmem:[%s10071_s4 + $0x400] ss:$8 sps:$4 sm:$0xff]  }
 0x22d   : > { %v7191_v34 = vld [vmem:[%s10071_s4 + $0x520] ss:$8 sps:$4 sm:$0xff]  }
 0x22f   : > { %2012 = vmatpush2.bf16.msra.mxu0 %v7122_v35  ;;  %2051 = vmatpush2.bf16.msra.mxu1 %v7125_v36  ;;  %v7196_v35 = vld [vmem:[%s10071_s4 + $0x4f4] ss:$8 sps:$4 sm:$0xff]  }
 0x230   : > { %2013 = vmatprep.subr.bf16.mxu0 %v7130_v42  ;;  %2052 = vmatprep.subr.bf16.mxu1 %v7133_v37  ;;  %v7199_v36 = vld [vmem:[%s10071_s4 + $0x514] ss:$8 sps:$4 sm:$0xff]   ;;  %v7194_v42 = vld [vmem:[%s10071_s4 + $0x4f0] ss:$8 sps:$4 sm:$0xff]  }
 0x231   : > { %v7197_v37 = vld [vmem:[%s10071_s4 + $0x510] ss:$8 sps:$4 sm:$0xff]  }
 0x233   : > { %2014 = vmatpush2.bf16.msra.mxu0 %v7128_v38  ;;  %2053 = vmatpush2.bf16.msra.mxu1 %v7131_v39  ;;  %v7202_v38 = vld [vmem:[%s10071_s4 + $0x4e4] ss:$8 sps:$4 sm:$0xff]  }
 0x234   : > { %2015 = vmatprep.subr.bf16.mxu0 %v7136_v40  ;;  %2054 = vmatprep.subr.bf16.mxu1 %v7139_v41  ;;  %v7205_v39 = vld [vmem:[%s10071_s4 + $0x504] ss:$8 sps:$4 sm:$0xff]   ;;  %v7200_v40 = vld [vmem:[%s10071_s4 + $0x4e0] ss:$8 sps:$4 sm:$0xff]  }
 0x235   : > { %v7203_v41 = vld [vmem:[%s10071_s4 + $0x500] ss:$8 sps:$4 sm:$0xff]  }
 0x237   : > { %2016 = vmatpush2.bf16.msra.mxu0 %v7134_v43  ;;  %2055 = vmatpush2.bf16.msra.mxu1 %v7137_v44  ;;  %v7208_v43 = vld [vmem:[%s10071_s4 + $0x4d4] ss:$8 sps:$4 sm:$0xff]  }
 0x238   : > { %2017 = vmatprep.subr.bf16.mxu0 %v7142_v58  ;;  %2056 = vmatprep.subr.bf16.mxu1 %v7145_v45  ;;  %v7211_v44 = vld [vmem:[%s10071_s4 + $0x5f4] ss:$8 sps:$4 sm:$0xff]   ;;  %v7206_v58 = vld [vmem:[%s10071_s4 + $0x4d0] ss:$8 sps:$4 sm:$0xff]  }
 0x239   : > { %v7209_v45 = vld [vmem:[%s10071_s4 + $0x5f0] ss:$8 sps:$4 sm:$0xff]  }
 0x23b   : > { %2018 = vmatpush2.bf16.msra.mxu0 %v7140_v47  ;;  %2057 = vmatpush2.bf16.msra.mxu1 %v7143_v48  ;;  %v7214_v47 = vld [vmem:[%s10071_s4 + $0x4c4] ss:$8 sps:$4 sm:$0xff]  }
 0x23c   : > { %2058 = vmatprep.subr.bf16.mxu1 %v7148_v49  ;;  %2487 = vmatprep.subr.bf16.mxu0 %v7151_v50  ;;  %v7217_v48 = vld [vmem:[%s10071_s4 + $0x5e4] ss:$8 sps:$4 sm:$0xff]   ;;  %v7212_v49 = vld [vmem:[%s10071_s4 + $0x4c0] ss:$8 sps:$4 sm:$0xff]  }
 0x23d   : > { %v7215_v50 = vld [vmem:[%s10071_s4 + $0x5e0] ss:$8 sps:$4 sm:$0xff]  }
 0x23e   : > { %2020 = vmatmul.mubr.bf16.vlgmr.msra.gmra.mxu0 %v8402_v51  ;;  %v7163_v51 = vld [vmem:[%s10071_s4 + $0x574] ss:$8 sps:$4 sm:$0xff]  }
 0x23f   : > { %2059 = vmatpush2.bf16.msra.mxu1 %v7146_v52  ;;  %2488 = vmatpush1.bf16.msra.mxu0 %v7149_v53  ;;  %v7220_v52 = vld [vmem:[%s10071_s4 + $0x4b4] ss:$8 sps:$4 sm:$0xff]  }
 0x240   : > { %2519 = vmatprep.mubr.bf16.mxu0 %v8430_v26  ;;  %2060 = vmatprep.subr.bf16.mxu1 %v7154_v56  ;;  %v7161_v26 = vld [vmem:[%s10071_s4 + $0x570] ss:$8 sps:$4 sm:$0xff]   ;;  %v7223_v53 = vld [vmem:[%s10071_s4 + $0x5d4] ss:$8 sps:$4 sm:$0xff]  }
 0x241   : > { %2489 = vmatprep.subr.bf16.mxu0 %v7157_v59  ;;  %v7218_v56 = vld [vmem:[%s10071_s4 + $0x4b0] ss:$8 sps:$4 sm:$0xff]  }
 0x242   : > { %v7221_v59 = vld [vmem:[%s10071_s4 + $0x5d0] ss:$8 sps:$4 sm:$0xff]  }
 0x243   : > { %2061 = vmatpush2.bf16.msra.mxu1 %v7152_v0  ;;  %2490 = vmatpush1.bf16.msra.mxu0 %v7155_v1  ;;  %v7226_v0 = vld [vmem:[%s10071_s4 + $0x4a4] ss:$8 sps:$4 sm:$0xff]  }
 0x244   : > { %2491 = vmatprep.subr.bf16.mxu0 %v7160_v4  ;;  %2530 = vmatprep.subr.bf16.mxu1 %v7163_v51  ;;  %v7229_v1 = vld [vmem:[%s10071_s4 + $0x5c4] ss:$8 sps:$4 sm:$0xff]   ;;  %v7224_v4 = vld [vmem:[%s10071_s4 + $0x4a0] ss:$8 sps:$4 sm:$0xff]  }
 0x245   : > { %v7227_v51 = vld [vmem:[%s10071_s4 + $0x5c0] ss:$8 sps:$4 sm:$0xff]  }
 0x246   : > { %2063 = vmatmul.mubr.bf16.vlgmr.msra.gmra.mxu1 %v8421_v12  ;;  %v7175_v12 = vld [vmem:[%s10071_s4 + $0x554] ss:$8 sps:$4 sm:$0xff]  }
 0x247   : > { %2492 = vmatpush1.bf16.msra.mxu0 %v7158_v8  ;;  %2531 = vmatpush1.bf16.msra.mxu1 %v7161_v26  ;;  %v7232_v8 = vld [vmem:[%s10071_s4 + $0x494] ss:$8 sps:$4 sm:$0xff]  }
 0x248   : > { %2562 = vmatprep.mubr.bf16.mxu1 %v8460_v54  ;;  %2493 = vmatprep.subr.bf16.mxu0 %v7166_v63  ;;  %v7173_v54 = vld [vmem:[%s10071_s4 + $0x550] ss:$8 sps:$4 sm:$0xff]   ;;  %v7235_v26 = vld [vmem:[%s10071_s4 + $0x5b4] ss:$8 sps:$4 sm:$0xff]  }
 0x249   : > { %2532 = vmatprep.subr.bf16.mxu1 %v7169_v9  ;;  %v7230_v63 = vld [vmem:[%s10071_s4 + $0x490] ss:$8 sps:$4 sm:$0xff]  }
 0x24a   : > { %v7233_v9 = vld [vmem:[%s10071_s4 + $0x5b0] ss:$8 sps:$4 sm:$0xff]  }
 0x24b   : > { %2494 = vmatpush1.bf16.msra.mxu0 %v7164_v10  ;;  %2533 = vmatpush1.bf16.msra.mxu1 %v7167_v13  ;;  %v2681_v10 = vshrl.u32 %v8476_v6, 16  ;;  %v2684_v13 = vshll.u32 %v8476_v6, 16  ;;  %v7236_v6 = vld [vmem:[%s10071_s4 + $0x480] ss:$8 sps:$4 sm:$0xff]  }
 0x24c   : > { %2495 = vmatprep.subr.bf16.mxu0 %v7172_v14  ;;  %2534 = vmatprep.subr.bf16.mxu1 %v7175_v12  ;;  %v7238_v14 = vld [vmem:[%s10071_s4 + $0x484] ss:$8 sps:$4 sm:$0xff]  }
 0x24d   : > { %v7241_v12 = vld [vmem:[%s10071_s4 + $0x5a4] ss:$8 sps:$4 sm:$0xff]  }
 0x24f   : > { %2496 = vmatpush1.bf16.msra.mxu0 %v7170_v15  ;;  %2535 = vmatpush1.bf16.msra.mxu1 %v7173_v54  ;;  %v2673_v15 = vshrl.u32 %v8406_v57, 16  ;;  %v2676_v54 = vshll.u32 %v8406_v57, 16  ;;  %v7247_v57 = vld [vmem:[%s10071_s4 + $0x674] ss:$8 sps:$4 sm:$0xff]  }
 0x250   : > { %2497 = vmatprep.subr.bf16.mxu0 %v7178_v17  ;;  %2536 = vmatprep.subr.bf16.mxu1 %v7181_v18  ;;  %v7239_v17 = vld [vmem:[%s10071_s4 + $0x5a0] ss:$8 sps:$4 sm:$0xff]   ;;  %v2683_v18 = vrot.slane %v2681_v10, 1  ;;  %v7280_v10 = vld [vmem:[%s10071_s4 + $0x610] ss:$8 sps:$4 sm:$0xff]  }
 0x253   : > { %2498 = vmatpush1.bf16.msra.mxu0 %v7176_v20  ;;  %2537 = vmatpush1.bf16.msra.mxu1 %v7179_v22  ;;  %v2686_v20 = vrot.slane %v2684_v13, 2  ;;  %v7244_v22 = vld [vmem:[%s10071_s4 + $0x594] ss:$8 sps:$4 sm:$0xff]   ;;  %v7283_v13 = vld [vmem:[%s10071_s4 + $0x730] ss:$8 sps:$4 sm:$0xff]  }
 0x254   : > { %2499 = vmatprep.subr.bf16.mxu0 %v7184_v11  ;;  %2538 = vmatprep.subr.bf16.mxu1 %v7187_v23  ;;  %v2675_v11 = vrot.slane %v2673_v15, 1  ;;  %v2678_v23 = vrot.slane %v2676_v54, 2  ;;  %v7286_v15 = vld [vmem:[%s10071_s4 + $0x600] ss:$8 sps:$4 sm:$0xff]  }
 0x255   : > { %v7289_v54 = vld [vmem:[%s10071_s4 + $0x720] ss:$8 sps:$4 sm:$0xff]  }
 0x257   : > { %2500 = vmatpush1.bf16.msra.mxu0 %v7182_v24  ;;  %2539 = vmatpush1.bf16.msra.mxu1 %v7185_v25  ;;  %v7242_v24 = vld [vmem:[%s10071_s4 + $0x590] ss:$8 sps:$4 sm:$0xff]  }
 0x258   : > { %2501 = vmatprep.subr.bf16.mxu0 %v7190_v27  ;;  %2540 = vmatprep.subr.bf16.mxu1 %v7193_v28  ;;  %v7245_v25 = vld [vmem:[%s10071_s4 + $0x670] ss:$8 sps:$4 sm:$0xff]   ;;  %v2687_v27 = vor.u32 %v2686_v20, %v2683_v18  ;;  %v2715_v28 = vshrl.u32 %v8492_v16, 16 }
 0x259   : > { %v7292_v18 = vld [vmem:[%s10071_s4 + $0x6f0] ss:$8 sps:$4 sm:$0xff]  }
 0x25a   : > { %v7295_v20 = vld [vmem:[%s10071_s4 + $0x710] ss:$8 sps:$4 sm:$0xff]  }
 0x25b   : > { %2502 = vmatpush1.bf16.msra.mxu0 %v7188_v29  ;;  %2541 = vmatpush1.bf16.msra.mxu1 %v7191_v34  ;;  %v2718_v29 = vshll.u32 %v8492_v16, 16  ;;  %v7251_v34 = vld [vmem:[%s10071_s4 + $0x584] ss:$8 sps:$4 sm:$0xff]  }
 0x25c   : > { %2503 = vmatprep.subr.bf16.mxu0 %v7196_v35  ;;  %2542 = vmatprep.subr.bf16.mxu1 %v7199_v36  ;;  %v2679_v35 = vor.u32 %v2678_v23, %v2675_v11  ;;  %v7254_v36 = vld [vmem:[%s10071_s4 + $0x664] ss:$8 sps:$4 sm:$0xff]   ;;  %v7298_v11 = vld [vmem:[%s10071_s4 + $0x6e0] ss:$8 sps:$4 sm:$0xff]  }
 0x25d   : > { %v7301_v23 = vld [vmem:[%s10071_s4 + $0x700] ss:$8 sps:$4 sm:$0xff]  }
 0x25e   : > { %v2688_v16 = vsel %vm2654_vm8, %v2679_v35, %v2687_v27  ;;  %v7304_v27 = vld [vmem:[%s10071_s4 + $0x6d0] ss:$8 sps:$4 sm:$0xff]   ;;  %v7310_v35 = vld [vmem:[%s10071_s4 + $0x6c0] ss:$8 sps:$4 sm:$0xff]  }
 0x25f   : > { %2504 = vmatpush2.bf16.msra.mxu0 %v7194_v42  ;;  %2543 = vmatpush1.bf16.msra.mxu1 %v7197_v37  ;;  %v2707_v42 = vshrl.u32 %v8438_v30, 16  ;;  %v2710_v37 = vshll.u32 %v8438_v30, 16  ;;  %v7257_v30 = vld [vmem:[%s10071_s4 + $0x654] ss:$8 sps:$4 sm:$0xff]  }
 0x260   : > { %2505 = vmatprep.subr.bf16.mxu0 %v7202_v38  ;;  %2544 = vmatprep.subr.bf16.mxu1 %v7205_v39  ;;  %v7249_v38 = vld [vmem:[%s10071_s4 + $0x580] ss:$8 sps:$4 sm:$0xff]  }
 0x261   : > { %v7252_v39 = vld [vmem:[%s10071_s4 + $0x660] ss:$8 sps:$4 sm:$0xff]  }
 0x263   : > { %2506 = vmatpush2.bf16.msra.mxu0 %v7200_v40  ;;  %2545 = vmatpush1.bf16.msra.mxu1 %v7203_v41  ;;  %v2717_v40 = vrot.slane %v2715_v28, 1  ;;  %v2720_v41 = vrot.slane %v2718_v29, 2  ;;  %v7307_v28 = vld [vmem:[%s10071_s4 + $0x7f0] ss:$8 sps:$4 sm:$0xff]   ;;  %v7312_v29 = vld [vmem:[%s10071_s4 + $0x6c4] ss:$8 sps:$4 sm:$0xff]  }
 0x264   : > { %2507 = vmatprep.subr.bf16.mxu0 %v7208_v43  ;;  %2546 = vmatprep.subr.bf16.mxu1 %v7211_v44  ;;  %v2709_v43 = vrot.slane %v2707_v42, 1  ;;  %v2712_v44 = vrot.slane %v2710_v37, 2  ;;  %v7318_v42 = vld [vmem:[%s10071_s4 + $0x6b4] ss:$8 sps:$4 sm:$0xff]  }
 0x265   : > { %v7321_v37 = vld [vmem:[%s10071_s4 + $0x7d4] ss:$8 sps:$4 sm:$0xff]  }
 0x267   : > { %2508 = vmatpush2.bf16.msra.mxu0 %v7206_v58  ;;  %2547 = vmatpush2.bf16.msra.mxu1 %v7209_v45  ;;  %v7255_v58 = vld [vmem:[%s10071_s4 + $0x650] ss:$8 sps:$4 sm:$0xff]  }
 0x268   : > { %2509 = vmatprep.subr.bf16.mxu0 %v7214_v47  ;;  %2548 = vmatprep.subr.bf16.mxu1 %v7217_v48  ;;  %v7258_v45 = vld [vmem:[%s10071_s4 + $0x770] ss:$8 sps:$4 sm:$0xff]   ;;  %v2721_v47 = vor.u32 %v2720_v41, %v2717_v40  ;;  %v7264_v48 = vld [vmem:[%s10071_s4 + $0x644] ss:$8 sps:$4 sm:$0xff]   ;;  %v7322_v41 = vld [vmem:[%s10071_s4 + $0x6a0] ss:$8 sps:$4 sm:$0xff]  }
 0x269   : > { %v7327_v40 = vld [vmem:[%s10071_s4 + $0x7c4] ss:$8 sps:$4 sm:$0xff]  }
 0x26b   : > { %2510 = vmatpush2.bf16.msra.mxu0 %v7212_v49  ;;  %2549 = vmatpush2.bf16.msra.mxu1 %v7215_v50  ;;  %v2713_v49 = vor.u32 %v2712_v44, %v2709_v43  ;;  %v7267_v50 = vld [vmem:[%s10071_s4 + $0x764] ss:$8 sps:$4 sm:$0xff]   ;;  %v7333_v43 = vld [vmem:[%s10071_s4 + $0x7b4] ss:$8 sps:$4 sm:$0xff]   ;;  %v2664_v44 = vshrl.u32 %v8511_v32, 16 }
 0x26c   : > { %2511 = vmatprep.subr.bf16.mxu0 %v7220_v52  ;;  %2550 = vmatprep.subr.bf16.mxu1 %v7223_v53  ;;  %v7262_v53 = vld [vmem:[%s10071_s4 + $0x640] ss:$8 sps:$4 sm:$0xff]  }
 0x26d   : > { %v2722_v52 = vsel %vm2654_vm8, %v2713_v49, %v2721_v47  ;;  %v7331_v47 = vld [vmem:[%s10071_s4 + $0x7b0] ss:$8 sps:$4 sm:$0xff]   ;;  %v2659_v49 = vshll.u32 %v8413_v62, 16 }
 0x26f   : > { %2512 = vmatpush2.bf16.msra.mxu0 %v7218_v56  ;;  %2551 = vmatpush2.bf16.msra.mxu1 %v7221_v59  ;;  %v7265_v56 = vld [vmem:[%s10071_s4 + $0x760] ss:$8 sps:$4 sm:$0xff]   ;;  %v7270_v59 = vld [vmem:[%s10071_s4 + $0x634] ss:$8 sps:$4 sm:$0xff]  }
 0x270   : > { %2513 = vmatprep.subr.bf16.mxu0 %v7226_v0  ;;  %2552 = vmatprep.subr.bf16.mxu1 %v7229_v1  ;;  %v7268_v0 = vld [vmem:[%s10071_s4 + $0x630] ss:$8 sps:$4 sm:$0xff]  }
 0x271   : > { %v7271_v1 = vld [vmem:[%s10071_s4 + $0x750] ss:$8 sps:$4 sm:$0xff]  }
 0x273   : > { %2514 = vmatpush2.bf16.msra.mxu0 %v7224_v4  ;;  %2553 = vmatpush2.bf16.msra.mxu1 %v7227_v51  ;;  %v7276_v4 = vld [vmem:[%s10071_s4 + $0x624] ss:$8 sps:$4 sm:$0xff]  }
 0x274   : > { %2515 = vmatprep.subr.bf16.mxu0 %v7232_v8  ;;  %2554 = vmatprep.subr.bf16.mxu1 %v7235_v26  ;;  %v7279_v51 = vld [vmem:[%s10071_s4 + $0x744] ss:$8 sps:$4 sm:$0xff]   ;;  %v7274_v8 = vld [vmem:[%s10071_s4 + $0x620] ss:$8 sps:$4 sm:$0xff]  }
 0x275   : > { %v7277_v26 = vld [vmem:[%s10071_s4 + $0x740] ss:$8 sps:$4 sm:$0xff]  }
 0x277   : > { %2516 = vmatpush2.bf16.msra.mxu0 %v7230_v63  ;;  %2555 = vmatpush2.bf16.msra.mxu1 %v7233_v9  ;;  %v7282_v63 = vld [vmem:[%s10071_s4 + $0x614] ss:$8 sps:$4 sm:$0xff]  }
 0x278   : > { %2517 = vmatprep.subr.bf16.mxu0 %v7238_v14  ;;  %2556 = vmatprep.subr.bf16.mxu1 %v7241_v12  ;;  %v7285_v9 = vld [vmem:[%s10071_s4 + $0x734] ss:$8 sps:$4 sm:$0xff]   ;;  %v7288_v14 = vld [vmem:[%s10071_s4 + $0x604] ss:$8 sps:$4 sm:$0xff]  }
 0x279   : > { %v7291_v12 = vld [vmem:[%s10071_s4 + $0x724] ss:$8 sps:$4 sm:$0xff]  }
 0x27b   : > { %2518 = vmatpush2.bf16.msra.mxu0 %v7236_v6  ;;  %2557 = vmatpush2.bf16.msra.mxu1 %v7239_v17  ;;  %v7294_v6 = vld [vmem:[%s10071_s4 + $0x6f4] ss:$8 sps:$4 sm:$0xff]  }
 0x27c   : > { %2558 = vmatprep.subr.bf16.mxu1 %v7244_v22  ;;  %3047 = vmatprep.subr.bf16.mxu0 %v7247_v57  ;;  %v7297_v17 = vld [vmem:[%s10071_s4 + $0x714] ss:$8 sps:$4 sm:$0xff]   ;;  %v7300_v22 = vld [vmem:[%s10071_s4 + $0x6e4] ss:$8 sps:$4 sm:$0xff]  }
 0x27d   : > { %v7303_v57 = vld [vmem:[%s10071_s4 + $0x704] ss:$8 sps:$4 sm:$0xff]  }
 0x27e   : > { %2520 = vmatmul.mubr.bf16.vlgmr.msra.gmra.mxu0 %v8441_v31  ;;  %v7260_v31 = vld [vmem:[%s10071_s4 + $0x774] ss:$8 sps:$4 sm:$0xff]  }
 0x27f   : > { %2559 = vmatpush2.bf16.msra.mxu1 %v7242_v24  ;;  %3048 = vmatpush1.bf16.msra.mxu0 %v7245_v25  ;;  %v7306_v24 = vld [vmem:[%s10071_s4 + $0x6d4] ss:$8 sps:$4 sm:$0xff]  }
 0x280   : > { %3079 = vmatprep.mubr.bf16.mxu0 %v2688_v16  ;;  %2560 = vmatprep.subr.bf16.mxu1 %v7251_v34  ;;  %v7309_v25 = vld [vmem:[%s10071_s4 + $0x7f4] ss:$8 sps:$4 sm:$0xff]   ;;  %v7315_v34 = vld [vmem:[%s10071_s4 + $0x7e4] ss:$8 sps:$4 sm:$0xff]   ;;  %v7316_v16 = vld [vmem:[%s10071_s4 + $0x6b0] ss:$8 sps:$4 sm:$0xff]  }
 0x281   : > { %3049 = vmatprep.subr.bf16.mxu0 %v7254_v36  ;;  %v7313_v36 = vld [vmem:[%s10071_s4 + $0x7e0] ss:$8 sps:$4 sm:$0xff]  }
 0x283   : > { %2561 = vmatpush2.bf16.msra.mxu1 %v7249_v38  ;;  %3050 = vmatpush1.bf16.msra.mxu0 %v7252_v39  ;;  %v7319_v38 = vld [vmem:[%s10071_s4 + $0x7d0] ss:$8 sps:$4 sm:$0xff]   ;;  %v7324_v39 = vld [vmem:[%s10071_s4 + $0x6a4] ss:$8 sps:$4 sm:$0xff]  }
 0x284   : > { %3051 = vmatprep.subr.bf16.mxu0 %v7257_v30  ;;  %3090 = vmatprep.subr.bf16.mxu1 %v7260_v31  ;;  %v7325_v30 = vld [vmem:[%s10071_s4 + $0x7c0] ss:$8 sps:$4 sm:$0xff]   ;;  %v7330_v31 = vld [vmem:[%s10071_s4 + $0x694] ss:$8 sps:$4 sm:$0xff]  }
 0x286   : > { %2563 = vmatmul.mubr.bf16.vlgmr.msra.gmra.mxu1 %v8471_v2  ;;  %v7273_v2 = vld [vmem:[%s10071_s4 + $0x754] ss:$8 sps:$4 sm:$0xff]  }
 0x287   : > { %3052 = vmatpush1.bf16.msra.mxu0 %v7255_v58  ;;  %3091 = vmatpush1.bf16.msra.mxu1 %v7258_v45  ;;  %v2667_v58 = vshll.u32 %v8511_v32, 16  ;;  %v7328_v45 = vld [vmem:[%s10071_s4 + $0x690] ss:$8 sps:$4 sm:$0xff]   ;;  %v7336_v32 = vld [vmem:[%s10071_s4 + $0x684] ss:$8 sps:$4 sm:$0xff]  }
 0x288   : > { %3122 = vmatprep.mubr.bf16.mxu1 %v2722_v52  ;;  %3053 = vmatprep.subr.bf16.mxu0 %v7264_v48  ;;  %v2656_v48 = vshrl.u32 %v8413_v62, 16  ;;  %v2666_v52 = vrot.slane %v2664_v44, 1  ;;  %v7337_v62 = vld [vmem:[%s10071_s4 + $0x7a0] ss:$8 sps:$4 sm:$0xff]   ;;  %v7404_v44 = vld [vmem:[%s10071_s4 + $0x8d4] ss:$8 sps:$4 sm:$0xff]  }
 0x289   : > { %3092 = vmatprep.subr.bf16.mxu1 %v7267_v50  ;;  %v7339_v50 = vld [vmem:[%s10071_s4 + $0x7a4] ss:$8 sps:$4 sm:$0xff]  }
 0x28b   : > { %3054 = vmatpush1.bf16.msra.mxu0 %v7262_v53  ;;  %3093 = vmatpush1.bf16.msra.mxu1 %v7265_v56  ;;  %v2669_v53 = vrot.slane %v2667_v58, 2  ;;  %v7334_v56 = vld [vmem:[%s10071_s4 + $0x680] ss:$8 sps:$4 sm:$0xff]   ;;  %v7407_v58 = vld [vmem:[%s10071_s4 + $0x9f4] ss:$8 sps:$4 sm:$0xff]  }
 0x28c   : > { %3055 = vmatprep.subr.bf16.mxu0 %v7270_v59  ;;  %3094 = vmatprep.subr.bf16.mxu1 %v7273_v2  ;;  %v2658_v59 = vrot.slane %v2656_v48, 1  ;;  %v2661_v2 = vrot.slane %v2659_v49, 2  ;;  %v7410_v48 = vld [vmem:[%s10071_s4 + $0x8c4] ss:$8 sps:$4 sm:$0xff]  }
 0x28d   : > { %v7413_v49 = vld [vmem:[%s10071_s4 + $0x9e4] ss:$8 sps:$4 sm:$0xff]  }
 0x28f   : > { %3056 = vmatpush1.bf16.msra.mxu0 %v7268_v0  ;;  %3095 = vmatpush1.bf16.msra.mxu1 %v7271_v1  ;;  %v7343_v0 = vld [vmem:[%s10071_s4 + $0x794] ss:$8 sps:$4 sm:$0xff]  }
 0x290   : > { %3057 = vmatprep.subr.bf16.mxu0 %v7276_v4  ;;  %3096 = vmatprep.subr.bf16.mxu1 %v7279_v51  ;;  %v7346_v1 = vld [vmem:[%s10071_s4 + $0x874] ss:$8 sps:$4 sm:$0xff]   ;;  %v2670_v4 = vor.u32 %v2669_v53, %v2666_v52  ;;  %v2662_v51 = vor.u32 %v2661_v2, %v2658_v59  ;;  %v7422_v59 = vld [vmem:[%s10071_s4 + $0x8a4] ss:$8 sps:$4 sm:$0xff]  }
 0x291   : > { %v7416_v52 = vld [vmem:[%s10071_s4 + $0x8b4] ss:$8 sps:$4 sm:$0xff]   ;;  %v7425_v2 = vld [vmem:[%s10071_s4 + $0x9c4] ss:$8 sps:$4 sm:$0xff]  }
 0x292   : > { %v7419_v53 = vld [vmem:[%s10071_s4 + $0x9d4] ss:$8 sps:$4 sm:$0xff]  }
 0x293   : > { %3058 = vmatpush1.bf16.msra.mxu0 %v7274_v8  ;;  %3097 = vmatpush1.bf16.msra.mxu1 %v7277_v26  ;;  %v7341_v8 = vld [vmem:[%s10071_s4 + $0x790] ss:$8 sps:$4 sm:$0xff]  }
 0x294   : > { %3059 = vmatprep.subr.bf16.mxu0 %v7282_v63  ;;  %3098 = vmatprep.subr.bf16.mxu1 %v7285_v9  ;;  %v7344_v26 = vld [vmem:[%s10071_s4 + $0x870] ss:$8 sps:$4 sm:$0xff]   ;;  %v7349_v63 = vld [vmem:[%s10071_s4 + $0x784] ss:$8 sps:$4 sm:$0xff]   ;;  %v2671_v9 = vsel %vm2654_vm8, %v2662_v51, %v2670_v4  ;;  %v7428_v4 = vld [vmem:[%s10071_s4 + $0x894] ss:$8 sps:$4 sm:$0xff]  }
 0x295   : > { %v7431_v51 = vld [vmem:[%s10071_s4 + $0x9b4] ss:$8 sps:$4 sm:$0xff]  }
 0x297   : > { %3060 = vmatpush1.bf16.msra.mxu0 %v7280_v10  ;;  %3099 = vmatpush1.bf16.msra.mxu1 %v7283_v13  ;;  %v7352_v10 = vld [vmem:[%s10071_s4 + $0x864] ss:$8 sps:$4 sm:$0xff]   ;;  %v7347_v13 = vld [vmem:[%s10071_s4 + $0x780] ss:$8 sps:$4 sm:$0xff]  }
 0x298   : > { %3061 = vmatprep.subr.bf16.mxu0 %v7288_v14  ;;  %3100 = vmatprep.subr.bf16.mxu1 %v7291_v12  ;;  %v7350_v14 = vld [vmem:[%s10071_s4 + $0x860] ss:$8 sps:$4 sm:$0xff]   ;;  %v7356_v12 = vld [vmem:[%s10071_s4 + $0x854] ss:$8 sps:$4 sm:$0xff]  }
 0x29b   : > { %3062 = vmatpush1.bf16.msra.mxu0 %v7286_v15  ;;  %3101 = vmatpush1.bf16.msra.mxu1 %v7289_v54  ;;  %v7359_v15 = vld [vmem:[%s10071_s4 + $0x974] ss:$8 sps:$4 sm:$0xff]   ;;  %v7354_v54 = vld [vmem:[%s10071_s4 + $0x850] ss:$8 sps:$4 sm:$0xff]  }
 0x29c   : > { %3063 = vmatprep.subr.bf16.mxu0 %v7294_v6  ;;  %3102 = vmatprep.subr.bf16.mxu1 %v7297_v17  ;;  %v7362_v6 = vld [vmem:[%s10071_s4 + $0x844] ss:$8 sps:$4 sm:$0xff]  }
 0x29d   : > { %v7365_v17 = vld [vmem:[%s10071_s4 + $0x964] ss:$8 sps:$4 sm:$0xff]  }
 0x29f   : > { %3064 = vmatpush2.bf16.msra.mxu0 %v7292_v18  ;;  %3103 = vmatpush1.bf16.msra.mxu1 %v7295_v20  ;;  %v7360_v18 = vld [vmem:[%s10071_s4 + $0x840] ss:$8 sps:$4 sm:$0xff]  }
 0x2a0   : > { %3065 = vmatprep.subr.bf16.mxu0 %v7300_v22  ;;  %3104 = vmatprep.subr.bf16.mxu1 %v7303_v57  ;;  %v7363_v20 = vld [vmem:[%s10071_s4 + $0x960] ss:$8 sps:$4 sm:$0xff]   ;;  %v7368_v22 = vld [vmem:[%s10071_s4 + $0x834] ss:$8 sps:$4 sm:$0xff]   ;;  %v7366_v57 = vld [vmem:[%s10071_s4 + $0x830] ss:$8 sps:$4 sm:$0xff]  }
 0x2a3   : > { %3066 = vmatpush2.bf16.msra.mxu0 %v7298_v11  ;;  %3105 = vmatpush1.bf16.msra.mxu1 %v7301_v23  ;;  %v7374_v11 = vld [vmem:[%s10071_s4 + $0x824] ss:$8 sps:$4 sm:$0xff]  }
 0x2a4   : > { %3067 = vmatprep.subr.bf16.mxu0 %v7306_v24  ;;  %3106 = vmatprep.subr.bf16.mxu1 %v7309_v25  ;;  %v7377_v23 = vld [vmem:[%s10071_s4 + $0x944] ss:$8 sps:$4 sm:$0xff]   ;;  %v7372_v24 = vld [vmem:[%s10071_s4 + $0x820] ss:$8 sps:$4 sm:$0xff]  }
 0x2a5   : > { %v7375_v25 = vld [vmem:[%s10071_s4 + $0x940] ss:$8 sps:$4 sm:$0xff]  }
 0x2a7   : > { %3068 = vmatpush2.bf16.msra.mxu0 %v7304_v27  ;;  %3107 = vmatpush2.bf16.msra.mxu1 %v7307_v28  ;;  %v7380_v27 = vld [vmem:[%s10071_s4 + $0x814] ss:$8 sps:$4 sm:$0xff]  }
 0x2a8   : > { %3069 = vmatprep.subr.bf16.mxu0 %v7312_v29  ;;  %3108 = vmatprep.subr.bf16.mxu1 %v7315_v34  ;;  %v7383_v28 = vld [vmem:[%s10071_s4 + $0x934] ss:$8 sps:$4 sm:$0xff]   ;;  %v7378_v29 = vld [vmem:[%s10071_s4 + $0x810] ss:$8 sps:$4 sm:$0xff]  }
 0x2a9   : > { %v7381_v34 = vld [vmem:[%s10071_s4 + $0x930] ss:$8 sps:$4 sm:$0xff]  }
 0x2ab   : > { %3070 = vmatpush2.bf16.msra.mxu0 %v7310_v35  ;;  %3109 = vmatpush2.bf16.msra.mxu1 %v7313_v36  ;;  %v7386_v35 = vld [vmem:[%s10071_s4 + $0x804] ss:$8 sps:$4 sm:$0xff]  }
 0x2ac   : > { %3071 = vmatprep.subr.bf16.mxu0 %v7318_v42  ;;  %3110 = vmatprep.subr.bf16.mxu1 %v7321_v37  ;;  %v7389_v36 = vld [vmem:[%s10071_s4 + $0x924] ss:$8 sps:$4 sm:$0xff]   ;;  %v7384_v42 = vld [vmem:[%s10071_s4 + $0x800] ss:$8 sps:$4 sm:$0xff]  }
 0x2ad   : > { %v7387_v37 = vld [vmem:[%s10071_s4 + $0x920] ss:$8 sps:$4 sm:$0xff]  }
 0x2af   : > { %3072 = vmatpush2.bf16.msra.mxu0 %v7316_v16  ;;  %3111 = vmatpush2.bf16.msra.mxu1 %v7319_v38  ;;  %v7392_v16 = vld [vmem:[%s10071_s4 + $0x8f4] ss:$8 sps:$4 sm:$0xff]  }
 0x2b0   : > { %3073 = vmatprep.subr.bf16.mxu0 %v7324_v39  ;;  %3112 = vmatprep.subr.bf16.mxu1 %v7327_v40  ;;  %v7395_v38 = vld [vmem:[%s10071_s4 + $0x914] ss:$8 sps:$4 sm:$0xff]   ;;  %v7390_v39 = vld [vmem:[%s10071_s4 + $0x8f0] ss:$8 sps:$4 sm:$0xff]  }
 0x2b1   : > { %v7393_v40 = vld [vmem:[%s10071_s4 + $0x910] ss:$8 sps:$4 sm:$0xff]  }
 0x2b3   : > { %3074 = vmatpush2.bf16.msra.mxu0 %v7322_v41  ;;  %3113 = vmatpush2.bf16.msra.mxu1 %v7325_v30  ;;  %v7398_v41 = vld [vmem:[%s10071_s4 + $0x8e4] ss:$8 sps:$4 sm:$0xff]  }
 0x2b4   : > { %3075 = vmatprep.subr.bf16.mxu0 %v7330_v31  ;;  %3114 = vmatprep.subr.bf16.mxu1 %v7333_v43  ;;  %v7401_v30 = vld [vmem:[%s10071_s4 + $0x904] ss:$8 sps:$4 sm:$0xff]   ;;  %v7396_v31 = vld [vmem:[%s10071_s4 + $0x8e0] ss:$8 sps:$4 sm:$0xff]  }
 0x2b5   : > { %v7399_v43 = vld [vmem:[%s10071_s4 + $0x900] ss:$8 sps:$4 sm:$0xff]  }
 0x2b7   : > { %3076 = vmatpush2.bf16.msra.mxu0 %v7328_v45  ;;  %3115 = vmatpush2.bf16.msra.mxu1 %v7331_v47  ;;  %v7402_v45 = vld [vmem:[%s10071_s4 + $0x8d0] ss:$8 sps:$4 sm:$0xff]  }
 0x2b8   : > { %3077 = vmatprep.subr.bf16.mxu0 %v7336_v32  ;;  %3116 = vmatprep.subr.bf16.mxu1 %v7339_v50  ;;  %v7405_v47 = vld [vmem:[%s10071_s4 + $0x9f0] ss:$8 sps:$4 sm:$0xff]   ;;  %v7408_v32 = vld [vmem:[%s10071_s4 + $0x8c0] ss:$8 sps:$4 sm:$0xff]  }
 0x2b9   : > { %v7411_v50 = vld [vmem:[%s10071_s4 + $0x9e0] ss:$8 sps:$4 sm:$0xff]  }
 0x2bb   : > { %3078 = vmatpush2.bf16.msra.mxu0 %v7334_v56  ;;  %3117 = vmatpush2.bf16.msra.mxu1 %v7337_v62  ;;  %v7414_v56 = vld [vmem:[%s10071_s4 + $0x8b0] ss:$8 sps:$4 sm:$0xff]  }
 0x2bc   : > { %3118 = vmatprep.subr.bf16.mxu1 %v7343_v0  ;;  %3551 = vmatprep.subr.bf16.mxu0 %v7346_v1  ;;  %v7417_v62 = vld [vmem:[%s10071_s4 + $0x9d0] ss:$8 sps:$4 sm:$0xff]   ;;  %v7420_v0 = vld [vmem:[%s10071_s4 + $0x8a0] ss:$8 sps:$4 sm:$0xff]  }
 0x2bd   : > { %v7423_v1 = vld [vmem:[%s10071_s4 + $0x9c0] ss:$8 sps:$4 sm:$0xff]  }
 0x2be   : > { %3080 = vmatmul.mubr.bf16.vlgmr.msra.gmra.mxu0 %v2671_v9  ;;  %v7437_v9 = vld [vmem:[%s10071_s4 + $0x9a4] ss:$8 sps:$4 sm:$0xff]  }
 0x2bf   : > { %3119 = vmatpush2.bf16.msra.mxu1 %v7341_v8  ;;  %3552 = vmatpush1.bf16.msra.mxu0 %v7344_v26  ;;  %v7426_v8 = vld [vmem:[%s10071_s4 + $0x890] ss:$8 sps:$4 sm:$0xff]  }
 0x2c0   : > { %3583 = vmatprep.mubr.bf16.mxu0 %v8514_v33  ;;  %3120 = vmatprep.subr.bf16.mxu1 %v7349_v63  ;;  %v7357_v33 = vld [vmem:[%s10071_s4 + $0x970] ss:$8 sps:$4 sm:$0xff]   ;;  %v7434_v63 = vld [vmem:[%s10071_s4 + $0x884] ss:$8 sps:$4 sm:$0xff]  }
 0x2c1   : > { %3553 = vmatprep.subr.bf16.mxu0 %v7352_v10  ;;  %v7429_v26 = vld [vmem:[%s10071_s4 + $0x9b0] ss:$8 sps:$4 sm:$0xff]   ;;  %v7432_v10 = vld [vmem:[%s10071_s4 + $0x880] ss:$8 sps:$4 sm:$0xff]  }
 0x2c3   : > { %3121 = vmatpush2.bf16.msra.mxu1 %v7347_v13  ;;  %3554 = vmatpush1.bf16.msra.mxu0 %v7350_v14  ;;  %v7435_v13 = vld [vmem:[%s10071_s4 + $0x9a0] ss:$8 sps:$4 sm:$0xff]   ;;  %v7440_v14 = vld [vmem:[%s10071_s4 + $0x994] ss:$8 sps:$4 sm:$0xff]  }
 0x2c4   : > { %3555 = vmatprep.subr.bf16.mxu0 %v7356_v12  ;;  %3594 = vmatprep.subr.bf16.mxu1 %v7359_v15  ;;  %v7438_v12 = vld [vmem:[%s10071_s4 + $0x990] ss:$8 sps:$4 sm:$0xff]   ;;  %v7443_v15 = vld [vmem:[%s10071_s4 + $0x984] ss:$8 sps:$4 sm:$0xff]  }
 0x2c6   : > { %3123 = vmatmul.mubr.bf16.vlgmr.msra.gmra.mxu1 %v8544_v60  ;;  %v7371_v60 = vld [vmem:[%s10071_s4 + $0x954] ss:$8 sps:$4 sm:$0xff]  }
 0x2c7   : > { %3556 = vmatpush1.bf16.msra.mxu0 %v7354_v54  ;;  %3595 = vmatpush1.bf16.msra.mxu1 %v7357_v33  ;;  %v7441_v54 = vld [vmem:[%s10071_s4 + $0x980] ss:$8 sps:$4 sm:$0xff]   ;;  %v7444_v33 = vld [vmem:[%s10072_s5 + $0x70] ss:$8 sps:$4 sm:$0xff]  }
 0x2c8   : > { %3626 = vmatprep.mubr.bf16.mxu1 %v8531_v46  ;;  %3557 = vmatprep.subr.bf16.mxu0 %v7362_v6  ;;  %v7369_v46 = vld [vmem:[%s10071_s4 + $0x950] ss:$8 sps:$4 sm:$0xff]   ;;  %v7446_v6 = vld [vmem:[%s10072_s5 + $0x74] ss:$8 sps:$4 sm:$0xff]  }
 0x2c9   : > { %3596 = vmatprep.subr.bf16.mxu1 %v7365_v17  ;;  %v7450_v17 = vld [vmem:[%s10072_s5 + $0x50] ss:$8 sps:$4 sm:$0xff]  }
 0x2cb   : > { %3558 = vmatpush1.bf16.msra.mxu0 %v7360_v18  ;;  %3597 = vmatpush1.bf16.msra.mxu1 %v7363_v20  ;;  %v7455_v18 = vld [vmem:[%s10072_s5 + $0x44] ss:$8 sps:$4 sm:$0xff]   ;;  %v7471_v20 = vld [vmem:[%s10072_s5 + $0x170] ss:$8 sps:$4 sm:$0xff]  }
 0x2cc   : > { %3559 = vmatprep.subr.bf16.mxu0 %v7368_v22  ;;  %3598 = vmatprep.subr.bf16.mxu1 %v7371_v60  ;;  %v7453_v22 = vld [vmem:[%s10072_s5 + $0x40] ss:$8 sps:$4 sm:$0xff]   ;;  %v7473_v60 = vld [vmem:[%s10072_s5 + $0x174] ss:$8 sps:$4 sm:$0xff]  }
 0x2cf   : > { %3560 = vmatpush1.bf16.msra.mxu0 %v7366_v57  ;;  %3599 = vmatpush1.bf16.msra.mxu1 %v7369_v46  ;;  %v7458_v57 = vld [vmem:[%s10072_s5 + $0x34] ss:$8 sps:$4 sm:$0xff]   ;;  %v7479_v46 = vld [vmem:[%s10072_s5 + $0x164] ss:$8 sps:$4 sm:$0xff]  }
 0x2d0   : > { %3561 = vmatprep.subr.bf16.mxu0 %v7374_v11  ;;  %3600 = vmatprep.subr.bf16.mxu1 %v7377_v23  ;;  %v7477_v11 = vld [vmem:[%s10072_s5 + $0x160] ss:$8 sps:$4 sm:$0xff]   ;;  %v7456_v23 = vld [vmem:[%s10072_s5 + $0x30] ss:$8 sps:$4 sm:$0xff]  }
 0x2d3   : > { %3562 = vmatpush1.bf16.msra.mxu0 %v7372_v24  ;;  %3601 = vmatpush1.bf16.msra.mxu1 %v7375_v25  ;;  %v7485_v24 = vld [vmem:[%s10072_s5 + $0x154] ss:$8 sps:$4 sm:$0xff]   ;;  %v7461_v25 = vld [vmem:[%s10072_s5 + $0x24] ss:$8 sps:$4 sm:$0xff]  }
 0x2d4   : > { %3563 = vmatprep.subr.bf16.mxu0 %v7380_v27  ;;  %3602 = vmatprep.subr.bf16.mxu1 %v7383_v28  ;;  %v7483_v27 = vld [vmem:[%s10072_s5 + $0x150] ss:$8 sps:$4 sm:$0xff]   ;;  %v7459_v28 = vld [vmem:[%s10072_s5 + $0x20] ss:$8 sps:$4 sm:$0xff]  }
 0x2d7   : > { %3564 = vmatpush1.bf16.msra.mxu0 %v7378_v29  ;;  %3603 = vmatpush1.bf16.msra.mxu1 %v7381_v34  ;;  %v7491_v29 = vld [vmem:[%s10072_s5 + $0x144] ss:$8 sps:$4 sm:$0xff]   ;;  %v7464_v34 = vld [vmem:[%s10072_s5 + $0x14] ss:$8 sps:$4 sm:$0xff]  }
 0x2d8   : > { %3565 = vmatprep.subr.bf16.mxu0 %v7386_v35  ;;  %3604 = vmatprep.subr.bf16.mxu1 %v7389_v36  ;;  %v7518_v35 = vld [vmem:[%s8194_s22 + $0x4] ss:$12 sps:$4 sm:$0xff]   ;;  %v7489_v36 = vld [vmem:[%s10072_s5 + $0x140] ss:$8 sps:$4 sm:$0xff]  }
 0x2db   : > { %3566 = vmatpush1.bf16.msra.mxu0 %v7384_v42  ;;  %3605 = vmatpush1.bf16.msra.mxu1 %v7387_v37  ;;  %v7462_v42 = vld [vmem:[%s10072_s5 + $0x10] ss:$8 sps:$4 sm:$0xff]   ;;  %v7497_v37 = vld [vmem:[%s10072_s5 + $0x134] ss:$8 sps:$4 sm:$0xff]  }
 0x2dc   : > { %3567 = vmatprep.subr.bf16.mxu0 %v7392_v16  ;;  %3606 = vmatprep.subr.bf16.mxu1 %v7395_v38  ;;  %v7467_v16 = vld [vmem:[%s10072_s5 + $0x4] ss:$8 sps:$4 sm:$0xff]   ;;  %v7495_v38 = vld [vmem:[%s10072_s5 + $0x130] ss:$8 sps:$4 sm:$0xff]  }
 0x2df   : > { %3568 = vmatpush2.bf16.msra.mxu0 %v7390_v39  ;;  %3607 = vmatpush1.bf16.msra.mxu1 %v7393_v40  ;;  %v7465_v39 = vld [vmem:[%s10072_s5] ss:$8 sps:$4 sm:$0xff]   ;;  %v7503_v40 = vld [vmem:[%s10072_s5 + $0x124] ss:$8 sps:$4 sm:$0xff]  }
 0x2e0   : > { %3569 = vmatprep.subr.bf16.mxu0 %v7398_v41  ;;  %3608 = vmatprep.subr.bf16.mxu1 %v7401_v30  ;;  %v7470_v41 = vld [vmem:[%s10072_s5 + $0xf4] ss:$8 sps:$4 sm:$0xff]   ;;  %v7501_v30 = vld [vmem:[%s10072_s5 + $0x120] ss:$8 sps:$4 sm:$0xff]  }
 0x2e3   : > { %3570 = vmatpush2.bf16.msra.mxu0 %v7396_v31  ;;  %3609 = vmatpush1.bf16.msra.mxu1 %v7399_v43  ;;  %v7468_v31 = vld [vmem:[%s10072_s5 + $0xf0] ss:$8 sps:$4 sm:$0xff]   ;;  %v7509_v43 = vld [vmem:[%s10072_s5 + $0x114] ss:$8 sps:$4 sm:$0xff]  }
 0x2e4   : > { %3571 = vmatprep.subr.bf16.mxu0 %v7404_v44  ;;  %3610 = vmatprep.subr.bf16.mxu1 %v7407_v58  ;;  %v7476_v44 = vld [vmem:[%s10072_s5 + $0xe4] ss:$8 sps:$4 sm:$0xff]   ;;  %v7507_v58 = vld [vmem:[%s10072_s5 + $0x110] ss:$8 sps:$4 sm:$0xff]  }
 0x2e7   : > { %3572 = vmatpush2.bf16.msra.mxu0 %v7402_v45  ;;  %3611 = vmatpush2.bf16.msra.mxu1 %v7405_v47  ;;  %v7474_v45 = vld [vmem:[%s10072_s5 + $0xe0] ss:$8 sps:$4 sm:$0xff]   ;;  %v7515_v47 = vld [vmem:[%s10072_s5 + $0x104] ss:$8 sps:$4 sm:$0xff]  }
 0x2e8   : > { %3573 = vmatprep.subr.bf16.mxu0 %v7410_v48  ;;  %3612 = vmatprep.subr.bf16.mxu1 %v7413_v49  ;;  %v7482_v48 = vld [vmem:[%s10072_s5 + $0xd4] ss:$8 sps:$4 sm:$0xff]   ;;  %v7513_v49 = vld [vmem:[%s10072_s5 + $0x100] ss:$8 sps:$4 sm:$0xff]  }
 0x2eb   : > { %3574 = vmatpush2.bf16.msra.mxu0 %v7408_v32  ;;  %3613 = vmatpush2.bf16.msra.mxu1 %v7411_v50  ;;  %v7480_v32 = vld [vmem:[%s10072_s5 + $0xd0] ss:$8 sps:$4 sm:$0xff]   ;;  %v7488_v50 = vld [vmem:[%s10072_s5 + $0xc4] ss:$8 sps:$4 sm:$0xff]  }
 0x2ec   : > { %3575 = vmatprep.subr.bf16.mxu0 %v7416_v52  ;;  %3614 = vmatprep.subr.bf16.mxu1 %v7419_v53  ;;  %v7519_v52 = vld [vmem:[%s8194_s22 + $0x8] ss:$12 sps:$4 sm:$0xff]  }
 0x2ed   : > { %v7486_v53 = vld [vmem:[%s10072_s5 + $0xc0] ss:$8 sps:$4 sm:$0xff]  }
 0x2ef   : > { %3576 = vmatpush2.bf16.msra.mxu0 %v7414_v56  ;;  %3615 = vmatpush2.bf16.msra.mxu1 %v7417_v62  ;;  %v7494_v56 = vld [vmem:[%s10072_s5 + $0xb4] ss:$8 sps:$4 sm:$0xff]   ;;  %v7492_v62 = vld [vmem:[%s10072_s5 + $0xb0] ss:$8 sps:$4 sm:$0xff]  }
 0x2f0   : > { %3577 = vmatprep.subr.bf16.mxu0 %v7422_v59  ;;  %3616 = vmatprep.subr.bf16.mxu1 %v7425_v2  ;;  %v7500_v59 = vld [vmem:[%s10072_s5 + $0xa4] ss:$8 sps:$4 sm:$0xff]   ;;  %v7498_v2 = vld [vmem:[%s10072_s5 + $0xa0] ss:$8 sps:$4 sm:$0xff]  }
 0x2f3   : > { %3578 = vmatpush2.bf16.msra.mxu0 %v7420_v0  ;;  %3617 = vmatpush2.bf16.msra.mxu1 %v7423_v1  ;;  %v7506_v0 = vld [vmem:[%s10072_s5 + $0x94] ss:$8 sps:$4 sm:$0xff]   ;;  %v7504_v1 = vld [vmem:[%s10072_s5 + $0x90] ss:$8 sps:$4 sm:$0xff]  }
 0x2f4   : > { %3579 = vmatprep.subr.bf16.mxu0 %v7428_v4  ;;  %3618 = vmatprep.subr.bf16.mxu1 %v7431_v51  ;;  %v7512_v4 = vld [vmem:[%s10072_s5 + $0x84] ss:$8 sps:$4 sm:$0xff]   ;;  %v1611_v51 = vpop.f32.mrf.mxu0 }
 0x2f7   : > { %3580 = vmatpush2.bf16.msra.mxu0 %v7426_v8  ;;  %3619 = vmatpush2.bf16.msra.mxu1 %v7429_v26  ;;  %v7510_v8 = vld [vmem:[%s10072_s5 + $0x80] ss:$8 sps:$4 sm:$0xff]  }
 0x2f8   : > { %3581 = vmatprep.subr.bf16.mxu0 %v7434_v63  ;;  %3620 = vmatprep.subr.bf16.mxu1 %v7437_v9  ;;  %v7516_v26 = vld [vmem:[%s8194_s22] ss:$12 sps:$4 sm:$0xff]   ;;  %v1613_v63 = vpop.f32.mrf.mxu0  ;;  %v1654_v9 = vpop.f32.mrf.mxu1 }
 0x2fb   : > { %3582 = vmatpush2.bf16.msra.mxu0 %v7432_v10  ;;  %3621 = vmatpush2.bf16.msra.mxu1 %v7435_v13  ;;  %v1615_v10 = vpop.f32.mrf.mxu0  ;;  %v1656_v13 = vpop.f32.mrf.mxu1 }
 0x2fc   : > { %3622 = vmatprep.subr.bf16.mxu1 %v7440_v14  ;;  %4026 = vmatprep.subr.bf16.mxu0 %v7446_v6 }
 0x2fd   : > { %v1617_v14 = vpop.f32.mrf.mxu0 }
 0x2fe   : > { %3584 = vmatmul.mubr.bf16.vlgmr.msra.gmra.mxu0 %v8535_v55  ;;  %v7449_v55 = vld [vmem:[%s10072_s5 + $0x64] ss:$8 sps:$4 sm:$0xff]  }
 0x2ff   : > { %3623 = vmatpush2.bf16.msra.mxu1 %v7438_v12  ;;  %4027 = vmatpush1.bf16.msra.mxu0 %v7444_v33  ;;  %v1658_v12 = vpop.f32.mrf.mxu1 }
 0x300   : > { %3624 = vmatprep.subr.bf16.mxu1 %v7443_v15  ;;  %4028 = vmatprep.subr.bf16.mxu0 %v7449_v55  ;;  %v2021_v15 = vpop.f32.mrf.mxu0 }
 0x301   : > { %4058 = vmatprep.mubr.bf16.mxu0 %v7518_v35 }
 0x302   : > { %v2023_v33 = vpop.f32.mrf.mxu0 }
 0x303   : > { %3625 = vmatpush2.bf16.msra.mxu1 %v7441_v54  ;;  %v1660_v54 = vpop.f32.mrf.mxu1 }
 0x304   : > { %4069 = vmatprep.subr.bf16.mxu1 %v7473_v60  ;;  %v2025_v55 = vpop.f32.mrf.mxu0 }
 0x306   : > { %3627 = vmatmul.mubr.bf16.vlgmr.msra.gmra.mxu1 %v8547_v61  ;;  %v7447_v61 = vld [vmem:[%s10072_s5 + $0x60] ss:$8 sps:$4 sm:$0xff]   ;;  %v2064_v6 = vpop.f32.mrf.mxu1 }
 0x307   : > { %4101 = vmatprep.mubr.bf16.mxu1 %v7822_v3  ;;  %v7452_v3 = vld [vmem:[%s10072_s5 + $0x54] ss:$8 sps:$4 sm:$0xff]   ;;  %4029 = vmatpush1.bf16.msra.mxu0 %v7447_v61 }
 0x308   : > { %4030 = vmatprep.subr.bf16.mxu0 %v7452_v3  ;;  %4070 = vmatpush1.bf16.msra.mxu1 %v7471_v20  ;;  %v2066_v61 = vpop.f32.mrf.mxu1  ;;  %v2027_v3 = vpop.f32.mrf.mxu0 }
 0x309   : > { %4071 = vmatprep.subr.bf16.mxu1 %v7479_v46 }
 0x30b   : > { %4031 = vmatpush1.bf16.msra.mxu0 %v7450_v17  ;;  %v2068_v17 = vpop.f32.mrf.mxu1 }
 0x30c   : > { %4032 = vmatprep.subr.bf16.mxu0 %v7455_v18  ;;  %4072 = vmatpush1.bf16.msra.mxu1 %v7477_v11 }
 0x30d   : > { %4073 = vmatprep.subr.bf16.mxu1 %v7485_v24  ;;  %v2070_v20 = vpop.f32.mrf.mxu1 }
 0x30f   : > { %4033 = vmatpush1.bf16.msra.mxu0 %v7453_v22 }
 0x310   : > { %4034 = vmatprep.subr.bf16.mxu0 %v7458_v57  ;;  %4074 = vmatpush1.bf16.msra.mxu1 %v7483_v27 }
 0x311   : > { %4075 = vmatprep.subr.bf16.mxu1 %v7491_v29 }
 0x313   : > { %4035 = vmatpush1.bf16.msra.mxu0 %v7456_v23 }
 0x314   : > { %4036 = vmatprep.subr.bf16.mxu0 %v7461_v25  ;;  %4076 = vmatpush1.bf16.msra.mxu1 %v7489_v36 }
 0x315   : > { %4077 = vmatprep.subr.bf16.mxu1 %v7497_v37  ;;  %v1655_v37 = vadd.f32 %v1654_v9, %v1611_v51 }
 0x317   : > { %4037 = vmatpush1.bf16.msra.mxu0 %v7459_v28 }
 0x318   : > { %4038 = vmatprep.subr.bf16.mxu0 %v7464_v34  ;;  %4078 = vmatpush1.bf16.msra.mxu1 %v7495_v38  ;;  %v1659_v38 = vadd.f32 %v1658_v12, %v1615_v10 }
 0x319   : > { %4079 = vmatprep.subr.bf16.mxu1 %v7503_v40 }
 0x31b   : > { %4039 = vmatpush1.bf16.msra.mxu0 %v7462_v42 }
 0x31c   : > { %4040 = vmatprep.subr.bf16.mxu0 %v7467_v16  ;;  %4080 = vmatpush1.bf16.msra.mxu1 %v7501_v30  ;;  %v1657_v16 = vadd.f32 %v1656_v13, %v1613_v63 }
 0x31d   : > { %4081 = vmatprep.subr.bf16.mxu1 %v7509_v43  ;;  %v2026_v43 = vadd.f32 %v2025_v55, %v1659_v38 }
 0x31e   : > { %v2024_v40 = vadd.f32 %v2023_v33, %v1657_v16 }
 0x31f   : > { %4041 = vmatpush1.bf16.msra.mxu0 %v7465_v39  ;;  %v2022_v39 = vadd.f32 %v2021_v15, %v1655_v37 }
 0x320   : > { %4042 = vmatprep.subr.bf16.mxu0 %v7470_v41  ;;  %4082 = vmatpush1.bf16.msra.mxu1 %v7507_v58 }
 0x321   : > { %4083 = vmatprep.subr.bf16.mxu1 %v7515_v47  ;;  %v2065_v47 = vadd.f32 %v2064_v6, %v2022_v39 }
 0x323   : > { %4043 = vmatpush2.bf16.msra.mxu0 %v7468_v31  ;;  %v1661_v31 = vadd.f32 %v1660_v54, %v1617_v14 }
 0x324   : > { %4044 = vmatprep.subr.bf16.mxu0 %v7476_v44  ;;  %4084 = vmatpush1.bf16.msra.mxu1 %v7513_v49 }
 0x327   : > { %4045 = vmatpush2.bf16.msra.mxu0 %v7474_v45  ;;  %4102 = vmatmul.mubr.bf16.vlgmr.msra.gmra.mxu1 %v7519_v52  ;;  %v2069_v52 = vadd.f32 %v2068_v17, %v2026_v43 }
 0x328   : > { %4046 = vmatprep.subr.bf16.mxu0 %v7482_v48  ;;  %v2067_v48 = vadd.f32 %v2066_v61, %v2024_v40 }
 0x32b   : > { %4047 = vmatpush2.bf16.msra.mxu0 %v7480_v32 }
 0x32c   : > { %4048 = vmatprep.subr.bf16.mxu0 %v7488_v50  ;;  %v2028_v50 = vadd.f32 %v2027_v3, %v1661_v31 }
 0x32f   : > { %4049 = vmatpush2.bf16.msra.mxu0 %v7486_v53 }
 0x330   : > { %4050 = vmatprep.subr.bf16.mxu0 %v7494_v56 }
 0x333   : > { %4051 = vmatpush2.bf16.msra.mxu0 %v7492_v62 }
 0x334   : > { %4052 = vmatprep.subr.bf16.mxu0 %v7500_v59 }
 0x337   : > { %4053 = vmatpush2.bf16.msra.mxu0 %v7498_v2 }
 0x338   : > { %4054 = vmatprep.subr.bf16.mxu0 %v7506_v0 }
 0x33b   : > { %4055 = vmatpush2.bf16.msra.mxu0 %v7504_v1  ;;  %v2071_v1 = vadd.f32 %v2070_v20, %v2028_v50 }
 0x33c   : > { %4056 = vmatprep.subr.bf16.mxu0 %v7512_v4 }
 0x33e   : > { %v2521_v18 = vpop.f32.mrf.mxu0 }
 0x33f   : > { %4057 = vmatpush2.bf16.msra.mxu0 %v7510_v8 }
 0x340   : > { %v2523_v22 = vpop.f32.mrf.mxu0 }
 0x342   : > { %4059 = vmatmul.mubr.bf16.vlgmr.msra.gmra.mxu0 %v7516_v26  ;;  %v2525_v57 = vpop.f32.mrf.mxu0 }
 0x344   : > { %v2527_v11 = vpop.f32.mrf.mxu0 }
 0x346   : > { %v2564_v60 = vpop.f32.mrf.mxu1 }
 0x347   : > { %v2565_v41 = vadd.f32 %v2564_v60, %v2521_v18 }
 0x348   : > { %v2566_v46 = vpop.f32.mrf.mxu1 }
 0x349   : > { %v2567_v30 = vadd.f32 %v2566_v46, %v2523_v22  ;;  %v2573_v62 = vadd.f32 %v2565_v41, %v2065_v47 }
 0x34a   : > { %v2568_v23 = vpop.f32.mrf.mxu1 }
 0x34b   : > { %v2569_v44 = vadd.f32 %v2568_v23, %v2525_v57  ;;  %v2574_v59 = vadd.f32 %v2567_v30, %v2067_v48  ;;  %v3687_v57 = vlaneseq }
 0x34c   : > { %v2570_v25 = vpop.f32.mrf.mxu1 }
 0x34d   : > { %v2571_v53 = vadd.f32 %v2570_v25, %v2527_v11  ;;  %v2575_v4 = vadd.f32 %v2569_v44, %v2069_v52  ;;  %v3688_v46 = vshrl.u32 %v3687_v57, 7 }
 0x34f   : > { %v2576_v13 = vadd.f32 %v2571_v53, %v2071_v1  ;;  %v9419_v23 = vsub.s32 0, %v3688_v46 }
 0x37e   : > { %v3081_v24 = vpop.f32.mrf.mxu0 }
 0x380   : > { %v3083_v27 = vpop.f32.mrf.mxu0 }
 0x382   : > { %v3085_v29 = vpop.f32.mrf.mxu0 }
 0x384   : > { %v3087_v35 = vpop.f32.mrf.mxu0 }
 0x386   : > { %v3124_v28 = vpop.f32.mrf.mxu1 }
 0x387   : > { %v3125_v49 = vadd.f32 %v3124_v28, %v3081_v24  ;;  %v9424_v24 = vld [vmem:[%s10075_s8] ss:$2 sm:$0x3]  ;;  %v9431_v28 = vsub.s32 1, %v3688_v46 }
 0x388   : > { %v3126_v34 = vpop.f32.mrf.mxu1 }
 0x389   : > { %v3127_v32 = vadd.f32 %v3126_v34, %v3083_v27  ;;  %v3133_v26 = vadd.f32 %v3125_v49, %v2573_v62  ;;  %v9429_v27 = vld [vmem:[%s10075_s8 + $0x1] ss:$2 sm:$0x3]  ;;  %v9445_v37 = vrot.slane %v9424_v24, %v9431_v28 }
 0x38a   : > { %v3128_v36 = vpop.f32.mrf.mxu1  ;;  %v9449_v16 = vrot.slane %v9429_v27, %v9431_v28 }
 0x38b   : > { %v3129_v2 = vadd.f32 %v3128_v36, %v3085_v29  ;;  %v3134_v63 = vadd.f32 %v3127_v32, %v2574_v59  ;;  %v9435_v29 = vrot.slane %v9424_v24, %v9419_v23 }
 0x38c   : > { %v3130_v58 = vpop.f32.mrf.mxu1 }
 0x38d   : > { %v3131_v9 = vadd.f32 %v3130_v58, %v3087_v35  ;;  %v3135_v12 = vadd.f32 %v3129_v2, %v2575_v4  ;;  %v9439_v35 = vrot.slane %v9429_v27, %v9419_v23 }
 0x38f   : > { %v3136_v61 = vadd.f32 %v3131_v9, %v2576_v13 }
 0x3be   : > { %v3585_v42 = vpop.f32.mrf.mxu0 }
 0x3c0   : > { %v3587_v45 = vpop.f32.mrf.mxu0 }
 0x3c2   : > { %v3589_v51 = vpop.f32.mrf.mxu0 }
 0x3c4   : > { %v3591_v6 = vpop.f32.mrf.mxu0 }
 0x3c6   : > { %v3628_v56 = vpop.f32.mrf.mxu1 }
 0x3c7   : > { %v3629_v0 = vadd.f32 %v3628_v56, %v3585_v42 }
 0x3c8   : > { %v3630_v8 = vpop.f32.mrf.mxu1 }
 0x3c9   : > { %v3631_v10 = vadd.f32 %v3630_v8, %v3587_v45  ;;  %v3637_v15 = vadd.f32 %v3629_v0, %v3133_v26 }
 0x3ca   : > { %v3632_v14 = vpop.f32.mrf.mxu1 }
 0x3cb   : > { %v3638_v54 = vadd.f32 %v3631_v10, %v3134_v63  ;;  %v3633_v33 = vadd.f32 %v3632_v14, %v3589_v51 }
 0x3cc   : > { %v3634_v55 = vpop.f32.mrf.mxu1 }
 0x3cd   : > { %v3639_v3 = vadd.f32 %v3633_v33, %v3135_v12  ;;  %v3635_v17 = vadd.f32 %v3634_v55, %v3591_v6  ;;  %v3641_v18 = vadd.f32 %v3638_v54, %v3637_v15 }
 0x3cf   : > { %v3640_v20 = vadd.f32 %v3635_v17, %v3136_v61  ;;  %v3642_v22 = vadd.f32 %v3641_v18, %v3639_v3 }
 0x3d1   : > { %v3643_v60 = vadd.f32 %v3642_v22, %v3640_v20 }
 0x3d3   : > { %3644 = vadd.xlane.f32.xlu0 %v3643_v60 }
 0x3e7   : > { %v4103_v11 = vpop.f32.mrf.mxu1 }
 0x3e9   : > { %v4105_v25 = vpop.f32.mrf.mxu1 }
 0x3eb   : > { %v4107_v36 = vpop.f32.mrf.mxu1 }
 0x3ed   : > { %v4109_v31 = vpop.f32.mrf.mxu1 }
 0x402   : > { %v4060_v34 = vpop.f32.mrf.mxu0 }
 0x403   : > { %v9441_v42 = vadd.f32 %v4103_v11, %v4060_v34 }
 0x404   : > { %v4062_v38 = vpop.f32.mrf.mxu0 }
 0x405   : > { %v4130_v39 = vmul.f32 %v9435_v29, %v9441_v42  ;;  %v9453_v40 = vadd.f32 %v4105_v25, %v4062_v38  ;;  %v4158_v41 = vmul.f32 %v9439_v35, %v9441_v42 }
 0x406   : > { %v4064_v30 = vpop.f32.mrf.mxu0 }
 0x407   : > { %v4131_v43 = vmul.f32 %v9445_v37, %v9453_v40  ;;  %v4159_v44 = vmul.f32 %v9449_v16, %v9453_v40  ;;  %v9461_v58 = vadd.f32 %v4107_v36, %v4064_v30 }
 0x408   : > { %v4066_v45 = vpop.f32.mrf.mxu0 }
 0x409   : > { %v4160_v47 = vmul.f32 %v9439_v35, %v9461_v58  ;;  %v9465_v48 = vadd.f32 %v4109_v31, %v4066_v45  ;;  %v4132_v49 = vmul.f32 %v9435_v29, %v9461_v58  ;;  %v4134_v32 = vadd.f32 %v4131_v43, %v4130_v39 }
 0x40a   : > { %v4162_v50 = vadd.f32 %v4159_v44, %v4158_v41 }
 0x40b   : > { %v4133_v52 = vmul.f32 %v9445_v37, %v9465_v48  ;;  %v4135_v53 = vadd.f32 %v4134_v32, %v4132_v49  ;;  %v4161_v56 = vmul.f32 %v9449_v16, %v9465_v48 }
 0x40c   : > { %v4163_v62 = vadd.f32 %v4162_v50, %v4160_v47 }
 0x40d   : > { %v4136_v59 = vadd.f32 %v4135_v53, %v4133_v52 }
 0x40e   : > { %v4164_v0 = vadd.f32 %v4163_v62, %v4161_v56 }
 0x40f   : > { %4137 = vadd.xlane.f32.xlu1 %v4136_v59 }
 0x413   : > { %4165 = vadd.xlane.f32.xlu1 %v4164_v0 }
 0x45c   : > { %v3645_v2 = vpop.xlane.xlu0 %3644 }
 0x45d   : > { %v3646_v1 = vrot.slane %v3645_v2, 4 }
 0x45f   : > { %v3647_v4 = vadd.f32 %v3646_v1, %v3645_v2 }
 0x461   : > { %v3648_v51 = vrot.slane %v3647_v4, 2 }
 0x463   : > { %v3649_v8 = vadd.f32 %v3648_v51, %v3647_v4 }
 0x465   : > { %v3650_v26 = vrot.slane %v3649_v8, 1 }
 0x467   : > { %v3651_v63 = vadd.f32 %v3650_v26, %v3649_v8 }
 0x469   : > { %6785 = vpush %v3651_v63 }
 0x498   : > { %v4138_v11 = vpop.xlane.xlu1 %4137 }
 0x499   : > { %v4139_v34 = vrot.slane %v4138_v11, 4 }
 0x49a   : > { %s6786_s16 = spop %6785 }
 0x49b   : > { %s3653_s19 = smul.f32 0.00024414063, %s6786_s16  ;;  %v4140_v38 = vadd.f32 %v4139_v34, %v4138_v11 }
 0x49c   : > { %v4166_v25 = vpop.xlane.xlu1 %4165 }
 0x49d   : > { %v3654_v9 = vstv %s3653_s19  ;;  %v4167_v36 = vrot.slane %v4166_v25, 4  ;;  %v4141_v30 = vrot.slane %v4140_v38, 2 }
 0x49e   : > { %v9473_v10 = vsub.f32 %v3637_v15, %v3654_v9  ;;  %v9475_v13 = vsub.f32 %v3638_v54, %v3654_v9  ;;  %v9477_v14 = vsub.f32 %v3639_v3, %v3654_v9  ;;  %v9479_v12 = vsub.f32 %v3640_v20, %v3654_v9 }
 0x49f   : > { %v4168_v39 = vadd.f32 %v4167_v36, %v4166_v25  ;;  %v4142_v43 = vadd.f32 %v4141_v30, %v4140_v38 }
 0x4a0   : > { %v3659_v33 = vmul.f32 %v9473_v10, %v9473_v10  ;;  %v3660_v6 = vmul.f32 %v9475_v13, %v9475_v13  ;;  %v3661_v55 = vmul.f32 %v9477_v14, %v9477_v14  ;;  %v3662_v15 = vmul.f32 %v9479_v12, %v9479_v12 }
 0x4a1   : > { %v4169_v31 = vrot.slane %v4168_v39, 2  ;;  %v4143_v45 = vrot.slane %v4142_v43, 1 }
 0x4a2   : > { %v3663_v61 = vadd.f32 %v3660_v6, %v3659_v33 }
 0x4a3   : > { %v4170_v44 = vadd.f32 %v4169_v31, %v4168_v39  ;;  %v4144_v32 = vadd.f32 %v4143_v45, %v4142_v43  ;;  %v7520_v31 = vld [vmem:[%s10073_s6 + $0x70] ss:$8 sps:$4 sm:$0xff]   ;;  %v7525_v43 = vld [vmem:[%s10073_s6 + $0x64] ss:$8 sps:$4 sm:$0xff]   ;;  %v7531_v45 = vld [vmem:[%s10073_s6 + $0x54] ss:$8 sps:$4 sm:$0xff]  }
 0x4a4   : > { %v3664_v17 = vadd.f32 %v3663_v61, %v3661_v55 }
 0x4a5   : > { %v4171_v47 = vrot.slane %v4170_v44, 1 }
 0x4a6   : > { %v3665_v54 = vadd.f32 %v3664_v17, %v3662_v15 }
 0x4a7   : > { %v4172_v50 = vadd.f32 %v4171_v47, %v4170_v44  ;;  %v7523_v44 = vld [vmem:[%s10073_s6 + $0x60] ss:$8 sps:$4 sm:$0xff]   ;;  %v7529_v47 = vld [vmem:[%s10073_s6 + $0x50] ss:$8 sps:$4 sm:$0xff]  }
 0x4a8   : > { %3666 = vadd.xlane.f32.xlu0 %v3665_v54 }
 0x531   : > { %v3667_v3 = vpop.xlane.xlu0 %3666 }
 0x532   : > { %v3668_v18 = vrot.slane %v3667_v3, 4 }
 0x534   : > { %v3669_v20 = vadd.f32 %v3668_v18, %v3667_v3 }
 0x536   : > { %v3670_v22 = vrot.slane %v3669_v20, 2 }
 0x538   : > { %v3671_v60 = vadd.f32 %v3670_v22, %v3669_v20 }
 0x53a   : > { %v3672_v57 = vrot.slane %v3671_v60, 1 }
 0x53c   : > { %v3673_v46 = vadd.f32 %v3672_v57, %v3671_v60 }
 0x53e   : > { %6787 = vpush %v3673_v46 }
 0x56f   : > { %s6788_s24 = spop %6787 }
 0x570   : > { %s3675_s12 = smul.f32 0.00024414063, %s6788_s24 }
 0x572   : > { %s3676_s30 = sadd.f32 1e-05, %s3675_s12 }
 0x574   : > { %v3677_v41 = vstv %s3676_s30 }
 0x575   : > { %7686 = vrsqrt.f32 %v3677_v41 }
 0x582   : > { %v7687_v49 = vpop.eup %7686 }
 0x583   : > { %6789 = vpush %v7687_v49  ;;  %v7528_v49 = vld [vmem:[%s10073_s6 + $0x174] ss:$8 sps:$4 sm:$0xff]  }
 0x584   : > { %6791 = vpush %v4144_v32  ;;  %v7537_v32 = vld [vmem:[%s10073_s6 + $0x44] ss:$8 sps:$4 sm:$0xff]   ;;  %4658 = vmatprep.subr.bf16.mxu1 %v7528_v49  ;;  %v7595_v49 = vld [vmem:[%s10073_s6 + $0xa0] ss:$8 sps:$4 sm:$0xff]  }
 0x585   : > { %6793 = vpush %v4172_v50  ;;  %v7526_v50 = vld [vmem:[%s10073_s6 + $0x170] ss:$8 sps:$4 sm:$0xff]  }
 0x586   : > { %4659 = vmatpush1.bf16.msra.mxu1 %v7526_v50  ;;  %v7592_v50 = vld [vmem:[%s10073_s6 + $0x1c0] ss:$8 sps:$4 sm:$0xff]  }
 0x5b4   : > { %s9489_s25 = spop %6789 }
 0x5b5   : > { %s6792_s29 = spop %6791 }
 0x5b6   : > { %s4146_s26 = smul.f32 0.00048828125, %s6792_s29  ;;  %s6794_s13 = spop %6793 }
 0x5b7   : > { %s4174_s22 = smul.f32 0.00048828125, %s6794_s13 }
 0x5b8   : > { %v4175_v52 = vstv %s4146_s26 }
 0x5b9   : > { %v4177_v53 = vstv %s4174_s22  ;;  %v4176_v56 = vmul.f32 %v4175_v52, %v9424_v24  ;;  %v7535_v52 = vld [vmem:[%s10073_s6 + $0x40] ss:$8 sps:$4 sm:$0xff]  }
 0x5ba   : > { %v4178_v62 = vmul.f32 %v9429_v27, %v4177_v53  ;;  %v7534_v53 = vld [vmem:[%s10073_s6 + $0x164] ss:$8 sps:$4 sm:$0xff]  }
 0x5bb   : > { %4660 = vmatprep.subr.bf16.mxu1 %v7534_v53  ;;  %v7601_v53 = vld [vmem:[%s10073_s6 + $0x90] ss:$8 sps:$4 sm:$0xff]  }
 0x5bc   : > { %v4179_v59 = vadd.f32 %v4178_v62, %v4176_v56  ;;  %v7543_v56 = vld [vmem:[%s10073_s6 + $0x34] ss:$8 sps:$4 sm:$0xff]   ;;  %v7532_v62 = vld [vmem:[%s10073_s6 + $0x160] ss:$8 sps:$4 sm:$0xff]  }
 0x5bd   : > { %4661 = vmatpush1.bf16.msra.mxu1 %v7532_v62  ;;  %v7598_v62 = vld [vmem:[%s10073_s6 + $0x1b0] ss:$8 sps:$4 sm:$0xff]  }
 0x5be   : > { %v4184_v2 = vrot.slane %v4179_v59, %v9419_v23  ;;  %v4188_v0 = vrot.slane %v4179_v59, %v9431_v28  ;;  %v7541_v59 = vld [vmem:[%s10073_s6 + $0x30] ss:$8 sps:$4 sm:$0xff]  }
 0x5c0   : > { %v9496_v1 = vsub.f32 %v9441_v42, %v4184_v2  ;;  %v9499_v4 = vsub.f32 %v9453_v40, %v4188_v0  ;;  %v9502_v51 = vsub.f32 %v9461_v58, %v4184_v2  ;;  %v9505_v8 = vsub.f32 %v9465_v48, %v4188_v0  ;;  %v7540_v2 = vld [vmem:[%s10073_s6 + $0x154] ss:$8 sps:$4 sm:$0xff]   ;;  %v7549_v0 = vld [vmem:[%s10073_s6 + $0x24] ss:$8 sps:$4 sm:$0xff]  }
 0x5c1   : > { %4662 = vmatprep.subr.bf16.mxu1 %v7540_v2  ;;  %v7607_v2 = vld [vmem:[%s10073_s6 + $0x80] ss:$8 sps:$4 sm:$0xff]  }
 0x5c2   : > { %v4195_v26 = vmul.f32 %v9496_v1, %v9496_v1  ;;  %v4196_v63 = vmul.f32 %v9499_v4, %v9499_v4  ;;  %v4197_v9 = vmul.f32 %v9502_v51, %v9502_v51  ;;  %v4198_v42 = vmul.f32 %v9505_v8, %v9505_v8 }
 0x5c4   : > { %v4216_v40 = vmul.f32 %v4195_v26, %v9439_v35  ;;  %v4217_v58 = vmul.f32 %v4196_v63, %v9449_v16  ;;  %v4199_v33 = vmul.f32 %v4195_v26, %v9435_v29  ;;  %v4200_v48 = vmul.f32 %v4196_v63, %v9445_v37  ;;  %v7538_v26 = vld [vmem:[%s10073_s6 + $0x150] ss:$8 sps:$4 sm:$0xff]   ;;  %v7547_v63 = vld [vmem:[%s10073_s6 + $0x20] ss:$8 sps:$4 sm:$0xff]  }
 0x5c5   : > { %v4218_v6 = vmul.f32 %v4197_v9, %v9439_v35  ;;  %v4201_v61 = vmul.f32 %v4197_v9, %v9435_v29  ;;  %v4219_v17 = vmul.f32 %v4198_v42, %v9449_v16  ;;  %v4202_v3 = vmul.f32 %v4198_v42, %v9445_v37  ;;  %v7522_v37 = vld [vmem:[%s10073_s6 + $0x74] ss:$8 sps:$4 sm:$0xff]   ;;  %4663 = vmatpush1.bf16.msra.mxu1 %v7538_v26  ;;  %v7546_v9 = vld [vmem:[%s10073_s6 + $0x144] ss:$8 sps:$4 sm:$0xff]  }
 0x5c6   : > { %v4220_v55 = vadd.f32 %v4217_v58, %v4216_v40  ;;  %v4203_v15 = vadd.f32 %v4200_v48, %v4199_v33  ;;  %4863 = vmatprep.subr.bf16.mxu0 %v7522_v37  ;;  %v7555_v42 = vld [vmem:[%s10073_s6 + $0x14] ss:$8 sps:$4 sm:$0xff]   ;;  %v7544_v40 = vld [vmem:[%s10073_s6 + $0x140] ss:$8 sps:$4 sm:$0xff]   ;;  %v7553_v58 = vld [vmem:[%s10073_s6 + $0x10] ss:$8 sps:$4 sm:$0xff]   ;;  %4664 = vmatprep.subr.bf16.mxu1 %v7546_v9 }
 0x5c7   : > { %4864 = vmatpush1.bf16.msra.mxu0 %v7520_v31  ;;  %v7552_v33 = vld [vmem:[%s10073_s6 + $0x134] ss:$8 sps:$4 sm:$0xff]   ;;  %v7561_v48 = vld [vmem:[%s10073_s6 + $0x4] ss:$8 sps:$4 sm:$0xff]   ;;  %v7589_v37 = vld [vmem:[%s10073_s6 + $0xb0] ss:$8 sps:$4 sm:$0xff]  }
 0x5c8   : > { %v4221_v54 = vadd.f32 %v4220_v55, %v4218_v6  ;;  %v4204_v18 = vadd.f32 %v4203_v15, %v4201_v61  ;;  %4865 = vmatprep.subr.bf16.mxu0 %v7525_v43  ;;  %v7550_v6 = vld [vmem:[%s10073_s6 + $0x130] ss:$8 sps:$4 sm:$0xff]   ;;  %v7559_v55 = vld [vmem:[%s10073_s6] ss:$8 sps:$4 sm:$0xff]   ;;  %v7558_v61 = vld [vmem:[%s10073_s6 + $0x124] ss:$8 sps:$4 sm:$0xff]  }
 0x5c9   : > { %4665 = vmatpush1.bf16.msra.mxu1 %v7544_v40  ;;  %v7567_v15 = vld [vmem:[%s10073_s6 + $0xf4] ss:$8 sps:$4 sm:$0xff]   ;;  %v7597_v31 = vld [vmem:[%s10073_s6 + $0xa4] ss:$8 sps:$4 sm:$0xff]  }
 0x5ca   : > { %v4222_v20 = vadd.f32 %v4221_v54, %v4219_v17  ;;  %v4205_v22 = vadd.f32 %v4204_v18, %v4202_v3  ;;  %4666 = vmatprep.subr.bf16.mxu1 %v7552_v33  ;;  %v7556_v17 = vld [vmem:[%s10073_s6 + $0x120] ss:$8 sps:$4 sm:$0xff]   ;;  %v7565_v54 = vld [vmem:[%s10073_s6 + $0xf0] ss:$8 sps:$4 sm:$0xff]   ;;  %v7564_v3 = vld [vmem:[%s10073_s6 + $0x114] ss:$8 sps:$4 sm:$0xff]   ;;  %v3680_v33 = vstv %s9489_s25 }
 0x5cb   : > { %4866 = vmatpush1.bf16.msra.mxu0 %v7523_v44  ;;  %v7573_v18 = vld [vmem:[%s10073_s6 + $0xe4] ss:$8 sps:$4 sm:$0xff]   ;;  %v7586_v44 = vld [vmem:[%s10073_s6 + $0x1d0] ss:$8 sps:$4 sm:$0xff]   ;;  %v7612_v26 = vld [vmem:[%s10073_s6 + $0x194] ss:$8 sps:$4 sm:$0xff]  }
 0x5cc   : > { %4223 = vadd.xlane.f32.xlu1 %v4222_v20  ;;  %4206 = vadd.xlane.f32.xlu0 %v4205_v22  ;;  %v7562_v22 = vld [vmem:[%s10073_s6 + $0x110] ss:$8 sps:$4 sm:$0xff]   ;;  %v7615_v9 = vld [vmem:[%s10073_s6 + $0x184] ss:$8 sps:$4 sm:$0xff]   ;;  %v7619_v40 = vld [vmem:[%s10073_s6 + $0x274] ss:$8 sps:$4 sm:$0xff]  }
 0x5cd   : > { %4867 = vmatprep.subr.bf16.mxu0 %v7531_v45  ;;  %4667 = vmatpush1.bf16.msra.mxu1 %v7550_v6 }
 0x5ce   : > { %4668 = vmatprep.subr.bf16.mxu1 %v7558_v61  ;;  %v3681_v61 = vmul.f32 %v3680_v33, %v9473_v10  ;;  %v6529_v10 = vld [vmem:[%s10074_s7 + $0x3] ss:$8 sm:$0x3] }
 0x5cf   : > { %4868 = vmatpush1.bf16.msra.mxu0 %v7529_v47  ;;  %v7594_v47 = vld [vmem:[%s10073_s6 + $0x1c4] ss:$8 sps:$4 sm:$0xff]  }
 0x5d0   : > { %4869 = vmatprep.subr.bf16.mxu0 %v7537_v32  ;;  %v7603_v32 = vld [vmem:[%s10073_s6 + $0x94] ss:$8 sps:$4 sm:$0xff]  }
 0x5d1   : > { %4669 = vmatpush1.bf16.msra.mxu1 %v7556_v17 }
 0x5d2   : > { %4670 = vmatprep.subr.bf16.mxu1 %v7564_v3  ;;  %v6476_v3 = vld [vmem:[%s10074_s7 + $0x1] ss:$8 sm:$0x3] }
 0x5d3   : > { %4870 = vmatpush1.bf16.msra.mxu0 %v7535_v52  ;;  %v7600_v52 = vld [vmem:[%s10073_s6 + $0x1b4] ss:$8 sps:$4 sm:$0xff]  }
 0x5d4   : > { %4871 = vmatprep.subr.bf16.mxu0 %v7543_v56  ;;  %v7609_v56 = vld [vmem:[%s10073_s6 + $0x84] ss:$8 sps:$4 sm:$0xff]  }
 0x5d5   : > { %4671 = vmatpush1.bf16.msra.mxu1 %v7562_v22  ;;  %v3684_v22 = vmul.f32 %v3680_v33, %v9479_v12 }
 0x5d7   : > { %4872 = vmatpush1.bf16.msra.mxu0 %v7541_v59  ;;  %v7606_v59 = vld [vmem:[%s10073_s6 + $0x1a4] ss:$8 sps:$4 sm:$0xff]  }
 0x5d8   : > { %4873 = vmatprep.subr.bf16.mxu0 %v7549_v0  ;;  %v7604_v0 = vld [vmem:[%s10073_s6 + $0x1a0] ss:$8 sps:$4 sm:$0xff]  }
 0x5db   : > { %4874 = vmatpush1.bf16.msra.mxu0 %v7547_v63  ;;  %v7610_v63 = vld [vmem:[%s10073_s6 + $0x190] ss:$8 sps:$4 sm:$0xff]  }
 0x5dc   : > { %4875 = vmatprep.subr.bf16.mxu0 %v7555_v42  ;;  %v7613_v42 = vld [vmem:[%s10073_s6 + $0x180] ss:$8 sps:$4 sm:$0xff]  }
 0x5df   : > { %4876 = vmatpush1.bf16.msra.mxu0 %v7553_v58  ;;  %v3685_v58 = vld [vmem:[%s10074_s7] ss:$8 sm:$0x3] }
 0x5e0   : > { %4877 = vmatprep.subr.bf16.mxu0 %v7561_v48  ;;  %v3690_v48 = vrot.slane %v3685_v58, %v9419_v23  ;;  %v3694_v6 = vrot.slane %v3685_v58, %v9431_v28 }
 0x5e3   : > { %4878 = vmatpush1.bf16.msra.mxu0 %v7559_v55 }
 0x5e4   : > { %4879 = vmatprep.subr.bf16.mxu0 %v7567_v15  ;;  %v3682_v15 = vmul.f32 %v3680_v33, %v9475_v13  ;;  %v3697_v13 = vmul.f32 %v3690_v48, %v3681_v61 }
 0x5e7   : > { %4880 = vmatpush2.bf16.msra.mxu0 %v7565_v54 }
 0x5e8   : > { %4881 = vmatprep.subr.bf16.mxu0 %v7573_v18 }
 0x655   : > { %v4224_v60 = vpop.xlane.xlu1 %4223  ;;  %v4207_v46 = vpop.xlane.xlu0 %4206 }
 0x656   : > { %v4225_v57 = vrot.slane %v4224_v60, 4  ;;  %v4208_v11 = vrot.slane %v4207_v46, 4 }
 0x658   : > { %v4226_v25 = vadd.f32 %v4225_v57, %v4224_v60  ;;  %v4209_v35 = vadd.f32 %v4208_v11, %v4207_v46  ;;  %v7571_v60 = vld [vmem:[%s10073_s6 + $0xe0] ss:$8 sps:$4 sm:$0xff]   ;;  %v7570_v46 = vld [vmem:[%s10073_s6 + $0x104] ss:$8 sps:$4 sm:$0xff]   ;;  %v7579_v11 = vld [vmem:[%s10073_s6 + $0xd4] ss:$8 sps:$4 sm:$0xff]  }
 0x659   : > { %4882 = vmatpush2.bf16.msra.mxu0 %v7571_v60  ;;  %4672 = vmatprep.subr.bf16.mxu1 %v7570_v46  ;;  %v6528_v60 = vld [vmem:[%s10074_s7 + $0x2] ss:$8 sm:$0x3]  ;;  %v3707_v46 = vrot.slane %v6476_v3, %v9419_v23 }
 0x65a   : > { %v4227_v34 = vrot.slane %v4226_v25, 2  ;;  %v4210_v36 = vrot.slane %v4209_v35, 2  ;;  %4883 = vmatprep.subr.bf16.mxu0 %v7579_v11  ;;  %v3711_v11 = vrot.slane %v6476_v3, %v9431_v28  ;;  %v4265_v12 = vrot.slane %v6528_v60, %v9419_v23 }
 0x65c   : > { %v4228_v29 = vadd.f32 %v4227_v34, %v4226_v25  ;;  %v4211_v38 = vadd.f32 %v4210_v36, %v4209_v35  ;;  %v7568_v25 = vld [vmem:[%s10073_s6 + $0x100] ss:$8 sps:$4 sm:$0xff]   ;;  %v7577_v35 = vld [vmem:[%s10073_s6 + $0xd0] ss:$8 sps:$4 sm:$0xff]   ;;  %v7576_v36 = vld [vmem:[%s10073_s6 + $0x1f4] ss:$8 sps:$4 sm:$0xff]  }
 0x65d   : > { %4673 = vmatpush1.bf16.msra.mxu1 %v7568_v25  ;;  %4884 = vmatpush2.bf16.msra.mxu0 %v7577_v35  ;;  %v7574_v34 = vld [vmem:[%s10073_s6 + $0x1f0] ss:$8 sps:$4 sm:$0xff]   ;;  %v4269_v25 = vrot.slane %v6528_v60, %v9431_v28 }
 0x65e   : > { %v4229_v39 = vrot.slane %v4228_v29, 1  ;;  %v4212_v16 = vrot.slane %v4211_v38, 1  ;;  %4674 = vmatprep.subr.bf16.mxu1 %v7576_v36  ;;  %v4280_v36 = vrot.slane %v6529_v10, %v9419_v23 }
 0x660   : > { %v4230_v41 = vadd.f32 %v4229_v39, %v4228_v29  ;;  %v4213_v30 = vadd.f32 %v4212_v16, %v4211_v38  ;;  %v7582_v29 = vld [vmem:[%s10073_s6 + $0x1e4] ss:$8 sps:$4 sm:$0xff]   ;;  %v7583_v38 = vld [vmem:[%s10073_s6 + $0xc0] ss:$8 sps:$4 sm:$0xff]  }
 0x661   : > { %v7585_v39 = vld [vmem:[%s10073_s6 + $0xc4] ss:$8 sps:$4 sm:$0xff]   ;;  %4675 = vmatpush2.bf16.msra.mxu1 %v7574_v34  ;;  %v7580_v16 = vld [vmem:[%s10073_s6 + $0x1e0] ss:$8 sps:$4 sm:$0xff]   ;;  %v3700_v34 = vmul.f32 %v3694_v6, %v3684_v22 }
 0x662   : > { %6795 = vpush %v4213_v30  ;;  %4676 = vmatprep.subr.bf16.mxu1 %v7582_v29  ;;  %4885 = vmatprep.subr.bf16.mxu0 %v7585_v39  ;;  %v7588_v30 = vld [vmem:[%s10073_s6 + $0x1d4] ss:$8 sps:$4 sm:$0xff]   ;;  %v4284_v29 = vrot.slane %v6529_v10, %v9431_v28 }
 0x663   : > { %6797 = vpush %v4230_v41  ;;  %v7591_v41 = vld [vmem:[%s10073_s6 + $0xb4] ss:$8 sps:$4 sm:$0xff]   ;;  %4886 = vmatpush2.bf16.msra.mxu0 %v7583_v38 }
 0x664   : > { %4887 = vmatprep.subr.bf16.mxu0 %v7591_v41 }
 0x665   : > { %4677 = vmatpush2.bf16.msra.mxu1 %v7580_v16 }
 0x666   : > { %4678 = vmatprep.subr.bf16.mxu1 %v7588_v30 }
 0x667   : > { %4888 = vmatpush2.bf16.msra.mxu0 %v7589_v37 }
 0x668   : > { %4889 = vmatprep.subr.bf16.mxu0 %v7597_v31 }
 0x669   : > { %4679 = vmatpush2.bf16.msra.mxu1 %v7586_v44  ;;  %v3714_v44 = vadd.f32 %v3707_v46, %v3697_v13 }
 0x66a   : > { %4680 = vmatprep.subr.bf16.mxu1 %v7594_v47 }
 0x66b   : > { %4890 = vmatpush2.bf16.msra.mxu0 %v7595_v49  ;;  %v3717_v49 = vadd.f32 %v3711_v11, %v3700_v34 }
 0x66c   : > { %4891 = vmatprep.subr.bf16.mxu0 %v7603_v32 }
 0x66d   : > { %4681 = vmatpush2.bf16.msra.mxu1 %v7592_v50 }
 0x66e   : > { %4682 = vmatprep.subr.bf16.mxu1 %v7600_v52 }
 0x66f   : > { %4892 = vmatpush2.bf16.msra.mxu0 %v7601_v53 }
 0x670   : > { %4893 = vmatprep.subr.bf16.mxu0 %v7609_v56 }
 0x671   : > { %4683 = vmatpush2.bf16.msra.mxu1 %v7598_v62 }
 0x672   : > { %4684 = vmatprep.subr.bf16.mxu1 %v7606_v59 }
 0x673   : > { %4894 = vmatpush2.bf16.msra.mxu0 %v7607_v2 }
 0x675   : > { %4685 = vmatpush2.bf16.msra.mxu1 %v7604_v0 }
 0x676   : > { %4686 = vmatprep.subr.bf16.mxu1 %v7612_v26 }
 0x679   : > { %4687 = vmatpush2.bf16.msra.mxu1 %v7610_v63 }
 0x67a   : > { %4688 = vmatprep.subr.bf16.mxu1 %v7615_v9 }
 0x67d   : > { %4689 = vmatpush2.bf16.msra.mxu1 %v7613_v42 }
 0x67e   : > { %5113 = vmatprep.subr.bf16.mxu1 %v7619_v40 }
 0x693   : > { %s6796_s19 = spop %6795 }
 0x694   : > { %s4215_s26 = smul.f32 0.00048828125, %s6796_s19  ;;  %s6798_s13 = spop %6797 }
 0x695   : > { %s4232_s16 = smul.f32 0.00048828125, %s6798_s13 }
 0x696   : > { %s4233_s0 = sadd.f32 1e-05, %s4215_s26 }
 0x697   : > { %s4239_s24 = sadd.f32 1e-05, %s4232_s16 }
 0x698   : > { %v4234_v20 = vstv %s4233_s0 }
 0x699   : > { %7688 = vrsqrt.f32 %v4234_v20  ;;  %v4240_v57 = vstv %s4239_s24  ;;  %v3683_v20 = vmul.f32 %v3680_v33, %v9477_v14 }
 0x69a   : > { %7690 = vrsqrt.f32 %v4240_v57  ;;  %v3698_v57 = vmul.f32 %v3694_v6, %v3682_v15 }
 0x69b   : > { %v3699_v35 = vmul.f32 %v3690_v48, %v3683_v20 }
 0x69d   : > { %v3716_v47 = vadd.f32 %v3707_v46, %v3699_v35 }
 0x6a6   : > { %v7689_v43 = vpop.eup %7688 }
 0x6a7   : > { %v7691_v45 = vpop.eup %7690  ;;  %6799 = vpush %v7689_v43 }
 0x6a8   : > { %6801 = vpush %v7691_v45  ;;  %v3715_v45 = vadd.f32 %v3711_v11, %v3698_v57 }
 0x6d8   : > { %s6800_s15 = spop %6799 }
 0x6d9   : > { %v4237_v55 = vstv %s6800_s15  ;;  %s6802_s26 = spop %6801 }
 0x6da   : > { %v4238_v17 = vmul.f32 %v4237_v55, %v9424_v24  ;;  %v4243_v54 = vstv %s6802_s26 }
 0x6db   : > { %v4244_v18 = vmul.f32 %v9429_v27, %v4243_v54 }
 0x6dd   : > { %v4245_v24 = vadd.f32 %v4244_v18, %v4238_v17 }
 0x6df   : > { %v4250_v27 = vrot.slane %v4245_v24, %v9419_v23  ;;  %v4254_v14 = vrot.slane %v4245_v24, %v9431_v28 }
 0x6e1   : > { %v4257_v38 = vmul.f32 %v4250_v27, %v9496_v1  ;;  %v4258_v39 = vmul.f32 %v4254_v14, %v9499_v4  ;;  %v4259_v16 = vmul.f32 %v4250_v27, %v9502_v51  ;;  %v4260_v41 = vmul.f32 %v4254_v14, %v9505_v8 }
 0x6e3   : > { %v4272_v30 = vmul.f32 %v4265_v12, %v4257_v38  ;;  %v4273_v37 = vmul.f32 %v4269_v25, %v4258_v39  ;;  %v4274_v31 = vmul.f32 %v4265_v12, %v4259_v16  ;;  %v4275_v43 = vmul.f32 %v4269_v25, %v4260_v41 }
 0x6e5   : > { %v4287_v32 = vadd.f32 %v4280_v36, %v4272_v30  ;;  %v4288_v50 = vadd.f32 %v4284_v29, %v4273_v37  ;;  %v4289_v52 = vadd.f32 %v4280_v36, %v4274_v31  ;;  %v4290_v53 = vadd.f32 %v4284_v29, %v4275_v43  ;;  %v4384_v30 = vld [vmem:[#allocation3] sm:$0xff] }
 0x6e7   : > { %v4291_v56 = vadd.f32 %v4287_v32, %v3714_v44  ;;  %v4292_v1 = vadd.f32 %v4288_v50, %v3715_v45  ;;  %v4293_v62 = vadd.f32 %v4289_v52, %v3716_v47  ;;  %v4294_v4 = vadd.f32 %v4290_v53, %v3717_v49  ;;  %v4388_v45 = vld [vmem:[#allocation3 + $0x10] sm:$0x11] }
 0x6e9   : > { %v4295_v59 = vmul.f32 1.442695, %v4291_v56  ;;  %v4297_v51 = vmul.f32 1.442695, %v4292_v1  ;;  %v4299_v2 = vmul.f32 1.442695, %v4293_v62 }
 0x6ea   : > { %v4301_v8 = vmul.f32 1.442695, %v4294_v4 }
 0x6eb   : > { %7692 = vpow2.f32 %v4295_v59 }
 0x6ec   : > { %7694 = vpow2.f32 %v4297_v51 }
 0x6ed   : > { %7696 = vpow2.f32 %v4299_v2 }
 0x6ee   : > { %7698 = vpow2.f32 %v4301_v8 }
 0x6f8   : > { %v7693_v0 = vpop.eup %7692 }
 0x6f9   : > { %v7695_v26 = vpop.eup %7694  ;;  %v4303_v63 = vadd.f32 1.0, %v7693_v0 }
 0x6fa   : > { %v7697_v9 = vpop.eup %7696  ;;  %v4304_v42 = vadd.f32 1.0, %v7695_v26 }
 0x6fb   : > { %v7699_v40 = vpop.eup %7698  ;;  %v4305_v58 = vadd.f32 1.0, %v7697_v9  ;;  %v4307_v33 = vmul.f32 %v4303_v63, %v4303_v63 }
 0x6fc   : > { %v4306_v48 = vadd.f32 1.0, %v7699_v40  ;;  %v4308_v6 = vmul.f32 %v4304_v42, %v4304_v42 }
 0x6fd   : > { %v4309_v55 = vmul.f32 %v4305_v58, %v4305_v58  ;;  %v4311_v61 = vadd.f32 1.0, %v4307_v33 }
 0x6fe   : > { %v4310_v15 = vmul.f32 %v4306_v48, %v4306_v48  ;;  %v4312_v17 = vadd.f32 1.0, %v4308_v6 }
 0x6ff   : > { %v4313_v54 = vadd.f32 1.0, %v4309_v55  ;;  %7700 = vrcp.f32 %v4311_v61 }
 0x700   : > { %v4314_v3 = vadd.f32 1.0, %v4310_v15  ;;  %7702 = vrcp.f32 %v4312_v17  ;;  %v7617_v15 = vld [vmem:[%s10073_s6 + $0x270] ss:$8 sps:$4 sm:$0xff]  }
 0x701   : > { %7704 = vrcp.f32 %v4313_v54 }
 0x702   : > { %7706 = vrcp.f32 %v4314_v3  ;;  %v7623_v3 = vld [vmem:[%s10073_s6 + $0x264] ss:$8 sps:$4 sm:$0xff]  }
 0x70c   : > { %v7701_v18 = vpop.eup %7700 }
 0x70d   : > { %v7703_v20 = vpop.eup %7702  ;;  %v4319_v22 = vmul.f32 2.0, %v7701_v18 }
 0x70e   : > { %v7705_v60 = vpop.eup %7704  ;;  %v4320_v10 = vmul.f32 2.0, %v7703_v20  ;;  %v7621_v20 = vld [vmem:[%s10073_s6 + $0x260] ss:$8 sps:$4 sm:$0xff]  }
 0x70f   : > { %v7707_v24 = vpop.eup %7706  ;;  %v4321_v13 = vmul.f32 2.0, %v7705_v60  ;;  %v4323_v57 = vsub.f32 1.0, %v4319_v22  ;;  %v7626_v22 = vld [vmem:[%s10073_s6 + $0x254] ss:$8 sps:$4 sm:$0xff]   ;;  %v7624_v60 = vld [vmem:[%s10073_s6 + $0x250] ss:$8 sps:$4 sm:$0xff]  }
 0x710   : > { %v4322_v46 = vmul.f32 2.0, %v7707_v24  ;;  %v4324_v11 = vsub.f32 1.0, %v4320_v10  ;;  %v7629_v10 = vld [vmem:[%s10073_s6 + $0x244] ss:$8 sps:$4 sm:$0xff]   ;;  %v7627_v24 = vld [vmem:[%s10073_s6 + $0x240] ss:$8 sps:$4 sm:$0xff]  }
 0x711   : > { %v4325_v27 = vsub.f32 1.0, %v4321_v13  ;;  %v4327_v14 = vmul.f32 %v4323_v57, %v4291_v56  ;;  %v7632_v13 = vld [vmem:[%s10073_s6 + $0x234] ss:$8 sps:$4 sm:$0xff]   ;;  %v7630_v57 = vld [vmem:[%s10073_s6 + $0x230] ss:$8 sps:$4 sm:$0xff]  }
 0x712   : > { %v4326_v12 = vsub.f32 1.0, %v4322_v46  ;;  %v4328_v25 = vmul.f32 %v4324_v11, %v4292_v1  ;;  %v7635_v46 = vld [vmem:[%s10073_s6 + $0x224] ss:$8 sps:$4 sm:$0xff]   ;;  %v7633_v11 = vld [vmem:[%s10073_s6 + $0x220] ss:$8 sps:$4 sm:$0xff]  }
 0x713   : > { %v4329_v35 = vmul.f32 %v4325_v27, %v4293_v62  ;;  %v7638_v27 = vld [vmem:[%s10073_s6 + $0x214] ss:$8 sps:$4 sm:$0xff]  }
 0x714   : > { %v4330_v34 = vmul.f32 %v4326_v12, %v4294_v4  ;;  %v6744_v36 = vpack.c.bf16 %v4328_v25, %v4327_v14  ;;  %v7636_v14 = vld [vmem:[%s10073_s6 + $0x210] ss:$8 sps:$4 sm:$0xff]   ;;  %v7641_v12 = vld [vmem:[%s10073_s6 + $0x204] ss:$8 sps:$4 sm:$0xff]   ;;  %v7639_v25 = vld [vmem:[%s10073_s6 + $0x200] ss:$8 sps:$4 sm:$0xff]  }
 0x716   : > { %v6745_v29 = vpack.c.bf16 %v4330_v34, %v4329_v35  ;;  %v4360_v38 = vshrl.u32 %v6744_v36, 16  ;;  %v4363_v16 = vshll.u32 %v6744_v36, 16  ;;  %v7644_v35 = vld [vmem:[%s10073_s6 + $0x2f4] ss:$8 sps:$4 sm:$0xff]   ;;  %v7642_v34 = vld [vmem:[%s10073_s6 + $0x2f0] ss:$8 sps:$4 sm:$0xff]  }
 0x717   : > { %v7647_v36 = vld [vmem:[%s10073_s6 + $0x2e4] ss:$8 sps:$4 sm:$0xff]  }
 0x718   : > { %v4362_v39 = vrot.slane %v4360_v38, 7  ;;  %v4368_v41 = vshrl.u32 %v6745_v29, 16  ;;  %v4371_v44 = vshll.u32 %v6745_v29, 16  ;;  %v7645_v29 = vld [vmem:[%s10073_s6 + $0x2e0] ss:$8 sps:$4 sm:$0xff]  }
 0x719   : > { %v7650_v38 = vld [vmem:[%s10073_s6 + $0x2d4] ss:$8 sps:$4 sm:$0xff]  }
 0x71a   : > { %v4365_v37 = vor.u32 %v4363_v16, %v4362_v39  ;;  %v4366_v31 = vrot.slane %v4362_v39, 4  ;;  %v4370_v43 = vrot.slane %v4368_v41, 7  ;;  %v7648_v39 = vld [vmem:[%s10073_s6 + $0x2d0] ss:$8 sps:$4 sm:$0xff]   ;;  %v7653_v16 = vld [vmem:[%s10073_s6 + $0x2c4] ss:$8 sps:$4 sm:$0xff]  }
 0x71b   : > { %v7651_v41 = vld [vmem:[%s10073_s6 + $0x2c0] ss:$8 sps:$4 sm:$0xff]  }
 0x71c   : > { %v4373_v47 = vor.u32 %v4371_v44, %v4370_v43  ;;  %v4375_v49 = vrot.slane %v4370_v43, 4  ;;  %v4385_v32 = vsel %vm4383_vm0, %v4365_v37, %v4384_v30  ;;  %v7656_v30 = vld [vmem:[%s10073_s6 + $0x2b4] ss:$8 sps:$4 sm:$0xff]   ;;  %v7654_v37 = vld [vmem:[%s10073_s6 + $0x2b0] ss:$8 sps:$4 sm:$0xff]  }
 0x71d   : > { %4386 = vst [vmem:[#allocation3] sm:$0xff] %v4385_v32  ;;  %v7657_v43 = vld [vmem:[%s10073_s6 + $0x2a0] ss:$8 sps:$4 sm:$0xff]   ;;  %v7662_v44 = vld [vmem:[%s10073_s6 + $0x294] ss:$8 sps:$4 sm:$0xff]  }
 0x71e   : > { %v4374_v50 = vsel %vm4358_vm12, %v4366_v31, %v4373_v47  ;;  %v4389_v52 = vsel %vm4335_vm11, %v4375_v49, %v4388_v45  ;;  %v7659_v31 = vld [vmem:[%s10073_s6 + $0x2a4] ss:$8 sps:$4 sm:$0xff]   ;;  %v7660_v45 = vld [vmem:[%s10073_s6 + $0x290] ss:$8 sps:$4 sm:$0xff]   ;;  %v7663_v49 = vld [vmem:[%s10073_s6 + $0x280] ss:$8 sps:$4 sm:$0xff]  }
 0x71f   : > { %4390 = vst [vmem:[#allocation3 + $0x10] sm:$0x11] %v4389_v52  ;;  %v6565_v53 = vcombine.low %v4385_v32, %v4374_v50  ;;  %v6566_v56 = vcombine.high %v4385_v32, %v4374_v50  ;;  %v7665_v47 = vld [vmem:[%s10073_s6 + $0x284] ss:$8 sps:$4 sm:$0xff]  }
 0x721   : > { %4895 = vmatprep.mubr.bf16.mxu0 %v6566_v56  ;;  %v4487_v1 = vshll.u32 %v6566_v56, 16  ;;  %v4475_v62 = vshll.u32 %v6565_v53, 16  ;;  %v4485_v26 = vshrl.u32 %v6566_v56, 16  ;;  %v4473_v5 = vshrl.u32 %v6565_v53, 16 }
 0x722   : > { %4896 = vmatmul.mubr.bf16.vlgmr.msra.gmra.mxu0 %v6565_v53 }
 0x723   : > { %v4489_v59 = vrot.slane %v4487_v1, 1  ;;  %v4477_v51 = vrot.slane %v4475_v62, 1  ;;  %v9865_v1 = vld [vmem:[%s10075_s8 + $0x1] ss:$2 sm:$0x3] }
 0x724   : > { %v4906_v21 = vld [vmem:[#allocation3] sm:$0xee] }
 0x725   : > { %v6665_v4 = vcombine.low %v4906_v21, %v4374_v50  ;;  %v6666_v2 = vcombine.high %v4906_v21, %v4374_v50  ;;  %v4490_v40 = vor.u32 %v4489_v59, %v4485_v26  ;;  %v4478_v58 = vor.u32 %v4477_v51, %v4473_v5 }
 0x726   : > { %v4425_v19 = vld [vmem:[#allocation3 + $0x10] sm:$0x11]  ;;  %v9874_v51 = vrot.slane %v9865_v1, %v9419_v23 }
 0x727   : > { %v6568_v8 = vcombine.high %v4425_v19, %v4425_v19  ;;  %v6567_v0 = vcombine.low %v4425_v19, %v4425_v19  ;;  %v4945_v7 = vrot.slane %v6665_v4, 1  ;;  %v4948_v33 = vrot.slane %v6666_v2, 1  ;;  %v9870_v19 = vld [vmem:[%s10075_s8] ss:$2 sm:$0x3] }
 0x728   : > { %v9886_v26 = vrot.slane %v9870_v19, %v9419_v23 }
 0x729   : > { %v4492_v63 = vshll.u32 %v6568_v8, 16  ;;  %v4480_v9 = vshll.u32 %v6567_v0, 16  ;;  %v4946_v42 = vrot.slane %v6567_v0, 1  ;;  %v4949_v55 = vrot.slane %v6568_v8, 1 }
 0x72a   : > { %v9878_v0 = vrot.slane %v9870_v19, %v9431_v28 }
 0x72b   : > { %v4494_v48 = vrot.slane %v4492_v63, 1  ;;  %v4482_v6 = vrot.slane %v4480_v9, 1  ;;  %v9763_v61 = vsel %vm2150_vm6, %v4945_v7, %v4946_v42  ;;  %v4950_v18 = vsel %vm2150_vm6, %v4948_v33, %v4949_v55 }
 0x72c   : > { %v9882_v7 = vrot.slane %v9865_v1, %v9431_v28 }
 0x72d   : > { %v4495_v17 = vsel %vm1204_vm3, %v4490_v40, %v4494_v48  ;;  %v4483_v54 = vsel %vm1204_vm3, %v4478_v58, %v4482_v6 }
 0x72e   : > { %4690 = vmatprep.mubr.bf16.mxu1 %v4495_v17 }
 0x72f   : > { %4691 = vmatmul.mubr.bf16.vlgmr.msra.gmra.mxu1 %v4483_v54 }
 0x730   : > { %5114 = vmatpush1.bf16.msra.mxu1 %v7617_v15  ;;  %5145 = vmatprep.mubr.bf16.mxu1 %v4950_v18 }
 0x731   : > { %5115 = vmatprep.subr.bf16.mxu1 %v7623_v3 }
 0x734   : > { %5116 = vmatpush1.bf16.msra.mxu1 %v7621_v20 }
 0x735   : > { %5117 = vmatprep.subr.bf16.mxu1 %v7626_v22 }
 0x738   : > { %5118 = vmatpush1.bf16.msra.mxu1 %v7624_v60 }
 0x739   : > { %5119 = vmatprep.subr.bf16.mxu1 %v7629_v10 }
 0x73c   : > { %5120 = vmatpush1.bf16.msra.mxu1 %v7627_v24 }
 0x73d   : > { %5121 = vmatprep.subr.bf16.mxu1 %v7632_v13 }
 0x740   : > { %5122 = vmatpush1.bf16.msra.mxu1 %v7630_v57 }
 0x741   : > { %5123 = vmatprep.subr.bf16.mxu1 %v7635_v46 }
 0x744   : > { %5124 = vmatpush1.bf16.msra.mxu1 %v7633_v11 }
 0x745   : > { %5125 = vmatprep.subr.bf16.mxu1 %v7638_v27 }
 0x748   : > { %5126 = vmatpush1.bf16.msra.mxu1 %v7636_v14 }
 0x749   : > { %5127 = vmatprep.subr.bf16.mxu1 %v7641_v12 }
 0x74c   : > { %5128 = vmatpush1.bf16.msra.mxu1 %v7639_v25 }
 0x74d   : > { %5129 = vmatprep.subr.bf16.mxu1 %v7644_v35 }
 0x750   : > { %5130 = vmatpush2.bf16.msra.mxu1 %v7642_v34 }
 0x751   : > { %5131 = vmatprep.subr.bf16.mxu1 %v7647_v36 }
 0x754   : > { %5132 = vmatpush2.bf16.msra.mxu1 %v7645_v29 }
 0x755   : > { %5133 = vmatprep.subr.bf16.mxu1 %v7650_v38 }
 0x758   : > { %5134 = vmatpush2.bf16.msra.mxu1 %v7648_v39 }
 0x759   : > { %5135 = vmatprep.subr.bf16.mxu1 %v7653_v16 }
 0x75c   : > { %5136 = vmatpush2.bf16.msra.mxu1 %v7651_v41 }
 0x75d   : > { %5137 = vmatprep.subr.bf16.mxu1 %v7656_v30 }
 0x760   : > { %5138 = vmatpush2.bf16.msra.mxu1 %v7654_v37 }
 0x761   : > { %5139 = vmatprep.subr.bf16.mxu1 %v7659_v31 }
 0x764   : > { %5140 = vmatpush2.bf16.msra.mxu1 %v7657_v43 }
 0x765   : > { %5141 = vmatprep.subr.bf16.mxu1 %v7662_v44 }
 0x768   : > { %5142 = vmatpush2.bf16.msra.mxu1 %v7660_v45 }
 0x769   : > { %5143 = vmatprep.subr.bf16.mxu1 %v7665_v47 }
 0x76c   : > { %5144 = vmatpush2.bf16.msra.mxu1 %v7663_v49 }
 0x76f   : > { %5146 = vmatmul.mubr.bf16.vlgmr.msra.gmra.mxu1 %v9763_v61 }
 0x7e2   : > { %v4897_v52 = vpop.f32.mrf.mxu0 }
 0x7e4   : > { %v4899_v56 = vpop.f32.mrf.mxu0 }
 0x7e6   : > { %v4901_v21 = vpop.f32.mrf.mxu0 }
 0x7e8   : > { %v4903_v63 = vpop.f32.mrf.mxu0 }
 0x7ef   : > { %v4692_v32 = vpop.f32.mrf.mxu1 }
 0x7f0   : > { %v4898_v4 = vadd.f32 %v4897_v52, %v4692_v32 }
 0x7f1   : > { %v4694_v50 = vpop.f32.mrf.mxu1 }
 0x7f2   : > { %v4900_v2 = vadd.f32 %v4899_v56, %v4694_v50 }
 0x7f3   : > { %v4696_v53 = vpop.f32.mrf.mxu1 }
 0x7f4   : > { %v4902_v9 = vadd.f32 %v4901_v21, %v4696_v53 }
 0x7f5   : > { %v4698_v62 = vpop.f32.mrf.mxu1 }
 0x7f6   : > { %v4904_v40 = vadd.f32 %v4903_v63, %v4698_v62 }
 0x82f   : > { %v5147_v59 = vpop.f32.mrf.mxu1 }
 0x830   : > { %v5156_v8 = vadd.f32 %v5147_v59, %v4898_v4 }
 0x831   : > { %v5149_v5 = vpop.f32.mrf.mxu1 }
 0x832   : > { %v5157_v42 = vadd.f32 %v5149_v5, %v4900_v2  ;;  %v5205_v33 = vmul.f32 %v9874_v51, %v5156_v8  ;;  %v5177_v61 = vmul.f32 %v9886_v26, %v5156_v8 }
 0x833   : > { %v5151_v58 = vpop.f32.mrf.mxu1 }
 0x834   : > { %v5178_v48 = vmul.f32 %v9878_v0, %v5157_v42  ;;  %v5206_v6 = vmul.f32 %v9882_v7, %v5157_v42  ;;  %v5158_v55 = vadd.f32 %v5151_v58, %v4902_v9 }
 0x835   : > { %v5153_v15 = vpop.f32.mrf.mxu1 }
 0x836   : > { %v5179_v17 = vmul.f32 %v9886_v26, %v5158_v55  ;;  %v5207_v54 = vmul.f32 %v9874_v51, %v5158_v55  ;;  %v5159_v3 = vadd.f32 %v5153_v15, %v4904_v40  ;;  %v5209_v18 = vadd.f32 %v5206_v6, %v5205_v33 }
 0x837   : > { %v5181_v20 = vadd.f32 %v5178_v48, %v5177_v61 }
 0x838   : > { %v5208_v22 = vmul.f32 %v9882_v7, %v5159_v3  ;;  %v5210_v60 = vadd.f32 %v5209_v18, %v5207_v54  ;;  %v5180_v10 = vmul.f32 %v9878_v0, %v5159_v3 }
 0x839   : > { %v5182_v24 = vadd.f32 %v5181_v20, %v5179_v17 }
 0x83a   : > { %v5211_v13 = vadd.f32 %v5210_v60, %v5208_v22 }
 0x83b   : > { %v5183_v57 = vadd.f32 %v5182_v24, %v5180_v10 }
 0x83c   : > { %5212 = vadd.xlane.f32.xlu1 %v5211_v13  ;;  %v7667_v13 = vld [vmem:[%s10077_s10 + $0x38] sm:$0xff]  }
 0x83d   : > { %5184 = vadd.xlane.f32.xlu0 %v5183_v57  ;;  %v7668_v57 = vld [vmem:[%s10077_s10 + $0x70] sm:$0xff]  }
 0x8c5   : > { %v5213_v46 = vpop.xlane.xlu1 %5212 }
 0x8c6   : > { %v5214_v11 = vrot.slane %v5213_v46, 4  ;;  %v5185_v27 = vpop.xlane.xlu0 %5184 }
 0x8c7   : > { %v5186_v14 = vrot.slane %v5185_v27, 4 }
 0x8c8   : > { %v5215_v12 = vadd.f32 %v5214_v11, %v5213_v46  ;;  %v7669_v46 = vld [vmem:[%s10077_s10 + $0x30] sm:$0xff]   ;;  %v7670_v11 = vld [vmem:[%s10077_s10 + $0x68] sm:$0xff]  }
 0x8c9   : > { %v5187_v25 = vadd.f32 %v5186_v14, %v5185_v27  ;;  %v7671_v27 = vld [vmem:[%s10077_s10 + $0x28] sm:$0xff]   ;;  %v7672_v14 = vld [vmem:[%s10077_s10 + $0x60] sm:$0xff]  }
 0x8ca   : > { %v5216_v35 = vrot.slane %v5215_v12, 2 }
 0x8cb   : > { %v5188_v34 = vrot.slane %v5187_v25, 2 }
 0x8cc   : > { %v5217_v36 = vadd.f32 %v5216_v35, %v5215_v12  ;;  %v7673_v12 = vld [vmem:[%s10077_s10 + $0x20] sm:$0xff]   ;;  %v7675_v35 = vld [vmem:[%s10077_s10 + $0x18] sm:$0xff]  }
 0x8cd   : > { %v5189_v29 = vadd.f32 %v5188_v34, %v5187_v25  ;;  %v7674_v25 = vld [vmem:[%s10077_s10 + $0x58] sm:$0xff]   ;;  %v7676_v34 = vld [vmem:[%s10077_s10 + $0x50] sm:$0xff]  }
 0x8ce   : > { %v5218_v38 = vrot.slane %v5217_v36, 1 }
 0x8cf   : > { %v5190_v39 = vrot.slane %v5189_v29, 1 }
 0x8d0   : > { %v5219_v16 = vadd.f32 %v5218_v38, %v5217_v36  ;;  %v7677_v36 = vld [vmem:[%s10077_s10 + $0x10] sm:$0xff]   ;;  %v7679_v38 = vld [vmem:[%s10077_s10 + $0x8] sm:$0xff]  }
 0x8d1   : > { %v5191_v41 = vadd.f32 %v5190_v39, %v5189_v29  ;;  %v7678_v29 = vld [vmem:[%s10077_s10 + $0x48] sm:$0xff]   ;;  %v7680_v39 = vld [vmem:[%s10077_s10 + $0x40] sm:$0xff]  }
 0x8d3   : > { %6803 = vpush %v5191_v41 }
 0x8d4   : > { %6805 = vpush %v5219_v16  ;;  %v7681_v16 = vld [vmem:[%s10077_s10] sm:$0xff]  }
 0x904   : > { %s6804_s25 = spop %6803 }
 0x905   : > { %s5193_s16 = smul.f32 0.00048828125, %s6804_s25  ;;  %s6806_s12 = spop %6805 }
 0x906   : > { %s5221_s30 = smul.f32 0.00048828125, %s6806_s12 }
 0x907   : > { %v5222_v30 = vstv %s5193_s16 }
 0x908   : > { %v5223_v37 = vmul.f32 %v5222_v30, %v9870_v19  ;;  %v5224_v31 = vstv %s5221_s30  ;;  %s6746_s30 = sshll.u32 %s7907_s21, 10 }
 0x909   : > { %v5225_v43 = vmul.f32 %v9865_v1, %v5224_v31  ;;  %s10019_s22 = scalar_lea.hbm %s10078_s11, %s6746_s30 }
 0x90b   : > { %v5226_v44 = vadd.f32 %v5225_v43, %v5223_v37 }
 0x90d   : > { %v5231_v45 = vrot.slane %v5226_v44, %v9419_v23  ;;  %v5235_v47 = vrot.slane %v5226_v44, %v9431_v28 }
 0x90f   : > { %v9900_v49 = vsub.f32 %v5156_v8, %v5231_v45  ;;  %v9902_v32 = vsub.f32 %v5157_v42, %v5235_v47  ;;  %v9904_v50 = vsub.f32 %v5158_v55, %v5231_v45  ;;  %v9906_v52 = vsub.f32 %v5159_v3, %v5235_v47 }
 0x911   : > { %v5242_v53 = vmul.f32 %v9900_v49, %v9900_v49  ;;  %v5243_v56 = vmul.f32 %v9902_v32, %v9902_v32  ;;  %v5244_v62 = vmul.f32 %v9904_v50, %v9904_v50  ;;  %v5245_v21 = vmul.f32 %v9906_v52, %v9906_v52 }
 0x913   : > { %v5263_v4 = vmul.f32 %v5242_v53, %v9874_v51  ;;  %v5264_v59 = vmul.f32 %v5243_v56, %v9882_v7  ;;  %v5246_v2 = vmul.f32 %v5242_v53, %v9886_v26  ;;  %v5247_v8 = vmul.f32 %v5243_v56, %v9878_v0  ;;  %v6699_v53 = vld [vmem:[%s10074_s7 + $0x4] ss:$8 sm:$0x3]  ;;  %v6700_v56 = vld [vmem:[%s10074_s7 + $0x5] ss:$8 sm:$0x3] }
 0x914   : > { %v5265_v5 = vmul.f32 %v5244_v62, %v9874_v51  ;;  %v5248_v9 = vmul.f32 %v5244_v62, %v9886_v26  ;;  %v5266_v40 = vmul.f32 %v5245_v21, %v9882_v7  ;;  %v5249_v33 = vmul.f32 %v5245_v21, %v9878_v0  ;;  %v7666_v0 = vld [vmem:[%s10077_s10 + $0x78] sm:$0xff]  }
 0x915   : > { %v5267_v63 = vadd.f32 %v5264_v59, %v5263_v4  ;;  %v5250_v42 = vadd.f32 %v5247_v8, %v5246_v2  ;;  %6747 = vmatprep.subr.bf16.mxu0 %v7666_v0  ;;  %v5312_v59 = vrot.slane %v6699_v53, %v9419_v23  ;;  %v5327_v2 = vrot.slane %v6700_v56, %v9419_v23 }
 0x916   : > { %6748 = vmatpush3.bf16.msra.mxu0 %v7667_v13 }
 0x917   : > { %v5268_v58 = vadd.f32 %v5267_v63, %v5265_v5  ;;  %v5251_v48 = vadd.f32 %v5250_v42, %v5248_v9  ;;  %6749 = vmatprep.subr.bf16.mxu0 %v7668_v57 }
 0x919   : > { %v5269_v6 = vadd.f32 %v5268_v58, %v5266_v40  ;;  %v5252_v55 = vadd.f32 %v5251_v48, %v5249_v33 }
 0x91a   : > { %6750 = vmatpush3.bf16.msra.mxu0 %v7669_v46 }
 0x91b   : > { %5270 = vadd.xlane.f32.xlu1 %v5269_v6  ;;  %5253 = vadd.xlane.f32.xlu0 %v5252_v55 }
 0x91c   : > { %6751 = vmatprep.subr.bf16.mxu0 %v7670_v11 }
 0x91e   : > { %6752 = vmatpush3.bf16.msra.mxu0 %v7671_v27 }
 0x91f   : > { %6753 = vmatprep.subr.bf16.mxu0 %v7672_v14 }
 0x922   : > { %6754 = vmatpush3.bf16.msra.mxu0 %v7673_v12 }
 0x923   : > { %6755 = vmatprep.subr.bf16.mxu0 %v7674_v25 }
 0x926   : > { %6756 = vmatpush3.bf16.msra.mxu0 %v7675_v35 }
 0x927   : > { %6757 = vmatprep.subr.bf16.mxu0 %v7676_v34 }
 0x92a   : > { %6758 = vmatpush3.bf16.msra.mxu0 %v7677_v36 }
 0x92b   : > { %6759 = vmatprep.subr.bf16.mxu0 %v7678_v29 }
 0x92e   : > { %6760 = vmatpush3.bf16.msra.mxu0 %v7679_v38 }
 0x92f   : > { %6761 = vmatprep.subr.bf16.mxu0 %v7680_v39 }
 0x932   : > { %6762 = vmatpush3.bf16.msra.mxu0 %v7681_v16 }
 0x9a4   : > { %v5271_v61 = vpop.xlane.xlu1 %5270  ;;  %v5254_v17 = vpop.xlane.xlu0 %5253 }
 0x9a5   : > { %v5272_v15 = vrot.slane %v5271_v61, 4  ;;  %v5255_v54 = vrot.slane %v5254_v17, 4 }
 0x9a7   : > { %v5273_v3 = vadd.f32 %v5272_v15, %v5271_v61  ;;  %v5256_v51 = vadd.f32 %v5255_v54, %v5254_v17 }
 0x9a9   : > { %v5274_v18 = vrot.slane %v5273_v3, 2  ;;  %v5257_v20 = vrot.slane %v5256_v51, 2 }
 0x9ab   : > { %v5275_v26 = vadd.f32 %v5274_v18, %v5273_v3  ;;  %v5258_v22 = vadd.f32 %v5257_v20, %v5256_v51 }
 0x9ad   : > { %v5276_v60 = vrot.slane %v5275_v26, 1  ;;  %v5259_v7 = vrot.slane %v5258_v22, 1 }
 0x9af   : > { %v5277_v10 = vadd.f32 %v5276_v60, %v5275_v26  ;;  %v5260_v24 = vadd.f32 %v5259_v7, %v5258_v22 }
 0x9b1   : > { %6807 = vpush %v5260_v24 }
 0x9b2   : > { %6809 = vpush %v5277_v10 }
 0x9e2   : > { %s6808_s24 = spop %6807 }
 0x9e3   : > { %s5262_s13 = smul.f32 0.00048828125, %s6808_s24  ;;  %s6810_s15 = spop %6809 }
 0x9e4   : > { %s5279_s26 = smul.f32 0.00048828125, %s6810_s15 }
 0x9e5   : > { %s5280_s23 = sadd.f32 1e-05, %s5262_s13  ;;  %s7823_s13 = smov [#allocation4]  }
 0x9e6   : > { %s5286_s0 = sadd.f32 1e-05, %s5279_s26  ;;  %s7764_s15 = sshll.u32 %s7823_s13, 4  ;;  %s7765_s15 = int_to_ptr.vmem [resolvable:$false] %s7764_s15 }
 0x9e7   : > { %v5281_v41 = vstv %s5280_s23  ;;  %s7766_s26 = scalar_lea.vmem %s7765_s15, 2048 }
 0x9e8   : > { %7708 = vrsqrt.f32 %v5281_v41  ;;  %v5287_v30 = vstv %s5286_s0 }
 0x9e9   : > { %7710 = vrsqrt.f32 %v5287_v30 }
 0x9f5   : > { %v7709_v37 = vpop.eup %7708 }
 0x9f6   : > { %v7711_v31 = vpop.eup %7710  ;;  %6811 = vpush %v7709_v37 }
 0x9f7   : > { %6813 = vpush %v7711_v31  ;;  %v7682_v31 = vld [vmem:[%s10076_s9] sm:$0xff]  }
 0xa27   : > { %s6812_s25 = spop %6811 }
 0xa28   : > { %v5284_v43 = vstv %s6812_s25  ;;  %s6814_s16 = spop %6813  ;;  %s392_s25 = sand.u32 1, %s7812_s18  }
 0xa29   : > { %v5285_v44 = vmul.f32 %v5284_v43, %v9870_v19  ;;  %v5290_v45 = vstv %s6814_s16  ;;  %v5316_v19 = vrot.slane %v6699_v53, %v9431_v28  ;;  %s5801_s16 = sshll.u32 %s392_s25, 6  ;;  %s10027_s21 = scalar_lea.sflag [#allocation5], %s392_s25 }
 0xa2a   : > { %v5291_v47 = vmul.f32 %v9865_v1, %v5290_v45  ;;  %v5331_v1 = vrot.slane %v6700_v56, %v9431_v28  ;;  %s394_s12 = scalar_lea.vmem [#allocation4], %s5801_s16 }
 0xa2b   : > { %s5723_s19 = sshll.u32 %s394_s12, 4  ;;  %s10021_s19 = int_to_ptr.vmem [resolvable:$true] %s5723_s19 }
 0xa2c   : > { %v5292_v62 = vadd.f32 %v5291_v47, %v5285_v44  ;;  %s7760_s14 = scalar_lea.vmem %s10021_s19, 1024  ;;  %p7767_p0 = scmp.lt.s32.totalorder %s10021_s19, %s7765_s15 }
 0xa2d   : > { %p7761_p11 = scmp.ne.s32.totalorder %s10021_s19, %s7760_s14  ;;  %p7768_p1 = scmp.lt.s32.totalorder %s7766_s26, %s7760_s14 }
 0xa2e   : > { %v5297_v21 = vrot.slane %v5292_v62, %v9419_v23  ;;  %v5301_v4 = vrot.slane %v5292_v62, %v9431_v28 }
 0xa2f   : > { %p7762_p12 = pnand %p7761_p11, %p7924_p5  ;;  %p7769_p2 = por %p7768_p1, %p7767_p0 }
 0xa30   : > { %v5304_v8 = vmul.f32 %v5297_v21, %v9900_v49  ;;  %v5305_v5 = vmul.f32 %v5301_v4, %v9902_v32  ;;  %v5306_v63 = vmul.f32 %v5297_v21, %v9904_v50  ;;  %v5307_v9 = vmul.f32 %v5301_v4, %v9906_v52  ;;  %v7683_v21 = vld [vmem:[%s10076_s9 + $0x8] sm:$0xff]   ;;  %v7684_v4 = vld [vmem:[%s10076_s9 + $0x10] sm:$0xff]  }
 0xa31   : > { %p7763_p13 = pneg %p7762_p12 }
 0xa32   : > { %v5319_v42 = vmul.f32 %v5312_v59, %v5304_v8  ;;  %v5320_v40 = vmul.f32 %v5316_v19, %v5305_v5  ;;  %v5321_v58 = vmul.f32 %v5312_v59, %v5306_v63  ;;  %v5322_v33 = vmul.f32 %v5316_v19, %v5307_v9  ;;  %v7685_v59 = vld [vmem:[%s10076_s9 + $0x18] sm:$0xff]  }
 0xa33   : > { %p7770_p3 = pnand %p7769_p2, %p7763_p13 }
 0xa34   : > { %v5334_v48 = vadd.f32 %v5327_v2, %v5319_v42  ;;  %v5336_v6 = vadd.f32 %v5327_v2, %v5321_v58  ;;  %v5335_v55 = vadd.f32 %v5331_v1, %v5320_v40  ;;  %v5337_v61 = vadd.f32 %v5331_v1, %v5322_v33 }
 0xa36   : > { %v5338_v15 = vmul.f32 1.442695, %v5334_v48  ;;  %v5342_v23 = vmul.f32 1.442695, %v5336_v6  ;;  %v5340_v17 = vmul.f32 1.442695, %v5335_v55 }
 0xa37   : > { %v5344_v28 = vmul.f32 1.442695, %v5337_v61 }
 0xa38   : > { %7712 = vpow2.f32 %v5338_v15 }
 0xa39   : > { %7714 = vpow2.f32 %v5342_v23 }
 0xa3a   : > { %7716 = vpow2.f32 %v5340_v17 }
 0xa3b   : > { %7718 = vpow2.f32 %v5344_v28 }
 0xa45   : > { %v7713_v49 = vpop.eup %7712 }
 0xa46   : > { %v7715_v32 = vpop.eup %7714  ;;  %v5346_v50 = vadd.f32 1.0, %v7713_v49 }
 0xa47   : > { %v7717_v52 = vpop.eup %7716  ;;  %v5348_v54 = vadd.f32 1.0, %v7715_v32 }
 0xa48   : > { %v7719_v3 = vpop.eup %7718  ;;  %v5347_v51 = vadd.f32 1.0, %v7717_v52  ;;  %v5350_v18 = vmul.f32 %v5346_v50, %v5346_v50 }
 0xa49   : > { %v5349_v20 = vadd.f32 1.0, %v7719_v3  ;;  %v5352_v26 = vmul.f32 %v5348_v54, %v5348_v54 }
 0xa4a   : > { %v5351_v22 = vmul.f32 %v5347_v51, %v5347_v51  ;;  %v5354_v60 = vadd.f32 1.0, %v5350_v18 }
 0xa4b   : > { %v5353_v7 = vmul.f32 %v5349_v20, %v5349_v20  ;;  %v5356_v10 = vadd.f32 1.0, %v5352_v26 }
 0xa4c   : > { %v5355_v24 = vadd.f32 1.0, %v5351_v22  ;;  %7720 = vrcp.f32 %v5354_v60 }
 0xa4d   : > { %v5357_v0 = vadd.f32 1.0, %v5353_v7  ;;  %7722 = vrcp.f32 %v5356_v10 }
 0xa4e   : > { %7724 = vrcp.f32 %v5355_v24 }
 0xa4f   : > { %7726 = vrcp.f32 %v5357_v0 }
 0xa59   : > { %v7721_v13 = vpop.eup %7720 }
 0xa5a   : > { %v7723_v57 = vpop.eup %7722  ;;  %v5362_v46 = vmul.f32 2.0, %v7721_v13 }
 0xa5b   : > { %v7725_v11 = vpop.eup %7724  ;;  %v5364_v27 = vmul.f32 2.0, %v7723_v57 }
 0xa5c   : > { %v7727_v14 = vpop.eup %7726  ;;  %v5363_v12 = vmul.f32 2.0, %v7725_v11  ;;  %v5366_v25 = vsub.f32 1.0, %v5362_v46 }
 0xa5d   : > { %v5365_v35 = vmul.f32 2.0, %v7727_v14  ;;  %v5368_v34 = vsub.f32 1.0, %v5364_v27 }
 0xa5e   : > { %v5367_v36 = vsub.f32 1.0, %v5363_v12  ;;  %v5370_v29 = vmul.f32 %v5366_v25, %v5334_v48 }
 0xa5f   : > { %v5369_v38 = vsub.f32 1.0, %v5365_v35  ;;  %v5372_v39 = vmul.f32 %v5368_v34, %v5336_v6 }
 0xa60   : > { %v5371_v16 = vmul.f32 %v5367_v36, %v5335_v55 }
 0xa61   : > { %v5373_v41 = vmul.f32 %v5369_v38, %v5337_v61  ;;  %v5374_v30 = vpack.c.bf16 %v5372_v39, %v5370_v29 }
 0xa63   : > { %v5375_v37 = vpack.c.bf16 %v5373_v41, %v5371_v16 }
 0xa65   : > { %5536 = vmatprep.mubr.bf16.mxu0 %v5375_v37 }
 0xa66   : > { %5537 = vmatmul.mubr.bf16.vlgmr.msra.gmra.mxu0 %v5374_v30 }
 0xa67   : > { %6776 = vmatprep.mubr.msk.bf16.mxu0 %vm5574_vm5, %v7682_v31 }
 0xb26   : > { %v6763_v43 = vpop.f32.mrf.mxu0 }
 0xb28   : > { %v6764_v44 = vpop.f32.mrf.mxu0 }
 0xb29   : > { %v6765_v53 = vadd.f32 %v6764_v44, %v6763_v43 }
 0xb2a   : > { %v6766_v45 = vpop.f32.mrf.mxu0 }
 0xb2c   : > { %v6767_v47 = vpop.f32.mrf.mxu0 }
 0xb2d   : > { %v6768_v56 = vadd.f32 %v6767_v47, %v6766_v45 }
 0xb2f   : > { %v5553_v62 = vpack.c.bf16 %v6768_v56, %v6765_v53 }
 0xb31   : > { %6774 = vmatprep.subr.bf16.mxu0 %v5553_v62 }
 0xb32   : > { %6775 = vmatpush3.bf16.msra.mxu0 %v5553_v62 }
 0xb35   : > { %6777 = vmatmul.mubr.msk.bf16.vlgmr.msra.gmra.mxu0 %vm5574_vm5, %v7683_v21 }
 0xb36   : > { %6780 = vmatprep.mubr.msk.bf16.mxu0 %vm5574_vm5, %v7684_v4 }
 0xb3d   : > { %6781 = vmatmul.mubr.msk.bf16.gmra.mxu0 %vm5574_vm5, %v7685_v59 }
 0xbf5   : > { %v6778_v19 = vpop.f32.mrf.mxu0 }
 0xbf6   : > { %v6728_v2 = vmul.f32 -1.442695, %v6778_v19 }
 0xbf7   : > { %v5621_v1 = vpop.f32.mrf.mxu0 }
 0xbf8   : > { %7728 = vpow2.f32 %v6728_v2  ;;  %v6726_v8 = vmul.f32 -1.442695, %v5621_v1 }
 0xbf9   : > { %v6779_v5 = vpop.f32.mrf.mxu0 }
 0xbfa   : > { %7730 = vpow2.f32 %v6726_v8  ;;  %v6729_v63 = vmul.f32 -1.442695, %v6779_v5 }
 0xbfb   : > { %v5624_v9 = vpop.f32.mrf.mxu0 }
 0xbfc   : > { %7732 = vpow2.f32 %v6729_v63  ;;  %v6727_v42 = vmul.f32 -1.442695, %v5624_v9 }
 0xbfd   : > { %v6782_v40 = vpop.f32.mrf.mxu0 }
 0xbfe   : > { %7734 = vpow2.f32 %v6727_v42  ;;  %v6732_v58 = vmul.f32 -1.442695, %v6782_v40 }
 0xbff   : > { %v5637_v33 = vpop.f32.mrf.mxu0 }
 0xc00   : > { %7736 = vpow2.f32 %v6732_v58  ;;  %v6730_v48 = vmul.f32 -1.442695, %v5637_v33 }
 0xc01   : > { %v6783_v6 = vpop.f32.mrf.mxu0 }
 0xc02   : > { %7738 = vpow2.f32 %v6730_v48  ;;  %v6733_v55 = vmul.f32 -1.442695, %v6783_v6 }
 0xc03   : > { %v5640_v61 = vpop.f32.mrf.mxu0 }
 0xc04   : > { %7740 = vpow2.f32 %v6733_v55  ;;  %v6731_v15 = vmul.f32 -1.442695, %v5640_v61 }
 0xc05   : > { %v7729_v23 = vpop.eup %7728 }
 0xc06   : > { %v5678_v17 = vadd.f32 1.0, %v7729_v23  ;;  %7742 = vpow2.f32 %v6731_v15 }
 0xc07   : > { %v7731_v28 = vpop.eup %7730 }
 0xc08   : > { %7744 = vrcp.f32 %v5678_v17  ;;  %v5676_v49 = vadd.f32 1.0, %v7731_v28 }
 0xc09   : > { %v7733_v32 = vpop.eup %7732 }
 0xc0a   : > { %7746 = vrcp.f32 %v5676_v49  ;;  %v5679_v50 = vadd.f32 1.0, %v7733_v32 }
 0xc0b   : > { %v7735_v52 = vpop.eup %7734 }
 0xc0c   : > { %7748 = vrcp.f32 %v5679_v50  ;;  %v5677_v54 = vadd.f32 1.0, %v7735_v52 }
 0xc0d   : > { %v7737_v3 = vpop.eup %7736 }
 0xc0e   : > { %7750 = vrcp.f32 %v5677_v54  ;;  %v5682_v51 = vadd.f32 1.0, %v7737_v3 }
 0xc0f   : > { %v7739_v18 = vpop.eup %7738 }
 0xc10   : > { %7752 = vrcp.f32 %v5682_v51  ;;  %v5680_v20 = vadd.f32 1.0, %v7739_v18 }
 0xc11   : > { %v7741_v26 = vpop.eup %7740 }
 0xc12   : > { %7754 = vrcp.f32 %v5680_v20  ;;  %v5683_v22 = vadd.f32 1.0, %v7741_v26 }
 0xc13   : > { %v7743_v60 = vpop.eup %7742 }
 0xc14   : > { %7756 = vrcp.f32 %v5683_v22  ;;  %v5681_v7 = vadd.f32 1.0, %v7743_v60 }
 0xc15   : > { %v7745_v10 = vpop.eup %7744 }
 0xc16   : > { %5703 = vst.msk [vmem:[%s394_s12 + $0x10] sm:$0xff] %vm5700_vm7, %v7745_v10  ;;  %7758 = vrcp.f32 %v5681_v7 }
 0xc17   : > { %v7747_v24 = vpop.eup %7746 }
 0xc18   : > { %5701 = vst.msk [vmem:[%s394_s12] sm:$0xff] %vm5700_vm7, %v7747_v24 }
 0xc19   : > { %v7749_v0 = vpop.eup %7748 }
 0xc1a   : > { %5704 = vst.msk [vmem:[%s394_s12 + $0x18] sm:$0xff] %vm5700_vm7, %v7749_v0 }
 0xc1b   : > { %v7751_v13 = vpop.eup %7750 }
 0xc1c   : > { %5702 = vst.msk [vmem:[%s394_s12 + $0x8] sm:$0xff] %vm5700_vm7, %v7751_v13 }
 0xc1d   : > { %v7753_v57 = vpop.eup %7752 }
 0xc1e   : > { %5707 = vst.msk [vmem:[%s394_s12 + $0x30] sm:$0xff] %vm5700_vm7, %v7753_v57 }
 0xc1f   : > { %v7755_v46 = vpop.eup %7754 }
 0xc20   : > { %5705 = vst.msk [vmem:[%s394_s12 + $0x20] sm:$0xff] %vm5700_vm7, %v7755_v46 }
 0xc21   : > { %v7757_v11 = vpop.eup %7756 }
 0xc22   : > { %5708 = vst.msk [vmem:[%s394_s12 + $0x38] sm:$0xff] %vm5700_vm7, %v7757_v11 }
 0xc23   : > { %v7759_v27 = vpop.eup %7758 }
 0xc24   : > { %5706 = vst.msk [vmem:[%s394_s12 + $0x28] sm:$0xff] %vm5700_vm7, %v7759_v27 }
 0xc25   : > { %7773 = shalt.err (!%p7770_p3)
}
 0xc26   : > { %s7774_s23 = scalar_lea.hbm %s10019_s22, 1024  ;;  %s7778_s16 = scalar_lea.hbm %s10078_s11, 2048 }
 0xc27   : > { %p7775_p4 = scmp.ne.s32.totalorder %s10019_s22, %s7774_s23  ;;  %p7779_p9 = scmp.lt.s32.totalorder %s10019_s22, %s10078_s11 }
 0xc28   : > { %p7780_p10 = scmp.lt.s32.totalorder %s7778_s16, %s7774_s23 }
 0xc29   : > { %p7776_p7 = pnand %p7775_p4, %p7924_p5 }
 0xc2a   : > { %p7781_p11 = por %p7780_p10, %p7779_p9 }
 0xc2b   : > { %p7777_p8 = pneg %p7776_p7 }
 0xc2d   : > { %p7782_p12 = pnand %p7781_p11, %p7777_p8 }
 0xc2f   : > { %7785 = shalt.err (!%p7782_p12)
}
 0xc30   : > { %s7824_s29 = smov 128   ;;  %s7825_s24 = smov 8  }
 0xc31   : > { %6815 = dma.vmem_to_hbm [thread:$0]  (%p7924_p5), %s10021_s19, 1024, %s10019_s22, %s10027_s21, %s7824_s29, %s7824_s29, %s7825_s24  }
 0xc32 PF: > { %p6821_p13 = scmp.ge.s32.totalorder %s7820_s20, 2  ;;  %s5738_s14 = sand.u32 1, %s7808_s17  }
 0xc33   : > { %s5739_s13 = scalar_lea.sflag [#allocation5], %s5738_s14 }
 0xc34   : > { %p6818_p0 = pnand %p6821_p13, %p7928_p6 }
 0xc36   : > { %p6819_p1 = pneg %p6818_p0 }
 0xc38   : > { %7803 = dma.done.wait (%p6819_p1), %s5739_s13, 1024  }
 0xc39   : > { %7805 = vsyncadd (%p6819_p1), %s5739_s13, 4294966272  ;;  %s10099_s20 = sld [smem:[#allocation8_spill]]  ;;  %s10102_s17 = smov %s7812_s18 }
 0xc3a   : > { %s10100_s15 = sld [smem:[#allocation7_spill]] }
 0xc3b   : > { %s10101_s19 = sld [smem:[#allocation9_spill]] }
 0xc3f   : > { %p21_p2 = scmp.ge.s32.totalorder %s10099_s20, 4  }
 0xc40   : > { %s10103_s18 = smov %s10100_s15 }
 0xc41   :  { %23 = sbr.rel (!%p21_p2) target bundleno = 5 (0x5), region = 114 }
 0xc46   :  { %5744 = vsyncpa [#allocation5], 1 }
 0xc47   :  { %5746 = vsyncpa [#allocation5 + $0x1], 1 }

</bundles_post_ra>
